<compile_context>
chip_gen: v5e
topology: v5e:2x2
jax: 0.10.0
libtpu: 0.0.40
codegen_flags: <defaults>
</compile_context>

<pallas_src>
import functools

import jax
import jax.numpy as jnp
from jax import lax
from jax.experimental import pallas as pl
from jax.experimental.pallas import tpu as pltpu

EPS = 1e-5
EXPANSION = 4
LANE = 128            # TPU lane width: keep every channel axis a multiple of this.
MAX_TILE_M = 256      # rows per block; multiple of 8, comfortably inside the 32 MiB
                      # scoped-VMEM default even on v7x (64 MiB physical).
VMEM_LIMIT_BYTES = 32 * 1024 * 1024
# Set to jnp.bfloat16 for ~3-4x MXU throughput on v6e/v7x (slightly different numerics).
MATMUL_DTYPE = jnp.float32


def _round_up(x, m):
    return ((x + m - 1) // m) * m


def _pick_tile_m(m):
    for t in (MAX_TILE_M, 128, 64, 32, 16, 8):
        if t <= m and m % t == 0:
            return t
    return m


def _cparams(semantics):
    return pltpu.CompilerParams(dimension_semantics=semantics,
                                vmem_limit_bytes=VMEM_LIMIT_BYTES)


# ---------------------------------------------------------------------------
# Kernels
# ---------------------------------------------------------------------------
def matmul_stats_kernel(x_ref, w_ref, y_ref, s_ref, q_ref):
    """y = x @ w for one (TM, K) tile; accumulate per-channel sum / sum-of-squares."""
    @pl.when(pl.program_id(0) == 0)
    def _():
        s_ref[...] = jnp.zeros_like(s_ref)
        q_ref[...] = jnp.zeros_like(q_ref)

    y = jnp.dot(x_ref[...].astype(MATMUL_DTYPE), w_ref[...].astype(MATMUL_DTYPE),
                preferred_element_type=jnp.float32)
    y_ref[...] = y
    s_ref[...] += jnp.sum(y, axis=0, keepdims=True)
    q_ref[...] += jnp.sum(y * y, axis=0, keepdims=True)


def dual_matmul_stats_kernel(a_ref, wa_ref, b_ref, wb_ref,
                             ya_ref, yb_ref, sa_ref, qa_ref, sb_ref, qb_ref):
    """conv3 and the 1x1 shortcut conv share the same M grid: fuse both matmuls + stats."""
    @pl.when(pl.program_id(0) == 0)
    def _():
        sa_ref[...] = jnp.zeros_like(sa_ref)
        qa_ref[...] = jnp.zeros_like(qa_ref)
        sb_ref[...] = jnp.zeros_like(sb_ref)
        qb_ref[...] = jnp.zeros_like(qb_ref)

    ya = jnp.dot(a_ref[...].astype(MATMUL_DTYPE), wa_ref[...].astype(MATMUL_DTYPE),
                 preferred_element_type=jnp.float32)
    yb = jnp.dot(b_ref[...].astype(MATMUL_DTYPE), wb_ref[...].astype(MATMUL_DTYPE),
                 preferred_element_type=jnp.float32)
    ya_ref[...] = ya
    yb_ref[...] = yb
    sa_ref[...] += jnp.sum(ya, axis=0, keepdims=True)
    qa_ref[...] += jnp.sum(ya * ya, axis=0, keepdims=True)
    sb_ref[...] += jnp.sum(yb, axis=0, keepdims=True)
    qb_ref[...] += jnp.sum(yb * yb, axis=0, keepdims=True)


def affine_relu_kernel(y_ref, s_ref, b_ref, o_ref):
    """BN epilogue folded into one per-channel FMA: relu(y*scale + bias)."""
    o_ref[...] = jnp.maximum(y_ref[...] * s_ref[...] + b_ref[...], 0.0)


def affine_add_id_relu_kernel(y_ref, s_ref, b_ref, sc_ref, o_ref):
    """BN3 affine + identity-shortcut add + final ReLU."""
    o_ref[...] = jnp.maximum(y_ref[...] * s_ref[...] + b_ref[...] + sc_ref[...], 0.0)


def affine2_add_relu_kernel(ya_ref, sa_ref, ba_ref, yb_ref, sb_ref, bb_ref, o_ref):
    """BN3 affine + shortcut-BN affine + add + final ReLU."""
    o_ref[...] = jnp.maximum(
        ya_ref[...] * sa_ref[...] + ba_ref[...] +
        yb_ref[...] * sb_ref[...] + bb_ref[...], 0.0)


# ---------------------------------------------------------------------------
# pallas_call wrappers (gridded over the flattened spatial axis M)
# ---------------------------------------------------------------------------
def _conv_with_stats(x2d, w):
    m, k = x2d.shape
    c = w.shape[1]
    tm = _pick_tile_m(m)
    row_in = pl.BlockSpec((tm, k), lambda i: (i, 0))
    w_res = pl.BlockSpec((k, c), lambda i: (0, 0))
    row_out = pl.BlockSpec((tm, c), lambda i: (i, 0))
    vec_out = pl.BlockSpec((1, c), lambda i: (0, 0))
    return pl.pallas_call(
        matmul_stats_kernel,
        grid=(m // tm,),
        in_specs=[row_in, w_res],
        out_specs=[row_out, vec_out, vec_out],
        out_shape=[jax.ShapeDtypeStruct((m, c), jnp.float32),
                   jax.ShapeDtypeStruct((1, c), jnp.float32),
                   jax.ShapeDtypeStruct((1, c), jnp.float32)],
        compiler_params=_cparams(("arbitrary",)),   # resident stat accumulators
    )(x2d, w)


def _dual_conv_with_stats(a2d, wa, b2d, wb):
    m, ka = a2d.shape
    kb = b2d.shape[1]
    ca, cb = wa.shape[1], wb.shape[1]
    tm = _pick_tile_m(m)
    return pl.pallas_call(
        dual_matmul_stats_kernel,
        grid=(m // tm,),
        in_specs=[pl.BlockSpec((tm, ka), lambda i: (i, 0)),
                  pl.BlockSpec((ka, ca), lambda i: (0, 0)),
                  pl.BlockSpec((tm, kb), lambda i: (i, 0)),
                  pl.BlockSpec((kb, cb), lambda i: (0, 0))],
        out_specs=[pl.BlockSpec((tm, ca), lambda i: (i, 0)),
                   pl.BlockSpec((tm, cb), lambda i: (i, 0)),
                   pl.BlockSpec((1, ca), lambda i: (0, 0)),
                   pl.BlockSpec((1, ca), lambda i: (0, 0)),
                   pl.BlockSpec((1, cb), lambda i: (0, 0)),
                   pl.BlockSpec((1, cb), lambda i: (0, 0))],
        out_shape=[jax.ShapeDtypeStruct((m, ca), jnp.float32),
                   jax.ShapeDtypeStruct((m, cb), jnp.float32),
                   jax.ShapeDtypeStruct((1, ca), jnp.float32),
                   jax.ShapeDtypeStruct((1, ca), jnp.float32),
                   jax.ShapeDtypeStruct((1, cb), jnp.float32),
                   jax.ShapeDtypeStruct((1, cb), jnp.float32)],
        compiler_params=_cparams(("arbitrary",)),
    )(a2d, wa, b2d, wb)


def _affine_relu(y, scale, bias):
    m, c = y.shape
    tm = _pick_tile_m(m)
    row = pl.BlockSpec((tm, c), lambda i: (i, 0))
    vec = pl.BlockSpec((1, c), lambda i: (0, 0))
    return pl.pallas_call(
        affine_relu_kernel,
        grid=(m // tm,),
        in_specs=[row, vec, vec],
        out_specs=row,
        out_shape=jax.ShapeDtypeStruct((m, c), jnp.float32),
        compiler_params=_cparams(("parallel",)),
    )(y, scale, bias)


def _affine_add_id_relu(y, scale, bias, sc):
    m, c = y.shape
    tm = _pick_tile_m(m)
    row = pl.BlockSpec((tm, c), lambda i: (i, 0))
    vec = pl.BlockSpec((1, c), lambda i: (0, 0))
    return pl.pallas_call(
        affine_add_id_relu_kernel,
        grid=(m // tm,),
        in_specs=[row, vec, vec, row],
        out_specs=row,
        out_shape=jax.ShapeDtypeStruct((m, c), jnp.float32),
        compiler_params=_cparams(("parallel",)),
    )(y, scale, bias, sc)


def _affine2_add_relu(ya, sa, ba, yb, sb, bb):
    m, c = ya.shape
    tm = _pick_tile_m(m)
    row = pl.BlockSpec((tm, c), lambda i: (i, 0))
    vec = pl.BlockSpec((1, c), lambda i: (0, 0))
    return pl.pallas_call(
        affine2_add_relu_kernel,
        grid=(m // tm,),
        in_specs=[row, vec, vec, row, vec, vec],
        out_specs=row,
        out_shape=jax.ShapeDtypeStruct((m, c), jnp.float32),
        compiler_params=_cparams(("parallel",)),
    )(ya, sa, ba, yb, sb, bb)


# ---------------------------------------------------------------------------
# Host glue: BN stat finalization, masks, params, padding helpers
# ---------------------------------------------------------------------------
def _bn_scale_bias(colsum, colssq, count, gamma, beta):
    # training-mode BN (biased variance) folded into one per-channel FMA
    mean = colsum / count
    var = jnp.maximum(colssq / count - mean * mean, 0.0)
    scale = gamma * lax.rsqrt(var + EPS)
    bias = beta - mean * scale
    return scale, bias


def build_masks(switch, zip_channels):
    out_channels = EXPANSION * zip_channels
    halflen = int(len(switch) / 6)
    m1 = [1.0] * zip_channels
    m2 = [1.0] * zip_channels
    m3 = [1.0] * out_channels
    for i in range(0, halflen):
        if switch[i] == 0:
            m1[i] = 0.0
    for i in range(halflen, halflen * 2):
        if switch[i] == 0:
            m2[i - halflen] = 0.0
    for i in range(halflen * 2, len(switch)):
        if switch[i] == 0:
            m3[i - halflen - halflen] = 0.0
    return (jnp.asarray(m1, jnp.float32),
            jnp.asarray(m2, jnp.float32),
            jnp.asarray(m3, jnp.float32))


def init_params(key, in_channels, zip_channels, stride):
    out_channels = EXPANSION * zip_channels
    k1, k2, k3, k4 = jax.random.split(key, 4)
    params = {
        # conv weights stored channel-last: (Cin, Cout) / HWIO (3, 3, Cin, Cout)
        "w1": 0.1 * jax.random.normal(k1, (in_channels, zip_channels), jnp.float32),
        "w2": 0.1 * jax.random.normal(k2, (3, 3, zip_channels, zip_channels), jnp.float32),
        "w3": 0.1 * jax.random.normal(k3, (zip_channels, out_channels), jnp.float32),
        "g1": jnp.ones((zip_channels,), jnp.float32),
        "b1": jnp.zeros((zip_channels,), jnp.float32),
        "g2": jnp.ones((zip_channels,), jnp.float32),
        "b2": jnp.zeros((zip_channels,), jnp.float32),
        "g3": jnp.ones((out_channels,), jnp.float32),
        "b3": jnp.zeros((out_channels,), jnp.float32),
    }
    if stride != 1 or in_channels != out_channels:
        params["wsc"] = 0.1 * jax.random.normal(k4, (in_channels, out_channels), jnp.float32)
        params["gsc"] = jnp.ones((out_channels,), jnp.float32)
        params["bsc"] = jnp.zeros((out_channels,), jnp.float32)
    return params


def _pad_cols(w, rows_p, cols_p):
    out = jnp.zeros((rows_p, cols_p), jnp.float32)
    return out.at[: w.shape[0], : w.shape[1]].set(w)


def _pad_gamma_beta(g, b, c_p):
    gp = jnp.ones((1, c_p), jnp.float32).at[:, : g.shape[0]].set(g[None, :])
    bp = jnp.zeros((1, c_p), jnp.float32).at[:, : b.shape[0]].set(b[None, :])
    return gp, bp


# ---------------------------------------------------------------------------
# Forward pass
# ---------------------------------------------------------------------------
def bottleneck_forward(x_nchw, params, switch, stride):
    n, cin, h, w = x_nchw.shape
    zipc = params["w1"].shape[1]
    cout = EXPANSION * zipc

    cin_p = _round_up(cin, LANE)
    zip_p = _round_up(zipc, LANE)
    cout_p = _round_up(cout, LANE)

    mask1, mask2, mask3 = build_masks(switch, zipc)

    # Fold switch-masks into weights (identical to masking the conv output pre-BN)
    # and zero-pad every channel axis to a lane-dense multiple of 128.
    w1 = _pad_cols(params["w1"] * mask1[None, :], cin_p, zip_p)
    w2 = jnp.zeros((3, 3, zip_p, zip_p), jnp.float32)
    w2 = w2.at[:, :, :zipc, :zipc].set(params["w2"] * mask2[None, None, None, :])
    w2 = w2.reshape(9 * zip_p, zip_p)        # rows ordered (dy, dx, cin) = im2col order
    w3 = _pad_cols(params["w3"] * mask3[None, :], zip_p, cout_p)

    g1, b1 = _pad_gamma_beta(params["g1"], params["b1"], zip_p)
    g2, b2 = _pad_gamma_beta(params["g2"], params["b2"], zip_p)
    g3, b3 = _pad_gamma_beta(params["g3"], params["b3"], cout_p)

    # NCHW -> NHWC, channel-pad (padded channels stay exactly zero throughout).
    x = jnp.transpose(x_nchw, (0, 2, 3, 1))
    x_p = jnp.pad(x, ((0, 0), (0, 0), (0, 0), (0, cin_p - cin)))
    m1cnt = n * h * w
    x2d = x_p.reshape(m1cnt, cin_p)

    # ---- stage 1: conv1 (1x1) -> BN1 -> ReLU (two-pass BN) ----
    y1, s1, q1 = _conv_with_stats(x2d, w1)
    sc1, bi1 = _bn_scale_bias(s1, q1, float(m1cnt), g1, b1)
    h1 = _affine_relu(y1, sc1, bi1)

    # ---- stage 2: conv2 (3x3, stride, pad=1) -> BN2 -> ReLU ----
    ho = (h + 2 - 3) // stride + 1
    wo = (w + 2 - 3) // stride + 1
    m2cnt = n * ho * wo
    # im2col in the wrapper so the kernel is a single K = 9*C MXU matmul.
    # TODO(synk): replace wrapper im2col with BlockSpec halo windows to avoid
    #             materializing the 9x-expanded activation in HBM.
    h1_pad = jnp.pad(h1.reshape(n, h, w, zip_p), ((0, 0), (1, 1), (1, 1), (0, 0)))
    cols = []
    for dy in range(3):
        for dx in range(3):
            cols.append(h1_pad[:, dy:dy + (ho - 1) * stride + 1:stride,
                                  dx:dx + (wo - 1) * stride + 1:stride, :])
    x_col = jnp.concatenate(cols, axis=-1).reshape(m2cnt, 9 * zip_p)

    y2, s2, q2 = _conv_with_stats(x_col, w2)
    sc2, bi2 = _bn_scale_bias(s2, q2, float(m2cnt), g2, b2)
    h2 = _affine_relu(y2, sc2, bi2)

    # ---- stage 3: conv3 (1x1) -> BN3, shortcut, add, final ReLU ----
    if "wsc" in params:
        wsc = _pad_cols(params["wsc"], cin_p, cout_p)
        gsc, bsc = _pad_gamma_beta(params["gsc"], params["bsc"], cout_p)
        x_sub = x_p[:, ::stride, ::stride, :].reshape(m2cnt, cin_p)
        y3, ysc, s3, q3, ssc, qsc = _dual_conv_with_stats(h2, w3, x_sub, wsc)
        sc3, bi3 = _bn_scale_bias(s3, q3, float(m2cnt), g3, b3)
        scs, bis = _bn_scale_bias(ssc, qsc, float(m2cnt), gsc, bsc)
        out2d = _affine2_add_relu(y3, sc3, bi3, ysc, scs, bis)
    else:
        # identity shortcut (only when stride == 1 and cin == cout -> cin_p == cout_p)
        y3, s3, q3 = _conv_with_stats(h2, w3)
        sc3, bi3 = _bn_scale_bias(s3, q3, float(m2cnt), g3, b3)
        out2d = _affine_add_id_relu(y3, sc3, bi3, x2d)

    out = out2d[:, :cout].reshape(n, ho, wo, cout)
    return jnp.transpose(out, (0, 3, 1, 2))     # NHWC -> NCHW


# ---------------------------------------------------------------------------
# Pure-JAX reference (mirrors the torch module in training mode) + demo
# ---------------------------------------------------------------------------
def _reference_forward(x_nchw, params, switch, stride):
    zipc = params["w1"].shape[1]
    mask1, mask2, mask3 = build_masks(switch, zipc)

    def bn(y, gamma, beta):
        mean = jnp.mean(y, axis=(0, 1, 2), keepdims=True)
        var = jnp.mean((y - mean) ** 2, axis=(0, 1, 2), keepdims=True)
        return gamma * (y - mean) * lax.rsqrt(var + EPS) + beta

    x = jnp.transpose(x_nchw, (0, 2, 3, 1))
    y = jnp.einsum("nhwc,co->nhwo", x, params["w1"]) * mask1
    y = jax.nn.relu(bn(y, params["g1"], params["b1"]))
    y = lax.conv_general_dilated(y, params["w2"], (stride, stride), ((1, 1), (1, 1)),
                                 dimension_numbers=("NHWC", "HWIO", "NHWC")) * mask2
    y = jax.nn.relu(bn(y, params["g2"], params["b2"]))
    y = jnp.einsum("nhwc,co->nhwo", y, params["w3"]) * mask3
    y = bn(y, params["g3"], params["b3"])
    if "wsc" in params:
        sc = jnp.einsum("nhwc,co->nhwo", x[:, ::stride, ::stride, :], params["wsc"])
        sc = bn(sc, params["gsc"], params["bsc"])
    else:
        sc = x
    return jnp.transpose(jax.nn.relu(y + sc), (0, 3, 1, 2))


if __name__ == "__main__":
    key = jax.random.PRNGKey(0)
    k_param, k_x = jax.random.split(key)

    N, CIN, H, W = 2, 4, 16, 16
    ZIP = 4
    STRIDE = 1
    COUT = EXPANSION * ZIP            # 16

    params = init_params(k_param, CIN, ZIP, STRIDE)
    switch = [1, 0, 1, 1] * (6 * ZIP // 4)       # deterministic on/off channel pattern
    x = jax.random.normal(k_x, (N, CIN, H, W), jnp.float32)

    fwd = jax.jit(lambda xx, pp: bottleneck_forward(xx, pp, switch, STRIDE))
    out = jax.block_until_ready(fwd(x, params))

    ho = (H + 2 - 3) // STRIDE + 1
    wo = (W + 2 - 3) // STRIDE + 1
    assert out.shape == (N, COUT, ho, wo), out.shape

    ref = jax.block_until_ready(_reference_forward(x, params, switch, STRIDE))
    max_err = float(jnp.max(jnp.abs(out - ref)))
    assert max_err < 2e-3, f"max abs error vs reference: {max_err}"

    print("KERNEL_OK")
</pallas_src>

<mosaic_0001>
module attributes {stable_mosaic.version = 11 : i64} {
  func.func @affine_relu_kernel(%arg0: i32, %arg1: memref<256x128xf32, #tpu.memory_space<vmem>>, %arg2: memref<1x128xf32, #tpu.memory_space<vmem>>, %arg3: memref<1x128xf32, #tpu.memory_space<vmem>>, %arg4: memref<256x128xf32, #tpu.memory_space<vmem>>) attributes {dimension_semantics = [#tpu.dimension_semantics<parallel>], iteration_bounds = array<i64: 2>, scalar_prefetch = 0 : i64, scratch_operands = 0 : i64, tpu.core_type = #tpu.core_type<tc>, window_params = [{transform_indices = @transform_0, window_bounds = array<i64: 256, 128>}, {pipeline_mode = #tpu.pipeline_mode<synchronous>, transform_indices = @transform_1, window_bounds = array<i64: 1, 128>}, {pipeline_mode = #tpu.pipeline_mode<synchronous>, transform_indices = @transform_2, window_bounds = array<i64: 1, 128>}, {transform_indices = @transform_3, window_bounds = array<i64: 256, 128>}]} {
    %c0 = arith.constant 0 : index
    %c0_0 = arith.constant 0 : index
    %0 = vector.load %arg1[%c0, %c0_0] : memref<256x128xf32, #tpu.memory_space<vmem>>, vector<256x128xf32>
    %c0_1 = arith.constant 0 : index
    %c0_2 = arith.constant 0 : index
    %1 = vector.load %arg2[%c0_1, %c0_2] : memref<1x128xf32, #tpu.memory_space<vmem>>, vector<1x128xf32>
    %2 = vector.broadcast %1 : vector<1x128xf32> to vector<256x128xf32>
    %3 = arith.mulf %0, %2 : vector<256x128xf32>
    %c0_3 = arith.constant 0 : index
    %c0_4 = arith.constant 0 : index
    %4 = vector.load %arg3[%c0_3, %c0_4] : memref<1x128xf32, #tpu.memory_space<vmem>>, vector<1x128xf32>
    %5 = vector.broadcast %4 : vector<1x128xf32> to vector<256x128xf32>
    %6 = arith.addf %3, %5 : vector<256x128xf32>
    %cst = arith.constant 0.000000e+00 : f32
    %7 = vector.broadcast %cst : f32 to vector<256x128xf32>
    %8 = arith.maximumf %6, %7 : vector<256x128xf32>
    %c0_5 = arith.constant 0 : index
    %c0_6 = arith.constant 0 : index
    %9 = vector.load %arg4[%c0_5, %c0_6] : memref<256x128xf32, #tpu.memory_space<vmem>>, vector<256x128xf32>
    tpu.vector_store %arg4[%c0_5, %c0_6], %8 {strides = array<i32>} : memref<256x128xf32, #tpu.memory_space<vmem>>, vector<256x128xf32>,
    return
  }
  func.func @transform_0(%arg0: i32) -> (i32, i32) {
    %c0_i32 = arith.constant 0 : i32
    %c0_i32_0 = arith.constant 0 : i32
    return %arg0, %c0_i32 : i32, i32
  }
  func.func @transform_1(%arg0: i32) -> (i32, i32) {
    %c0_i32 = arith.constant 0 : i32
    %c0_i32_0 = arith.constant 0 : i32
    %c0_i32_1 = arith.constant 0 : i32
    return %c0_i32, %c0_i32_0 : i32, i32
  }
  func.func @transform_2(%arg0: i32) -> (i32, i32) {
    %c0_i32 = arith.constant 0 : i32
    %c0_i32_0 = arith.constant 0 : i32
    %c0_i32_1 = arith.constant 0 : i32
    return %c0_i32, %c0_i32_0 : i32, i32
  }
  func.func @transform_3(%arg0: i32) -> (i32, i32) {
    %c0_i32 = arith.constant 0 : i32
    %c0_i32_0 = arith.constant 0 : i32
    return %arg0, %c0_i32 : i32, i32
  }
}

module attributes {stable_mosaic.version = 11 : i64} {
  func.func @matmul_stats_kernel(%arg0: i32, %arg1: memref<256x128xf32, #tpu.memory_space<vmem>>, %arg2: memref<128x128xf32, #tpu.memory_space<vmem>>, %arg3: memref<256x128xf32, #tpu.memory_space<vmem>>, %arg4: memref<1x128xf32, #tpu.memory_space<vmem>>, %arg5: memref<1x128xf32, #tpu.memory_space<vmem>>) attributes {dimension_semantics = [#tpu.dimension_semantics<arbitrary>], iteration_bounds = array<i64: 2>, scalar_prefetch = 0 : i64, scratch_operands = 0 : i64, tpu.core_type = #tpu.core_type<tc>, window_params = [{transform_indices = @transform_0, window_bounds = array<i64: 256, 128>}, {pipeline_mode = #tpu.pipeline_mode<synchronous>, transform_indices = @transform_1, window_bounds = array<i64: 128, 128>}, {transform_indices = @transform_2, window_bounds = array<i64: 256, 128>}, {pipeline_mode = #tpu.pipeline_mode<synchronous>, transform_indices = @transform_3, window_bounds = array<i64: 1, 128>}, {pipeline_mode = #tpu.pipeline_mode<synchronous>, transform_indices = @transform_4, window_bounds = array<i64: 1, 128>}]} {
    %c0_i32 = arith.constant 0 : i32
    %0 = arith.cmpi eq, %arg0, %c0_i32 : i32
    %1 = arith.extui %0 : i1 to i32
    %c0_i32_0 = arith.constant 0 : i32
    %2 = arith.cmpi ne, %1, %c0_i32_0 : i32
    scf.if %2 {
      %cst_16 = arith.constant 0.000000e+00 : f32
      %18 = vector.broadcast %cst_16 : f32 to vector<1x128xf32>
      %c0_17 = arith.constant 0 : index
      %c0_18 = arith.constant 0 : index
      %19 = vector.load %arg4[%c0_17, %c0_18] : memref<1x128xf32, #tpu.memory_space<vmem>>, vector<1x128xf32>
      tpu.vector_store %arg4[%c0_17, %c0_18], %18 {strides = array<i32>} : memref<1x128xf32, #tpu.memory_space<vmem>>, vector<1x128xf32>,
      %cst_19 = arith.constant 0.000000e+00 : f32
      %20 = vector.broadcast %cst_19 : f32 to vector<1x128xf32>
      %c0_20 = arith.constant 0 : index
      %c0_21 = arith.constant 0 : index
      %21 = vector.load %arg5[%c0_20, %c0_21] : memref<1x128xf32, #tpu.memory_space<vmem>>, vector<1x128xf32>
      tpu.vector_store %arg5[%c0_20, %c0_21], %20 {strides = array<i32>} : memref<1x128xf32, #tpu.memory_space<vmem>>, vector<1x128xf32>,
    } else {
    }
    %c0 = arith.constant 0 : index
    %c0_1 = arith.constant 0 : index
    %3 = vector.load %arg1[%c0, %c0_1] : memref<256x128xf32, #tpu.memory_space<vmem>>, vector<256x128xf32>
    %c0_2 = arith.constant 0 : index
    %c0_3 = arith.constant 0 : index
    %4 = vector.load %arg2[%c0_2, %c0_3] : memref<128x128xf32, #tpu.memory_space<vmem>>, vector<128x128xf32>
    %cst = arith.constant dense<0.000000e+00> : vector<256x128xf32>
    %5 = tpu.matmul %3, %4, %cst {dimension_numbers = #tpu.dot_dimension_numbers<[1], [0], [0], [1], [0, 0, 1, 1], [], []>} : vector<256x128xf32>, vector<128x128xf32>, vector<256x128xf32> -> vector<256x128xf32>
    %c0_4 = arith.constant 0 : index
    %c0_5 = arith.constant 0 : index
    %6 = vector.load %arg3[%c0_4, %c0_5] : memref<256x128xf32, #tpu.memory_space<vmem>>, vector<256x128xf32>
    tpu.vector_store %arg3[%c0_4, %c0_5], %5 {strides = array<i32>} : memref<256x128xf32, #tpu.memory_space<vmem>>, vector<256x128xf32>,
    %c0_6 = arith.constant 0 : index
    %c0_7 = arith.constant 0 : index
    %7 = vector.load %arg4[%c0_6, %c0_7] : memref<1x128xf32, #tpu.memory_space<vmem>>, vector<1x128xf32>
    %cst_8 = arith.constant dense<0.000000e+00> : vector<128xf32>
    %8 = vector.multi_reduction <add>, %5, %cst_8 [0] : vector<256x128xf32> to vector<128xf32>
    %9 = vector.shape_cast %8 : vector<128xf32> to vector<1x128xf32>
    %10 = arith.addf %7, %9 : vector<1x128xf32>
    %c0_9 = arith.constant 0 : index
    %c0_10 = arith.constant 0 : index
    %11 = vector.load %arg4[%c0_9, %c0_10] : memref<1x128xf32, #tpu.memory_space<vmem>>, vector<1x128xf32>
    tpu.vector_store %arg4[%c0_9, %c0_10], %10 {strides = array<i32>} : memref<1x128xf32, #tpu.memory_space<vmem>>, vector<1x128xf32>,
    %c0_11 = arith.constant 0 : index
    %c0_12 = arith.constant 0 : index
    %12 = vector.load %arg5[%c0_11, %c0_12] : memref<1x128xf32, #tpu.memory_space<vmem>>, vector<1x128xf32>
    %13 = arith.mulf %5, %5 : vector<256x128xf32>
    %cst_13 = arith.constant dense<0.000000e+00> : vector<128xf32>
    %14 = vector.multi_reduction <add>, %13, %cst_13 [0] : vector<256x128xf32> to vector<128xf32>
    %15 = vector.shape_cast %14 : vector<128xf32> to vector<1x128xf32>
    %16 = arith.addf %12, %15 : vector<1x128xf32>
    %c0_14 = arith.constant 0 : index
    %c0_15 = arith.constant 0 : index
    %17 = vector.load %arg5[%c0_14, %c0_15] : memref<1x128xf32, #tpu.memory_space<vmem>>, vector<1x128xf32>
    tpu.vector_store %arg5[%c0_14, %c0_15], %16 {strides = array<i32>} : memref<1x128xf32, #tpu.memory_space<vmem>>, vector<1x128xf32>,
    return
  }
  func.func @transform_0(%arg0: i32) -> (i32, i32) {
    %c0_i32 = arith.constant 0 : i32
    %c0_i32_0 = arith.constant 0 : i32
    return %arg0, %c0_i32 : i32, i32
  }
  func.func @transform_1(%arg0: i32) -> (i32, i32) {
    %c0_i32 = arith.constant 0 : i32
    %c0_i32_0 = arith.constant 0 : i32
    %c0_i32_1 = arith.constant 0 : i32
    return %c0_i32, %c0_i32_0 : i32, i32
  }
  func.func @transform_2(%arg0: i32) -> (i32, i32) {
    %c0_i32 = arith.constant 0 : i32
    %c0_i32_0 = arith.constant 0 : i32
    return %arg0, %c0_i32 : i32, i32
  }
  func.func @transform_3(%arg0: i32) -> (i32, i32) {
    %c0_i32 = arith.constant 0 : i32
    %c0_i32_0 = arith.constant 0 : i32
    %c0_i32_1 = arith.constant 0 : i32
    return %c0_i32, %c0_i32_0 : i32, i32
  }
  func.func @transform_4(%arg0: i32) -> (i32, i32) {
    %c0_i32 = arith.constant 0 : i32
    %c0_i32_0 = arith.constant 0 : i32
    %c0_i32_1 = arith.constant 0 : i32
    return %c0_i32, %c0_i32_0 : i32, i32
  }
}

module attributes {stable_mosaic.version = 11 : i64} {
  func.func @matmul_stats_kernel(%arg0: i32, %arg1: memref<256x1152xf32, #tpu.memory_space<vmem>>, %arg2: memref<1152x128xf32, #tpu.memory_space<vmem>>, %arg3: memref<256x128xf32, #tpu.memory_space<vmem>>, %arg4: memref<1x128xf32, #tpu.memory_space<vmem>>, %arg5: memref<1x128xf32, #tpu.memory_space<vmem>>) attributes {dimension_semantics = [#tpu.dimension_semantics<arbitrary>], iteration_bounds = array<i64: 2>, scalar_prefetch = 0 : i64, scratch_operands = 0 : i64, tpu.core_type = #tpu.core_type<tc>, window_params = [{transform_indices = @transform_0, window_bounds = array<i64: 256, 1152>}, {pipeline_mode = #tpu.pipeline_mode<synchronous>, transform_indices = @transform_1, window_bounds = array<i64: 1152, 128>}, {transform_indices = @transform_2, window_bounds = array<i64: 256, 128>}, {pipeline_mode = #tpu.pipeline_mode<synchronous>, transform_indices = @transform_3, window_bounds = array<i64: 1, 128>}, {pipeline_mode = #tpu.pipeline_mode<synchronous>, transform_indices = @transform_4, window_bounds = array<i64: 1, 128>}]} {
    %c0_i32 = arith.constant 0 : i32
    %0 = arith.cmpi eq, %arg0, %c0_i32 : i32
    %1 = arith.extui %0 : i1 to i32
    %c0_i32_0 = arith.constant 0 : i32
    %2 = arith.cmpi ne, %1, %c0_i32_0 : i32
    scf.if %2 {
      %cst_16 = arith.constant 0.000000e+00 : f32
      %18 = vector.broadcast %cst_16 : f32 to vector<1x128xf32>
      %c0_17 = arith.constant 0 : index
      %c0_18 = arith.constant 0 : index
      %19 = vector.load %arg4[%c0_17, %c0_18] : memref<1x128xf32, #tpu.memory_space<vmem>>, vector<1x128xf32>
      tpu.vector_store %arg4[%c0_17, %c0_18], %18 {strides = array<i32>} : memref<1x128xf32, #tpu.memory_space<vmem>>, vector<1x128xf32>,
      %cst_19 = arith.constant 0.000000e+00 : f32
      %20 = vector.broadcast %cst_19 : f32 to vector<1x128xf32>
      %c0_20 = arith.constant 0 : index
      %c0_21 = arith.constant 0 : index
      %21 = vector.load %arg5[%c0_20, %c0_21] : memref<1x128xf32, #tpu.memory_space<vmem>>, vector<1x128xf32>
      tpu.vector_store %arg5[%c0_20, %c0_21], %20 {strides = array<i32>} : memref<1x128xf32, #tpu.memory_space<vmem>>, vector<1x128xf32>,
    } else {
    }
    %c0 = arith.constant 0 : index
    %c0_1 = arith.constant 0 : index
    %3 = vector.load %arg1[%c0, %c0_1] : memref<256x1152xf32, #tpu.memory_space<vmem>>, vector<256x1152xf32>
    %c0_2 = arith.constant 0 : index
    %c0_3 = arith.constant 0 : index
    %4 = vector.load %arg2[%c0_2, %c0_3] : memref<1152x128xf32, #tpu.memory_space<vmem>>, vector<1152x128xf32>
    %cst = arith.constant dense<0.000000e+00> : vector<256x128xf32>
    %5 = tpu.matmul %3, %4, %cst {dimension_numbers = #tpu.dot_dimension_numbers<[1], [0], [0], [1], [0, 0, 1, 1], [], []>} : vector<256x1152xf32>, vector<1152x128xf32>, vector<256x128xf32> -> vector<256x128xf32>
    %c0_4 = arith.constant 0 : index
    %c0_5 = arith.constant 0 : index
    %6 = vector.load %arg3[%c0_4, %c0_5] : memref<256x128xf32, #tpu.memory_space<vmem>>, vector<256x128xf32>
    tpu.vector_store %arg3[%c0_4, %c0_5], %5 {strides = array<i32>} : memref<256x128xf32, #tpu.memory_space<vmem>>, vector<256x128xf32>,
    %c0_6 = arith.constant 0 : index
    %c0_7 = arith.constant 0 : index
    %7 = vector.load %arg4[%c0_6, %c0_7] : memref<1x128xf32, #tpu.memory_space<vmem>>, vector<1x128xf32>
    %cst_8 = arith.constant dense<0.000000e+00> : vector<128xf32>
    %8 = vector.multi_reduction <add>, %5, %cst_8 [0] : vector<256x128xf32> to vector<128xf32>
    %9 = vector.shape_cast %8 : vector<128xf32> to vector<1x128xf32>
    %10 = arith.addf %7, %9 : vector<1x128xf32>
    %c0_9 = arith.constant 0 : index
    %c0_10 = arith.constant 0 : index
    %11 = vector.load %arg4[%c0_9, %c0_10] : memref<1x128xf32, #tpu.memory_space<vmem>>, vector<1x128xf32>
    tpu.vector_store %arg4[%c0_9, %c0_10], %10 {strides = array<i32>} : memref<1x128xf32, #tpu.memory_space<vmem>>, vector<1x128xf32>,
    %c0_11 = arith.constant 0 : index
    %c0_12 = arith.constant 0 : index
    %12 = vector.load %arg5[%c0_11, %c0_12] : memref<1x128xf32, #tpu.memory_space<vmem>>, vector<1x128xf32>
    %13 = arith.mulf %5, %5 : vector<256x128xf32>
    %cst_13 = arith.constant dense<0.000000e+00> : vector<128xf32>
    %14 = vector.multi_reduction <add>, %13, %cst_13 [0] : vector<256x128xf32> to vector<128xf32>
    %15 = vector.shape_cast %14 : vector<128xf32> to vector<1x128xf32>
    %16 = arith.addf %12, %15 : vector<1x128xf32>
    %c0_14 = arith.constant 0 : index
    %c0_15 = arith.constant 0 : index
    %17 = vector.load %arg5[%c0_14, %c0_15] : memref<1x128xf32, #tpu.memory_space<vmem>>, vector<1x128xf32>
    tpu.vector_store %arg5[%c0_14, %c0_15], %16 {strides = array<i32>} : memref<1x128xf32, #tpu.memory_space<vmem>>, vector<1x128xf32>,
    return
  }
  func.func @transform_0(%arg0: i32) -> (i32, i32) {
    %c0_i32 = arith.constant 0 : i32
    %c0_i32_0 = arith.constant 0 : i32
    return %arg0, %c0_i32 : i32, i32
  }
  func.func @transform_1(%arg0: i32) -> (i32, i32) {
    %c0_i32 = arith.constant 0 : i32
    %c0_i32_0 = arith.constant 0 : i32
    %c0_i32_1 = arith.constant 0 : i32
    return %c0_i32, %c0_i32_0 : i32, i32
  }
  func.func @transform_2(%arg0: i32) -> (i32, i32) {
    %c0_i32 = arith.constant 0 : i32
    %c0_i32_0 = arith.constant 0 : i32
    return %arg0, %c0_i32 : i32, i32
  }
  func.func @transform_3(%arg0: i32) -> (i32, i32) {
    %c0_i32 = arith.constant 0 : i32
    %c0_i32_0 = arith.constant 0 : i32
    %c0_i32_1 = arith.constant 0 : i32
    return %c0_i32, %c0_i32_0 : i32, i32
  }
  func.func @transform_4(%arg0: i32) -> (i32, i32) {
    %c0_i32 = arith.constant 0 : i32
    %c0_i32_0 = arith.constant 0 : i32
    %c0_i32_1 = arith.constant 0 : i32
    return %c0_i32, %c0_i32_0 : i32, i32
  }
}

module attributes {stable_mosaic.version = 11 : i64} {
  func.func @dual_matmul_stats_kernel(%arg0: i32, %arg1: memref<256x128xf32, #tpu.memory_space<vmem>>, %arg2: memref<128x128xf32, #tpu.memory_space<vmem>>, %arg3: memref<256x128xf32, #tpu.memory_space<vmem>>, %arg4: memref<128x128xf32, #tpu.memory_space<vmem>>, %arg5: memref<256x128xf32, #tpu.memory_space<vmem>>, %arg6: memref<256x128xf32, #tpu.memory_space<vmem>>, %arg7: memref<1x128xf32, #tpu.memory_space<vmem>>, %arg8: memref<1x128xf32, #tpu.memory_space<vmem>>, %arg9: memref<1x128xf32, #tpu.memory_space<vmem>>, %arg10: memref<1x128xf32, #tpu.memory_space<vmem>>) attributes {dimension_semantics = [#tpu.dimension_semantics<arbitrary>], iteration_bounds = array<i64: 2>, scalar_prefetch = 0 : i64, scratch_operands = 0 : i64, tpu.core_type = #tpu.core_type<tc>, window_params = [{transform_indices = @transform_0, window_bounds = array<i64: 256, 128>}, {pipeline_mode = #tpu.pipeline_mode<synchronous>, transform_indices = @transform_1, window_bounds = array<i64: 128, 128>}, {transform_indices = @transform_2, window_bounds = array<i64: 256, 128>}, {pipeline_mode = #tpu.pipeline_mode<synchronous>, transform_indices = @transform_3, window_bounds = array<i64: 128, 128>}, {transform_indices = @transform_4, window_bounds = array<i64: 256, 128>}, {transform_indices = @transform_5, window_bounds = array<i64: 256, 128>}, {pipeline_mode = #tpu.pipeline_mode<synchronous>, transform_indices = @transform_6, window_bounds = array<i64: 1, 128>}, {pipeline_mode = #tpu.pipeline_mode<synchronous>, transform_indices = @transform_7, window_bounds = array<i64: 1, 128>}, {pipeline_mode = #tpu.pipeline_mode<synchronous>, transform_indices = @transform_8, window_bounds = array<i64: 1, 128>}, {pipeline_mode = #tpu.pipeline_mode<synchronous>, transform_indices = @transform_9, window_bounds = array<i64: 1, 128>}]} {
    %c0_i32 = arith.constant 0 : i32
    %0 = arith.cmpi eq, %arg0, %c0_i32 : i32
    %1 = arith.extui %0 : i1 to i32
    %c0_i32_0 = arith.constant 0 : i32
    %2 = arith.cmpi ne, %1, %c0_i32_0 : i32
    scf.if %2 {
      %cst_33 = arith.constant 0.000000e+00 : f32
      %33 = vector.broadcast %cst_33 : f32 to vector<1x128xf32>
      %c0_34 = arith.constant 0 : index
      %c0_35 = arith.constant 0 : index
      %34 = vector.load %arg7[%c0_34, %c0_35] : memref<1x128xf32, #tpu.memory_space<vmem>>, vector<1x128xf32>
      tpu.vector_store %arg7[%c0_34, %c0_35], %33 {strides = array<i32>} : memref<1x128xf32, #tpu.memory_space<vmem>>, vector<1x128xf32>,
      %cst_36 = arith.constant 0.000000e+00 : f32
      %35 = vector.broadcast %cst_36 : f32 to vector<1x128xf32>
      %c0_37 = arith.constant 0 : index
      %c0_38 = arith.constant 0 : index
      %36 = vector.load %arg8[%c0_37, %c0_38] : memref<1x128xf32, #tpu.memory_space<vmem>>, vector<1x128xf32>
      tpu.vector_store %arg8[%c0_37, %c0_38], %35 {strides = array<i32>} : memref<1x128xf32, #tpu.memory_space<vmem>>, vector<1x128xf32>,
      %cst_39 = arith.constant 0.000000e+00 : f32
      %37 = vector.broadcast %cst_39 : f32 to vector<1x128xf32>
      %c0_40 = arith.constant 0 : index
      %c0_41 = arith.constant 0 : index
      %38 = vector.load %arg9[%c0_40, %c0_41] : memref<1x128xf32, #tpu.memory_space<vmem>>, vector<1x128xf32>
      tpu.vector_store %arg9[%c0_40, %c0_41], %37 {strides = array<i32>} : memref<1x128xf32, #tpu.memory_space<vmem>>, vector<1x128xf32>,
      %cst_42 = arith.constant 0.000000e+00 : f32
      %39 = vector.broadcast %cst_42 : f32 to vector<1x128xf32>
      %c0_43 = arith.constant 0 : index
      %c0_44 = arith.constant 0 : index
      %40 = vector.load %arg10[%c0_43, %c0_44] : memref<1x128xf32, #tpu.memory_space<vmem>>, vector<1x128xf32>
      tpu.vector_store %arg10[%c0_43, %c0_44], %39 {strides = array<i32>} : memref<1x128xf32, #tpu.memory_space<vmem>>, vector<1x128xf32>,
    } else {
    }
    %c0 = arith.constant 0 : index
    %c0_1 = arith.constant 0 : index
    %3 = vector.load %arg1[%c0, %c0_1] : memref<256x128xf32, #tpu.memory_space<vmem>>, vector<256x128xf32>
    %c0_2 = arith.constant 0 : index
    %c0_3 = arith.constant 0 : index
    %4 = vector.load %arg2[%c0_2, %c0_3] : memref<128x128xf32, #tpu.memory_space<vmem>>, vector<128x128xf32>
    %cst = arith.constant dense<0.000000e+00> : vector<256x128xf32>
    %5 = tpu.matmul %3, %4, %cst {dimension_numbers = #tpu.dot_dimension_numbers<[1], [0], [0], [1], [0, 0, 1, 1], [], []>} : vector<256x128xf32>, vector<128x128xf32>, vector<256x128xf32> -> vector<256x128xf32>
    %c0_4 = arith.constant 0 : index
    %c0_5 = arith.constant 0 : index
    %6 = vector.load %arg3[%c0_4, %c0_5] : memref<256x128xf32, #tpu.memory_space<vmem>>, vector<256x128xf32>
    %c0_6 = arith.constant 0 : index
    %c0_7 = arith.constant 0 : index
    %7 = vector.load %arg4[%c0_6, %c0_7] : memref<128x128xf32, #tpu.memory_space<vmem>>, vector<128x128xf32>
    %cst_8 = arith.constant dense<0.000000e+00> : vector<256x128xf32>
    %8 = tpu.matmul %6, %7, %cst_8 {dimension_numbers = #tpu.dot_dimension_numbers<[1], [0], [0], [1], [0, 0, 1, 1], [], []>} : vector<256x128xf32>, vector<128x128xf32>, vector<256x128xf32> -> vector<256x128xf32>
    %c0_9 = arith.constant 0 : index
    %c0_10 = arith.constant 0 : index
    %9 = vector.load %arg5[%c0_9, %c0_10] : memref<256x128xf32, #tpu.memory_space<vmem>>, vector<256x128xf32>
    tpu.vector_store %arg5[%c0_9, %c0_10], %5 {strides = array<i32>} : memref<256x128xf32, #tpu.memory_space<vmem>>, vector<256x128xf32>,
    %c0_11 = arith.constant 0 : index
    %c0_12 = arith.constant 0 : index
    %10 = vector.load %arg6[%c0_11, %c0_12] : memref<256x128xf32, #tpu.memory_space<vmem>>, vector<256x128xf32>
    tpu.vector_store %arg6[%c0_11, %c0_12], %8 {strides = array<i32>} : memref<256x128xf32, #tpu.memory_space<vmem>>, vector<256x128xf32>,
    %c0_13 = arith.constant 0 : index
    %c0_14 = arith.constant 0 : index
    %11 = vector.load %arg7[%c0_13, %c0_14] : memref<1x128xf32, #tpu.memory_space<vmem>>, vector<1x128xf32>
    %cst_15 = arith.constant dense<0.000000e+00> : vector<128xf32>
    %12 = vector.multi_reduction <add>, %5, %cst_15 [0] : vector<256x128xf32> to vector<128xf32>
    %13 = vector.shape_cast %12 : vector<128xf32> to vector<1x128xf32>
    %14 = arith.addf %11, %13 : vector<1x128xf32>
    %c0_16 = arith.constant 0 : index
    %c0_17 = arith.constant 0 : index
    %15 = vector.load %arg7[%c0_16, %c0_17] : memref<1x128xf32, #tpu.memory_space<vmem>>, vector<1x128xf32>
    tpu.vector_store %arg7[%c0_16, %c0_17], %14 {strides = array<i32>} : memref<1x128xf32, #tpu.memory_space<vmem>>, vector<1x128xf32>,
    %c0_18 = arith.constant 0 : index
    %c0_19 = arith.constant 0 : index
    %16 = vector.load %arg8[%c0_18, %c0_19] : memref<1x128xf32, #tpu.memory_space<vmem>>, vector<1x128xf32>
    %17 = arith.mulf %5, %5 : vector<256x128xf32>
    %cst_20 = arith.constant dense<0.000000e+00> : vector<128xf32>
    %18 = vector.multi_reduction <add>, %17, %cst_20 [0] : vector<256x128xf32> to vector<128xf32>
    %19 = vector.shape_cast %18 : vector<128xf32> to vector<1x128xf32>
    %20 = arith.addf %16, %19 : vector<1x128xf32>
    %c0_21 = arith.constant 0 : index
    %c0_22 = arith.constant 0 : index
    %21 = vector.load %arg8[%c0_21, %c0_22] : memref<1x128xf32, #tpu.memory_space<vmem>>, vector<1x128xf32>
    tpu.vector_store %arg8[%c0_21, %c0_22], %20 {strides = array<i32>} : memref<1x128xf32, #tpu.memory_space<vmem>>, vector<1x128xf32>,
    %c0_23 = arith.constant 0 : index
    %c0_24 = arith.constant 0 : index
    %22 = vector.load %arg9[%c0_23, %c0_24] : memref<1x128xf32, #tpu.memory_space<vmem>>, vector<1x128xf32>
    %cst_25 = arith.constant dense<0.000000e+00> : vector<128xf32>
    %23 = vector.multi_reduction <add>, %8, %cst_25 [0] : vector<256x128xf32> to vector<128xf32>
    %24 = vector.shape_cast %23 : vector<128xf32> to vector<1x128xf32>
    %25 = arith.addf %22, %24 : vector<1x128xf32>
    %c0_26 = arith.constant 0 : index
    %c0_27 = arith.constant 0 : index
    %26 = vector.load %arg9[%c0_26, %c0_27] : memref<1x128xf32, #tpu.memory_space<vmem>>, vector<1x128xf32>
    tpu.vector_store %arg9[%c0_26, %c0_27], %25 {strides = array<i32>} : memref<1x128xf32, #tpu.memory_space<vmem>>, vector<1x128xf32>,
    %c0_28 = arith.constant 0 : index
    %c0_29 = arith.constant 0 : index
    %27 = vector.load %arg10[%c0_28, %c0_29] : memref<1x128xf32, #tpu.memory_space<vmem>>, vector<1x128xf32>
    %28 = arith.mulf %8, %8 : vector<256x128xf32>
    %cst_30 = arith.constant dense<0.000000e+00> : vector<128xf32>
    %29 = vector.multi_reduction <add>, %28, %cst_30 [0] : vector<256x128xf32> to vector<128xf32>
    %30 = vector.shape_cast %29 : vector<128xf32> to vector<1x128xf32>
    %31 = arith.addf %27, %30 : vector<1x128xf32>
    %c0_31 = arith.constant 0 : index
    %c0_32 = arith.constant 0 : index
    %32 = vector.load %arg10[%c0_31, %c0_32] : memref<1x128xf32, #tpu.memory_space<vmem>>, vector<1x128xf32>
    tpu.vector_store %arg10[%c0_31, %c0_32], %31 {strides = array<i32>} : memref<1x128xf32, #tpu.memory_space<vmem>>, vector<1x128xf32>,
    return
  }
  func.func @transform_0(%arg0: i32) -> (i32, i32) {
    %c0_i32 = arith.constant 0 : i32
    %c0_i32_0 = arith.constant 0 : i32
    return %arg0, %c0_i32 : i32, i32
  }
  func.func @transform_1(%arg0: i32) -> (i32, i32) {
    %c0_i32 = arith.constant 0 : i32
    %c0_i32_0 = arith.constant 0 : i32
    %c0_i32_1 = arith.constant 0 : i32
    return %c0_i32, %c0_i32_0 : i32, i32
  }
  func.func @transform_2(%arg0: i32) -> (i32, i32) {
    %c0_i32 = arith.constant 0 : i32
    %c0_i32_0 = arith.constant 0 : i32
    return %arg0, %c0_i32 : i32, i32
  }
  func.func @transform_3(%arg0: i32) -> (i32, i32) {
    %c0_i32 = arith.constant 0 : i32
    %c0_i32_0 = arith.constant 0 : i32
    %c0_i32_1 = arith.constant 0 : i32
    return %c0_i32, %c0_i32_0 : i32, i32
  }
  func.func @transform_4(%arg0: i32) -> (i32, i32) {
    %c0_i32 = arith.constant 0 : i32
    %c0_i32_0 = arith.constant 0 : i32
    return %arg0, %c0_i32 : i32, i32
  }
  func.func @transform_5(%arg0: i32) -> (i32, i32) {
    %c0_i32 = arith.constant 0 : i32
    %c0_i32_0 = arith.constant 0 : i32
    return %arg0, %c0_i32 : i32, i32
  }
  func.func @transform_6(%arg0: i32) -> (i32, i32) {
    %c0_i32 = arith.constant 0 : i32
    %c0_i32_0 = arith.constant 0 : i32
    %c0_i32_1 = arith.constant 0 : i32
    return %c0_i32, %c0_i32_0 : i32, i32
  }
  func.func @transform_7(%arg0: i32) -> (i32, i32) {
    %c0_i32 = arith.constant 0 : i32
    %c0_i32_0 = arith.constant 0 : i32
    %c0_i32_1 = arith.constant 0 : i32
    return %c0_i32, %c0_i32_0 : i32, i32
  }
  func.func @transform_8(%arg0: i32) -> (i32, i32) {
    %c0_i32 = arith.constant 0 : i32
    %c0_i32_0 = arith.constant 0 : i32
    %c0_i32_1 = arith.constant 0 : i32
    return %c0_i32, %c0_i32_0 : i32, i32
  }
  func.func @transform_9(%arg0: i32) -> (i32, i32) {
    %c0_i32 = arith.constant 0 : i32
    %c0_i32_0 = arith.constant 0 : i32
    %c0_i32_1 = arith.constant 0 : i32
    return %c0_i32, %c0_i32_0 : i32, i32
  }
}

module attributes {stable_mosaic.version = 11 : i64} {
  func.func @affine2_add_relu_kernel(%arg0: i32, %arg1: memref<256x128xf32, #tpu.memory_space<vmem>>, %arg2: memref<1x128xf32, #tpu.memory_space<vmem>>, %arg3: memref<1x128xf32, #tpu.memory_space<vmem>>, %arg4: memref<256x128xf32, #tpu.memory_space<vmem>>, %arg5: memref<1x128xf32, #tpu.memory_space<vmem>>, %arg6: memref<1x128xf32, #tpu.memory_space<vmem>>, %arg7: memref<256x128xf32, #tpu.memory_space<vmem>>) attributes {dimension_semantics = [#tpu.dimension_semantics<parallel>], iteration_bounds = array<i64: 2>, scalar_prefetch = 0 : i64, scratch_operands = 0 : i64, tpu.core_type = #tpu.core_type<tc>, window_params = [{transform_indices = @transform_0, window_bounds = array<i64: 256, 128>}, {pipeline_mode = #tpu.pipeline_mode<synchronous>, transform_indices = @transform_1, window_bounds = array<i64: 1, 128>}, {pipeline_mode = #tpu.pipeline_mode<synchronous>, transform_indices = @transform_2, window_bounds = array<i64: 1, 128>}, {transform_indices = @transform_3, window_bounds = array<i64: 256, 128>}, {pipeline_mode = #tpu.pipeline_mode<synchronous>, transform_indices = @transform_4, window_bounds = array<i64: 1, 128>}, {pipeline_mode = #tpu.pipeline_mode<synchronous>, transform_indices = @transform_5, window_bounds = array<i64: 1, 128>}, {transform_indices = @transform_6, window_bounds = array<i64: 256, 128>}]} {
    %c0 = arith.constant 0 : index
    %c0_0 = arith.constant 0 : index
    %0 = vector.load %arg1[%c0, %c0_0] : memref<256x128xf32, #tpu.memory_space<vmem>>, vector<256x128xf32>
    %c0_1 = arith.constant 0 : index
    %c0_2 = arith.constant 0 : index
    %1 = vector.load %arg2[%c0_1, %c0_2] : memref<1x128xf32, #tpu.memory_space<vmem>>, vector<1x128xf32>
    %2 = vector.broadcast %1 : vector<1x128xf32> to vector<256x128xf32>
    %3 = arith.mulf %0, %2 : vector<256x128xf32>
    %c0_3 = arith.constant 0 : index
    %c0_4 = arith.constant 0 : index
    %4 = vector.load %arg3[%c0_3, %c0_4] : memref<1x128xf32, #tpu.memory_space<vmem>>, vector<1x128xf32>
    %5 = vector.broadcast %4 : vector<1x128xf32> to vector<256x128xf32>
    %6 = arith.addf %3, %5 : vector<256x128xf32>
    %c0_5 = arith.constant 0 : index
    %c0_6 = arith.constant 0 : index
    %7 = vector.load %arg4[%c0_5, %c0_6] : memref<256x128xf32, #tpu.memory_space<vmem>>, vector<256x128xf32>
    %c0_7 = arith.constant 0 : index
    %c0_8 = arith.constant 0 : index
    %8 = vector.load %arg5[%c0_7, %c0_8] : memref<1x128xf32, #tpu.memory_space<vmem>>, vector<1x128xf32>
    %9 = vector.broadcast %8 : vector<1x128xf32> to vector<256x128xf32>
    %10 = arith.mulf %7, %9 : vector<256x128xf32>
    %11 = arith.addf %6, %10 : vector<256x128xf32>
    %c0_9 = arith.constant 0 : index
    %c0_10 = arith.constant 0 : index
    %12 = vector.load %arg6[%c0_9, %c0_10] : memref<1x128xf32, #tpu.memory_space<vmem>>, vector<1x128xf32>
    %13 = vector.broadcast %12 : vector<1x128xf32> to vector<256x128xf32>
    %14 = arith.addf %11, %13 : vector<256x128xf32>
    %cst = arith.constant 0.000000e+00 : f32
    %15 = vector.broadcast %cst : f32 to vector<256x128xf32>
    %16 = arith.maximumf %14, %15 : vector<256x128xf32>
    %c0_11 = arith.constant 0 : index
    %c0_12 = arith.constant 0 : index
    %17 = vector.load %arg7[%c0_11, %c0_12] : memref<256x128xf32, #tpu.memory_space<vmem>>, vector<256x128xf32>
    tpu.vector_store %arg7[%c0_11, %c0_12], %16 {strides = array<i32>} : memref<256x128xf32, #tpu.memory_space<vmem>>, vector<256x128xf32>,
    return
  }
  func.func @transform_0(%arg0: i32) -> (i32, i32) {
    %c0_i32 = arith.constant 0 : i32
    %c0_i32_0 = arith.constant 0 : i32
    return %arg0, %c0_i32 : i32, i32
  }
  func.func @transform_1(%arg0: i32) -> (i32, i32) {
    %c0_i32 = arith.constant 0 : i32
    %c0_i32_0 = arith.constant 0 : i32
    %c0_i32_1 = arith.constant 0 : i32
    return %c0_i32, %c0_i32_0 : i32, i32
  }
  func.func @transform_2(%arg0: i32) -> (i32, i32) {
    %c0_i32 = arith.constant 0 : i32
    %c0_i32_0 = arith.constant 0 : i32
    %c0_i32_1 = arith.constant 0 : i32
    return %c0_i32, %c0_i32_0 : i32, i32
  }
  func.func @transform_3(%arg0: i32) -> (i32, i32) {
    %c0_i32 = arith.constant 0 : i32
    %c0_i32_0 = arith.constant 0 : i32
    return %arg0, %c0_i32 : i32, i32
  }
  func.func @transform_4(%arg0: i32) -> (i32, i32) {
    %c0_i32 = arith.constant 0 : i32
    %c0_i32_0 = arith.constant 0 : i32
    %c0_i32_1 = arith.constant 0 : i32
    return %c0_i32, %c0_i32_0 : i32, i32
  }
  func.func @transform_5(%arg0: i32) -> (i32, i32) {
    %c0_i32 = arith.constant 0 : i32
    %c0_i32_0 = arith.constant 0 : i32
    %c0_i32_1 = arith.constant 0 : i32
    return %c0_i32, %c0_i32_0 : i32, i32
  }
  func.func @transform_6(%arg0: i32) -> (i32, i32) {
    %c0_i32 = arith.constant 0 : i32
    %c0_i32_0 = arith.constant 0 : i32
    return %arg0, %c0_i32 : i32, i32
  }
}

</mosaic_0001>

<bundles_post_ra>
// kernel: _lambda_.7
= control target key start
LH: loop header
LB: loop body
LE: loop exit
PB: predicated region body
PF: predicated region fallthrough
CT: control target
= control target key end

     0   :  { %s447_s12 = smov 0   ;;  %s606_s0 = inlined_call_operand.vmem [shape: f32[512,128], index: 0, kind: input, shape index: {}]   ;;  %s607_s1 = inlined_call_operand.vmem [shape: f32[1,128], index: 1, kind: input, shape index: {}]   ;;  %s608_s2 = inlined_call_operand.vmem [shape: f32[1,128], index: 2, kind: input, shape index: {}]   ;;  %s609_s3 = inlined_call_operand.vmem [shape: f32[512,128], index: 3, kind: output, shape index: {}]  }
   0x1 LB: > { %s398_s13 = sadd.s32 4294967295, %s425_s12   ;;  %p402_p0 = scmp.ge.s32.totalorder %s425_s12, 1  ;;  %s425_s12 = sphi %s447_s12, %s13_s12  }
   0x2   : > { %p138_p1 = scmp.lt.s32.totalorder %s425_s12, 3 }
   0x4   : > { %p139_p2 = pnand %p402_p0, %p138_p1 }
   0x5   : > { %s403_s14 = sshll.u32 (!%p139_p2), %s398_s13, 5 }
   0x6   : > { %142 = sbr.rel (%p139_p2) target bundleno = 53 (0x35), region = 32  ;;  %p163_p3 = scmp.lt.s32.totalorder (!%p139_p2), %s403_s14, 63 }
   0xb   : > { %s611_s14 = smov (!%p163_p3, %s403_s14), 63  ;;  %v458_v0 = vld [vmem:[%s607_s1] ss:$0 sm:$0xff] }
   0xc   : > { %s404_s17 = sshll.u32 %s611_s14, 3  ;;  %v468_v1 = vld [vmem:[%s608_s2] ss:$0 sm:$0xff] }
   0xd   : > { %s463_s20 = scalar_lea.vmem %s606_s0, %s404_s17  ;;  %s491_s25 = scalar_lea.vmem %s609_s3, %s404_s17 }
   0xe   : > { %v174_v2 = vld [vmem:[%s463_s20] sm:$0xff]  ;;  %v175_v3 = vld [vmem:[%s463_s20 + $0x8] sm:$0xff]  ;;  %v176_v4 = vld [vmem:[%s463_s20 + $0x10] sm:$0xff] }
   0xf   : > { %v210_v5 = vmul.f32 %v458_v0, %v174_v2  ;;  %v211_v6 = vmul.f32 %v458_v0, %v175_v3  ;;  %v212_v7 = vmul.f32 %v458_v0, %v176_v4  ;;  %v177_v8 = vld [vmem:[%s463_s20 + $0x18] sm:$0xff]  ;;  %v178_v9 = vld [vmem:[%s463_s20 + $0x20] sm:$0xff]  ;;  %v179_v10 = vld [vmem:[%s463_s20 + $0x28] sm:$0xff] }
  0x10   : > { %v213_v11 = vmul.f32 %v458_v0, %v177_v8  ;;  %v214_v12 = vmul.f32 %v458_v0, %v178_v9  ;;  %v215_v13 = vmul.f32 %v458_v0, %v179_v10  ;;  %v180_v14 = vld [vmem:[%s463_s20 + $0x30] sm:$0xff]  ;;  %v181_v15 = vld [vmem:[%s463_s20 + $0x38] sm:$0xff]  ;;  %v182_v24 = vld [vmem:[%s463_s20 + $0x40] sm:$0xff] }
  0x11   : > { %v246_v16 = vadd.f32 %v468_v1, %v210_v5  ;;  %v247_v17 = vadd.f32 %v468_v1, %v211_v6  ;;  %v248_v18 = vadd.f32 %v468_v1, %v212_v7  ;;  %v216_v19 = vmul.f32 %v458_v0, %v180_v14  ;;  %v183_v25 = vld [vmem:[%s463_s20 + $0x48] sm:$0xff]  ;;  %v184_v26 = vld [vmem:[%s463_s20 + $0x50] sm:$0xff]  ;;  %v185_v31 = vld [vmem:[%s463_s20 + $0x58] sm:$0xff] }
  0x12   : > { %v249_v20 = vadd.f32 %v468_v1, %v213_v11  ;;  %v250_v21 = vadd.f32 %v468_v1, %v214_v12  ;;  %v251_v22 = vadd.f32 %v468_v1, %v215_v13  ;;  %v217_v23 = vmul.f32 %v458_v0, %v181_v15  ;;  %v186_v32 = vld [vmem:[%s463_s20 + $0x60] sm:$0xff]  ;;  %v187_v33 = vld [vmem:[%s463_s20 + $0x68] sm:$0xff]  ;;  %v188_v37 = vld [vmem:[%s463_s20 + $0x70] sm:$0xff] }
  0x13   : > { %v278_v27 = vmax.f32 %v246_v16, 0.0  ;;  %v279_v28 = vmax.f32 %v247_v17, 0.0  ;;  %v280_v29 = vmax.f32 %v248_v18, 0.0  ;;  %v252_v30 = vadd.f32 %v468_v1, %v216_v19  ;;  %v189_v42 = vld [vmem:[%s463_s20 + $0x78] sm:$0xff]  ;;  %v190_v54 = vld [vmem:[%s463_s20 + $0x80] sm:$0xff]  ;;  %v191_v55 = vld [vmem:[%s463_s20 + $0x88] sm:$0xff] }
  0x14   : > { %v281_v34 = vmax.f32 %v249_v20, 0.0  ;;  %v282_v35 = vmax.f32 %v250_v21, 0.0  ;;  %v253_v36 = vadd.f32 %v468_v1, %v217_v23  ;;  %v283_v38 = vmax.f32 %v251_v22, 0.0  ;;  %v192_v56 = vld [vmem:[%s463_s20 + $0x90] sm:$0xff]  ;;  %v193_v59 = vld [vmem:[%s463_s20 + $0x98] sm:$0xff]  ;;  %v194_v63 = vld [vmem:[%s463_s20 + $0xa0] sm:$0xff] }
  0x15   : > { %310 = vst [vmem:[%s491_s25] sm:$0xff] %v278_v27  ;;  %v218_v39 = vmul.f32 %v458_v0, %v182_v24  ;;  %v219_v40 = vmul.f32 %v458_v0, %v183_v25  ;;  %v220_v41 = vmul.f32 %v458_v0, %v184_v26  ;;  %v284_v43 = vmax.f32 %v252_v30, 0.0  ;;  %v195_v6 = vld [vmem:[%s463_s20 + $0xa8] sm:$0xff]  ;;  %v196_v10 = vld [vmem:[%s463_s20 + $0xb0] sm:$0xff]  ;;  %v197_v14 = vld [vmem:[%s463_s20 + $0xb8] sm:$0xff] }
  0x16   : > { %311 = vst [vmem:[%s491_s25 + $0x8] sm:$0xff] %v279_v28  ;;  %v221_v44 = vmul.f32 %v458_v0, %v185_v31  ;;  %v222_v45 = vmul.f32 %v458_v0, %v186_v32  ;;  %v223_v46 = vmul.f32 %v458_v0, %v187_v33  ;;  %v224_v50 = vmul.f32 %v458_v0, %v188_v37  ;;  %v198_v18 = vld [vmem:[%s463_s20 + $0xc0] sm:$0xff]  ;;  %v199_v22 = vld [vmem:[%s463_s20 + $0xc8] sm:$0xff]  ;;  %v200_v26 = vld [vmem:[%s463_s20 + $0xd0] sm:$0xff] }
  0x17   : > { %312 = vst [vmem:[%s491_s25 + $0x10] sm:$0xff] %v280_v29  ;;  %v254_v47 = vadd.f32 %v468_v1, %v218_v39  ;;  %v255_v48 = vadd.f32 %v468_v1, %v219_v40  ;;  %v256_v49 = vadd.f32 %v468_v1, %v220_v41  ;;  %v285_v51 = vmax.f32 %v253_v36, 0.0  ;;  %v201_v30 = vld [vmem:[%s463_s20 + $0xd8] sm:$0xff] }
  0x18   : > { %313 = vst [vmem:[%s491_s25 + $0x18] sm:$0xff] %v281_v34  ;;  %v257_v52 = vadd.f32 %v468_v1, %v221_v44  ;;  %v225_v53 = vmul.f32 %v458_v0, %v189_v42  ;;  %v258_v58 = vadd.f32 %v468_v1, %v222_v45  ;;  %v259_v62 = vadd.f32 %v468_v1, %v223_v46  ;;  %v202_v34 = vld [vmem:[%s463_s20 + $0xe0] sm:$0xff]  ;;  %v204_v42 = vld [vmem:[%s463_s20 + $0xf0] sm:$0xff]  ;;  %v205_v46 = vld [vmem:[%s463_s20 + $0xf8] sm:$0xff] }
  0x19   : > { %314 = vst [vmem:[%s491_s25 + $0x20] sm:$0xff] %v282_v35  ;;  %v286_v57 = vmax.f32 %v254_v47, 0.0  ;;  %v287_v60 = vmax.f32 %v255_v48, 0.0  ;;  %v288_v61 = vmax.f32 %v256_v49, 0.0  ;;  %v260_v2 = vadd.f32 %v468_v1, %v224_v50 }
  0x1a   : > { %315 = vst [vmem:[%s491_s25 + $0x28] sm:$0xff] %v283_v38  ;;  %v226_v3 = vmul.f32 %v458_v0, %v190_v54  ;;  %v227_v4 = vmul.f32 %v458_v0, %v191_v55  ;;  %v228_v5 = vmul.f32 %v458_v0, %v192_v56  ;;  %v289_v7 = vmax.f32 %v257_v52, 0.0  ;;  %v203_v38 = vld [vmem:[%s463_s20 + $0xe8] sm:$0xff] }
  0x1b   : > { %316 = vst [vmem:[%s491_s25 + $0x30] sm:$0xff] %v284_v43  ;;  %v261_v8 = vadd.f32 %v468_v1, %v225_v53  ;;  %v229_v9 = vmul.f32 %v458_v0, %v193_v59  ;;  %v290_v11 = vmax.f32 %v258_v58, 0.0  ;;  %v230_v13 = vmul.f32 %v458_v0, %v194_v63 }
  0x1c   : > { %317 = vst [vmem:[%s491_s25 + $0x38] sm:$0xff] %v285_v51  ;;  %v262_v12 = vadd.f32 %v468_v1, %v226_v3  ;;  %v291_v15 = vmax.f32 %v259_v62, 0.0  ;;  %v263_v16 = vadd.f32 %v468_v1, %v227_v4  ;;  %v231_v17 = vmul.f32 %v458_v0, %v195_v6 }
  0x1d   : > { %318 = vst [vmem:[%s491_s25 + $0x40] sm:$0xff] %v286_v57  ;;  %v292_v19 = vmax.f32 %v260_v2, 0.0  ;;  %v264_v20 = vadd.f32 %v468_v1, %v228_v5  ;;  %v232_v21 = vmul.f32 %v458_v0, %v196_v10  ;;  %v293_v23 = vmax.f32 %v261_v8, 0.0 }
  0x1e   : > { %319 = vst [vmem:[%s491_s25 + $0x48] sm:$0xff] %v287_v60  ;;  %v265_v24 = vadd.f32 %v468_v1, %v229_v9  ;;  %v233_v25 = vmul.f32 %v458_v0, %v197_v14  ;;  %v294_v27 = vmax.f32 %v262_v12, 0.0  ;;  %v266_v28 = vadd.f32 %v468_v1, %v230_v13 }
  0x1f   : > { %320 = vst [vmem:[%s491_s25 + $0x50] sm:$0xff] %v288_v61  ;;  %v234_v29 = vmul.f32 %v458_v0, %v198_v18  ;;  %v295_v31 = vmax.f32 %v263_v16, 0.0  ;;  %v267_v32 = vadd.f32 %v468_v1, %v231_v17  ;;  %v235_v33 = vmul.f32 %v458_v0, %v199_v22 }
  0x20   : > { %321 = vst [vmem:[%s491_s25 + $0x58] sm:$0xff] %v289_v7  ;;  %v296_v35 = vmax.f32 %v264_v20, 0.0  ;;  %v268_v36 = vadd.f32 %v468_v1, %v232_v21  ;;  %v236_v37 = vmul.f32 %v458_v0, %v200_v26  ;;  %v297_v39 = vmax.f32 %v265_v24, 0.0 }
  0x21   : > { %322 = vst [vmem:[%s491_s25 + $0x60] sm:$0xff] %v290_v11  ;;  %v269_v40 = vadd.f32 %v468_v1, %v233_v25  ;;  %v237_v41 = vmul.f32 %v458_v0, %v201_v30  ;;  %v298_v43 = vmax.f32 %v266_v28, 0.0  ;;  %v270_v44 = vadd.f32 %v468_v1, %v234_v29 }
  0x22   : > { %323 = vst [vmem:[%s491_s25 + $0x68] sm:$0xff] %v291_v15  ;;  %v238_v45 = vmul.f32 %v458_v0, %v202_v34  ;;  %v299_v47 = vmax.f32 %v267_v32, 0.0  ;;  %v271_v48 = vadd.f32 %v468_v1, %v235_v33  ;;  %v239_v49 = vmul.f32 %v458_v0, %v203_v38 }
  0x23   : > { %324 = vst [vmem:[%s491_s25 + $0x70] sm:$0xff] %v292_v19  ;;  %v300_v50 = vmax.f32 %v268_v36, 0.0  ;;  %v272_v51 = vadd.f32 %v468_v1, %v236_v37  ;;  %v240_v52 = vmul.f32 %v458_v0, %v204_v42  ;;  %v301_v53 = vmax.f32 %v269_v40, 0.0 }
  0x24   : > { %325 = vst [vmem:[%s491_s25 + $0x78] sm:$0xff] %v293_v23  ;;  %v273_v54 = vadd.f32 %v468_v1, %v237_v41  ;;  %v241_v55 = vmul.f32 %v458_v0, %v205_v46  ;;  %v302_v56 = vmax.f32 %v270_v44, 0.0  ;;  %v274_v57 = vadd.f32 %v468_v1, %v238_v45 }
  0x25   : > { %326 = vst [vmem:[%s491_s25 + $0x80] sm:$0xff] %v294_v27  ;;  %v303_v58 = vmax.f32 %v271_v48, 0.0  ;;  %v275_v59 = vadd.f32 %v468_v1, %v239_v49  ;;  %v304_v60 = vmax.f32 %v272_v51, 0.0  ;;  %v276_v61 = vadd.f32 %v468_v1, %v240_v52 }
  0x26   : > { %327 = vst [vmem:[%s491_s25 + $0x88] sm:$0xff] %v295_v31  ;;  %v305_v0 = vmax.f32 %v273_v54, 0.0  ;;  %v277_v62 = vadd.f32 %v468_v1, %v241_v55  ;;  %v306_v63 = vmax.f32 %v274_v57, 0.0 }
  0x27   : > { %328 = vst [vmem:[%s491_s25 + $0x90] sm:$0xff] %v296_v35  ;;  %v307_v2 = vmax.f32 %v275_v59, 0.0  ;;  %v308_v3 = vmax.f32 %v276_v61, 0.0 }
  0x28   : > { %329 = vst [vmem:[%s491_s25 + $0x98] sm:$0xff] %v297_v39  ;;  %v309_v4 = vmax.f32 %v277_v62, 0.0 }
  0x29   : > { %330 = vst [vmem:[%s491_s25 + $0xa0] sm:$0xff] %v298_v43 }
  0x2a   : > { %331 = vst [vmem:[%s491_s25 + $0xa8] sm:$0xff] %v299_v47 }
  0x2b   : > { %332 = vst [vmem:[%s491_s25 + $0xb0] sm:$0xff] %v300_v50 }
  0x2c   : > { %333 = vst [vmem:[%s491_s25 + $0xb8] sm:$0xff] %v301_v53 }
  0x2d   : > { %334 = vst [vmem:[%s491_s25 + $0xc0] sm:$0xff] %v302_v56 }
  0x2e   : > { %335 = vst [vmem:[%s491_s25 + $0xc8] sm:$0xff] %v303_v58 }
  0x2f   : > { %336 = vst [vmem:[%s491_s25 + $0xd0] sm:$0xff] %v304_v60 }
  0x30   : > { %337 = vst [vmem:[%s491_s25 + $0xd8] sm:$0xff] %v305_v0 }
  0x31   : > { %338 = vst [vmem:[%s491_s25 + $0xe0] sm:$0xff] %v306_v63 }
  0x32   : > { %339 = vst [vmem:[%s491_s25 + $0xe8] sm:$0xff] %v307_v2 }
  0x33   : > { %340 = vst [vmem:[%s491_s25 + $0xf0] sm:$0xff] %v308_v3 }
  0x34   : > { %341 = vst [vmem:[%s491_s25 + $0xf8] sm:$0xff] %v309_v4 }
  0x35 PF: > { %s13_s12 = sadd.s32 1, %s425_s12  }
  0x36   : > { %p10_p4 = scmp.ge.s32.totalorder %s13_s12, 4  }
  0x38   :  { %12 = sbr.rel (!%p10_p4) target bundleno = 1 (0x1), region = 62 }

// kernel: _lambda_.6
= control target key start
LH: loop header
LB: loop body
LE: loop exit
PB: predicated region body
PF: predicated region fallthrough
CT: control target
= control target key end

     0   :  { %s678_s15 = smov 0   ;;  %s937_s0 = inlined_call_operand.vmem [shape: f32[512,128], index: 0, kind: input, shape index: {}]   ;;  %s938_s1 = inlined_call_operand.vmem [shape: f32[128,128], index: 1, kind: input, shape index: {}]   ;;  %s939_s2 = inlined_call_operand.vmem [shape: f32[512,128], index: 2, kind: output, shape index: {0}]   ;;  %s940_s3 = inlined_call_operand.vmem [shape: f32[1,128], index: 3, kind: output, shape index: {1}]   ;;  %s941_s4 = inlined_call_operand.vmem [shape: f32[1,128], index: 4, kind: output, shape index: {2}]  }
   0x1 LB: > { %s575_s16 = sadd.s32 4294967295, %s650_s15   ;;  %p579_p0 = scmp.ge.s32.totalorder %s650_s15, 1  ;;  %s650_s15 = sphi %s678_s15, %s15_s15  }
   0x2   : > { %p158_p1 = scmp.lt.s32.totalorder %s650_s15, 3 }
   0x4   : > { %p159_p2 = pnand %p579_p0, %p158_p1 }
   0x5   : > { %s580_s17 = sshll.u32 (!%p159_p2), %s575_s16, 5  ;;  %p584_p4 = scmp.ne.s32.totalorder (!%p159_p2), %s575_s16, 0 }
   0x6   : > { %162 = sbr.rel (%p159_p2) target bundleno = 300 (0x12c), region = 28  ;;  %p185_p3 = scmp.lt.s32.totalorder (!%p159_p2), %s580_s17, 63 }
   0xb   : > { %s943_s17 = smov (!%p185_p3, %s580_s17), 63  ;;  %199 = sbr.rel (%p584_p4) target bundleno = 19 (0x13), region = 32 }
   0xc   : > { %s581_s18 = sshll.u32 %s943_s17, 3 }
   0xd   : > { %s689_s21 = scalar_lea.vmem %s937_s0, %s581_s18  ;;  %s694_s24 = scalar_lea.vmem %s939_s2, %s581_s18 }
  0x10   : > { %v652_v0 = vmov 0.0  }
  0x11   : > { %200 = vst [vmem:[%s940_s3] sm:$0x1] %v652_v0 }
  0x12   : > { %201 = vst [vmem:[%s941_s4] sm:$0x1] %v652_v0 }
  0x13 PF: > { %v249_v1 = vld [vmem:[%s938_s1 + $0x78] sm:$0xff]  ;;  %v248_v2 = vld [vmem:[%s938_s1 + $0x70] sm:$0xff]  ;;  %v247_v3 = vld [vmem:[%s938_s1 + $0x68] sm:$0xff] }
  0x14   : > { %250 = vmatpush.msra.mxu0 %v249_v1  ;;  %587 = vmatpush.msra.mxu1 %v249_v1  ;;  %v246_v4 = vld [vmem:[%s938_s1 + $0x60] sm:$0xff]  ;;  %v245_v5 = vld [vmem:[%s938_s1 + $0x58] sm:$0xff]  ;;  %v244_v6 = vld [vmem:[%s938_s1 + $0x50] sm:$0xff] }
  0x15   : > { %588 = vmatpush.msra.mxu2 %v249_v1  ;;  %589 = vmatpush.msra.mxu3 %v249_v1  ;;  %v243_v7 = vld [vmem:[%s938_s1 + $0x48] sm:$0xff]  ;;  %v242_v8 = vld [vmem:[%s938_s1 + $0x40] sm:$0xff]  ;;  %v241_v9 = vld [vmem:[%s938_s1 + $0x38] sm:$0xff] }
  0x16   : > { %251 = vmatpush.msra.mxu0 %v248_v2  ;;  %590 = vmatpush.msra.mxu1 %v248_v2  ;;  %v240_v10 = vld [vmem:[%s938_s1 + $0x30] sm:$0xff]  ;;  %v239_v11 = vld [vmem:[%s938_s1 + $0x28] sm:$0xff]  ;;  %v238_v12 = vld [vmem:[%s938_s1 + $0x20] sm:$0xff] }
  0x17   : > { %591 = vmatpush.msra.mxu2 %v248_v2  ;;  %592 = vmatpush.msra.mxu3 %v248_v2  ;;  %v237_v13 = vld [vmem:[%s938_s1 + $0x18] sm:$0xff]  ;;  %v236_v14 = vld [vmem:[%s938_s1 + $0x10] sm:$0xff]  ;;  %v235_v15 = vld [vmem:[%s938_s1 + $0x8] sm:$0xff] }
  0x18   : > { %252 = vmatpush.msra.mxu0 %v247_v3  ;;  %593 = vmatpush.msra.mxu1 %v247_v3  ;;  %v234_v16 = vld [vmem:[%s938_s1] sm:$0xff]  ;;  %v203_v20 = vld [vmem:[%s689_s21 + $0x8] sm:$0xff]  ;;  %v204_v24 = vld [vmem:[%s689_s21 + $0x10] sm:$0xff] }
  0x19   : > { %594 = vmatpush.msra.mxu2 %v247_v3  ;;  %595 = vmatpush.msra.mxu3 %v247_v3  ;;  %v202_v17 = vld [vmem:[%s689_s21] sm:$0xff]  ;;  %v211_v21 = vld [vmem:[%s689_s21 + $0x48] sm:$0xff]  ;;  %v212_v25 = vld [vmem:[%s689_s21 + $0x50] sm:$0xff] }
  0x1a   : > { %253 = vmatpush.msra.mxu0 %v246_v4  ;;  %596 = vmatpush.msra.mxu1 %v246_v4  ;;  %v210_v18 = vld [vmem:[%s689_s21 + $0x40] sm:$0xff]  ;;  %v219_v22 = vld [vmem:[%s689_s21 + $0x88] sm:$0xff]  ;;  %v220_v26 = vld [vmem:[%s689_s21 + $0x90] sm:$0xff] }
  0x1b   : > { %597 = vmatpush.msra.mxu2 %v246_v4  ;;  %598 = vmatpush.msra.mxu3 %v246_v4  ;;  %v218_v19 = vld [vmem:[%s689_s21 + $0x80] sm:$0xff]  ;;  %v227_v27 = vld [vmem:[%s689_s21 + $0xc8] sm:$0xff]  ;;  %v205_v28 = vld [vmem:[%s689_s21 + $0x18] sm:$0xff] }
  0x1c   : > { %254 = vmatpush.msra.mxu0 %v245_v5  ;;  %599 = vmatpush.msra.mxu1 %v245_v5  ;;  %v226_v23 = vld [vmem:[%s689_s21 + $0xc0] sm:$0xff]  ;;  %v213_v29 = vld [vmem:[%s689_s21 + $0x58] sm:$0xff]  ;;  %v228_v31 = vld [vmem:[%s689_s21 + $0xd0] sm:$0xff] }
  0x1d   : > { %600 = vmatpush.msra.mxu2 %v245_v5  ;;  %601 = vmatpush.msra.mxu3 %v245_v5  ;;  %v221_v30 = vld [vmem:[%s689_s21 + $0x98] sm:$0xff]  ;;  %v206_v32 = vld [vmem:[%s689_s21 + $0x20] sm:$0xff]  ;;  %v207_v36 = vld [vmem:[%s689_s21 + $0x28] sm:$0xff] }
  0x1e   : > { %255 = vmatpush.msra.mxu0 %v244_v6  ;;  %602 = vmatpush.msra.mxu1 %v244_v6  ;;  %v214_v33 = vld [vmem:[%s689_s21 + $0x60] sm:$0xff]  ;;  %v229_v34 = vld [vmem:[%s689_s21 + $0xd8] sm:$0xff]  ;;  %v215_v37 = vld [vmem:[%s689_s21 + $0x68] sm:$0xff] }
  0x1f   : > { %603 = vmatpush.msra.mxu2 %v244_v6  ;;  %604 = vmatpush.msra.mxu3 %v244_v6  ;;  %v222_v35 = vld [vmem:[%s689_s21 + $0xa0] sm:$0xff]  ;;  %v223_v39 = vld [vmem:[%s689_s21 + $0xa8] sm:$0xff]  ;;  %v208_v40 = vld [vmem:[%s689_s21 + $0x30] sm:$0xff] }
  0x20   : > { %256 = vmatpush.msra.mxu0 %v243_v7  ;;  %605 = vmatpush.msra.mxu1 %v243_v7  ;;  %v230_v38 = vld [vmem:[%s689_s21 + $0xe0] sm:$0xff]  ;;  %v216_v41 = vld [vmem:[%s689_s21 + $0x70] sm:$0xff]  ;;  %v231_v42 = vld [vmem:[%s689_s21 + $0xe8] sm:$0xff] }
  0x21   : > { %606 = vmatpush.msra.mxu2 %v243_v7  ;;  %607 = vmatpush.msra.mxu3 %v243_v7  ;;  %v224_v43 = vld [vmem:[%s689_s21 + $0xb0] sm:$0xff]  ;;  %v209_v44 = vld [vmem:[%s689_s21 + $0x38] sm:$0xff] }
  0x22   : > { %257 = vmatpush.msra.mxu0 %v242_v8  ;;  %608 = vmatpush.msra.mxu1 %v242_v8  ;;  %v217_v45 = vld [vmem:[%s689_s21 + $0x78] sm:$0xff]  ;;  %v232_v46 = vld [vmem:[%s689_s21 + $0xf0] sm:$0xff] }
  0x23   : > { %609 = vmatpush.msra.mxu2 %v242_v8  ;;  %610 = vmatpush.msra.mxu3 %v242_v8  ;;  %v225_v47 = vld [vmem:[%s689_s21 + $0xb8] sm:$0xff] }
  0x24   : > { %258 = vmatpush.msra.mxu0 %v241_v9  ;;  %611 = vmatpush.msra.mxu1 %v241_v9  ;;  %v233_v48 = vld [vmem:[%s689_s21 + $0xf8] sm:$0xff] }
  0x25   : > { %612 = vmatpush.msra.mxu2 %v241_v9  ;;  %613 = vmatpush.msra.mxu3 %v241_v9 }
  0x26   : > { %259 = vmatpush.msra.mxu0 %v240_v10  ;;  %614 = vmatpush.msra.mxu1 %v240_v10 }
  0x27   : > { %615 = vmatpush.msra.mxu2 %v240_v10  ;;  %616 = vmatpush.msra.mxu3 %v240_v10 }
  0x28   : > { %260 = vmatpush.msra.mxu0 %v239_v11  ;;  %617 = vmatpush.msra.mxu1 %v239_v11 }
  0x29   : > { %618 = vmatpush.msra.mxu2 %v239_v11  ;;  %619 = vmatpush.msra.mxu3 %v239_v11 }
  0x2a   : > { %261 = vmatpush.msra.mxu0 %v238_v12  ;;  %620 = vmatpush.msra.mxu1 %v238_v12 }
  0x2b   : > { %621 = vmatpush.msra.mxu2 %v238_v12  ;;  %622 = vmatpush.msra.mxu3 %v238_v12 }
  0x2c   : > { %262 = vmatpush.msra.mxu0 %v237_v13  ;;  %623 = vmatpush.msra.mxu1 %v237_v13 }
  0x2d   : > { %624 = vmatpush.msra.mxu2 %v237_v13  ;;  %625 = vmatpush.msra.mxu3 %v237_v13 }
  0x2e   : > { %263 = vmatpush.msra.mxu0 %v236_v14  ;;  %626 = vmatpush.msra.mxu1 %v236_v14 }
  0x2f   : > { %627 = vmatpush.msra.mxu2 %v236_v14  ;;  %628 = vmatpush.msra.mxu3 %v236_v14 }
  0x30   : > { %264 = vmatpush.msra.mxu0 %v235_v15  ;;  %629 = vmatpush.msra.mxu1 %v235_v15 }
  0x31   : > { %630 = vmatpush.msra.mxu2 %v235_v15  ;;  %631 = vmatpush.msra.mxu3 %v235_v15 }
  0x32   : > { %265 = vmatpush.msra.mxu0 %v234_v16  ;;  %632 = vmatpush.msra.mxu1 %v234_v16 }
  0x33   : > { %266 = vmatmul.f32.vlgmr.msra.gmra.mxu0 %v202_v17  ;;  %290 = vmatmul.f32.vlgmr.msra.gmra.mxu1 %v210_v18 }
  0x34   : > { %633 = vmatpush.msra.mxu2 %v234_v16  ;;  %634 = vmatpush.msra.mxu3 %v234_v16 }
  0x35   : > { %314 = vmatmul.f32.vlgmr.msra.gmra.mxu2 %v218_v19  ;;  %338 = vmatmul.f32.vlgmr.msra.gmra.mxu3 %v226_v23 }
  0x3b   : > { %269 = vmatmul.f32.gmra.mxu0 %v203_v20  ;;  %293 = vmatmul.f32.gmra.mxu1 %v211_v21 }
  0x3d   : > { %317 = vmatmul.f32.gmra.mxu2 %v219_v22  ;;  %341 = vmatmul.f32.gmra.mxu3 %v227_v27 }
  0x43   : > { %272 = vmatmul.f32.gmra.mxu0 %v204_v24  ;;  %296 = vmatmul.f32.gmra.mxu1 %v212_v25 }
  0x45   : > { %320 = vmatmul.f32.gmra.mxu2 %v220_v26  ;;  %344 = vmatmul.f32.gmra.mxu3 %v228_v31 }
  0x4b   : > { %275 = vmatmul.f32.gmra.mxu0 %v205_v28  ;;  %299 = vmatmul.f32.gmra.mxu1 %v213_v29 }
  0x4d   : > { %323 = vmatmul.f32.gmra.mxu2 %v221_v30  ;;  %347 = vmatmul.f32.gmra.mxu3 %v229_v34 }
  0x53   : > { %278 = vmatmul.f32.gmra.mxu0 %v206_v32  ;;  %302 = vmatmul.f32.gmra.mxu1 %v214_v33 }
  0x55   : > { %326 = vmatmul.f32.gmra.mxu2 %v222_v35  ;;  %350 = vmatmul.f32.gmra.mxu3 %v230_v38 }
  0x5b   : > { %281 = vmatmul.f32.gmra.mxu0 %v207_v36  ;;  %305 = vmatmul.f32.gmra.mxu1 %v215_v37 }
  0x5d   : > { %329 = vmatmul.f32.gmra.mxu2 %v223_v39  ;;  %353 = vmatmul.f32.gmra.mxu3 %v231_v42 }
  0x63   : > { %284 = vmatmul.f32.gmra.mxu0 %v208_v40  ;;  %308 = vmatmul.f32.gmra.mxu1 %v216_v41 }
  0x65   : > { %332 = vmatmul.f32.gmra.mxu2 %v224_v43  ;;  %356 = vmatmul.f32.gmra.mxu3 %v232_v46 }
  0x6b   : > { %287 = vmatmul.f32.gmra.mxu0 %v209_v44  ;;  %311 = vmatmul.f32.gmra.mxu1 %v217_v45 }
  0x6d   : > { %335 = vmatmul.f32.gmra.mxu2 %v225_v47  ;;  %359 = vmatmul.f32.gmra.mxu3 %v233_v48 }
  0xb0   : > { %v267_v49 = vpop.f32.mrf.mxu0  ;;  %v782_v50 = vpop.f32.mrf.mxu1 }
  0xb1   : > { %363 = vst [vmem:[%s694_s24] sm:$0xff] %v267_v49  ;;  %v436_v7 = vmul.f32 %v267_v49, %v267_v49  ;;  %v444_v35 = vmul.f32 %v782_v50, %v782_v50 }
  0xb2   : > { %371 = vst [vmem:[%s694_s24 + $0x40] sm:$0xff] %v782_v50 }
  0xb8   : > { %v270_v51 = vpop.f32.mrf.mxu0  ;;  %v787_v52 = vpop.f32.mrf.mxu1 }
  0xb9   : > { %364 = vst [vmem:[%s694_s24 + $0x8] sm:$0xff] %v270_v51  ;;  %v790_v53 = vpop.f32.mrf.mxu2  ;;  %v801_v57 = vpop.f32.mrf.mxu3  ;;  %v437_v6 = vmul.f32 %v270_v51, %v270_v51  ;;  %v396_v8 = vadd.f32 %v270_v51, %v267_v49  ;;  %v445_v38 = vmul.f32 %v787_v52, %v787_v52 }
  0xba   : > { %372 = vst [vmem:[%s694_s24 + $0x48] sm:$0xff] %v787_v52 }
  0xbb   : > { %379 = vst [vmem:[%s694_s24 + $0x80] sm:$0xff] %v790_v53  ;;  %v468_v10 = vadd.f32 %v437_v6, %v436_v7 }
  0xbc   : > { %387 = vst [vmem:[%s694_s24 + $0xc0] sm:$0xff] %v801_v57 }
  0xc0   : > { %v273_v54 = vpop.f32.mrf.mxu0  ;;  %v796_v55 = vpop.f32.mrf.mxu1 }
  0xc1   : > { %365 = vst [vmem:[%s694_s24 + $0x10] sm:$0xff] %v273_v54  ;;  %v799_v56 = vpop.f32.mrf.mxu2  ;;  %v814_v61 = vpop.f32.mrf.mxu3  ;;  %v438_v9 = vmul.f32 %v273_v54, %v273_v54  ;;  %v397_v11 = vadd.f32 %v396_v8, %v273_v54  ;;  %v446_v41 = vmul.f32 %v796_v55, %v796_v55 }
  0xc2   : > { %373 = vst [vmem:[%s694_s24 + $0x50] sm:$0xff] %v796_v55 }
  0xc3   : > { %380 = vst [vmem:[%s694_s24 + $0x88] sm:$0xff] %v799_v56  ;;  %v469_v15 = vadd.f32 %v468_v10, %v438_v9  ;;  %v452_v9 = vmul.f32 %v790_v53, %v790_v53 }
  0xc4   : > { %388 = vst [vmem:[%s694_s24 + $0xc8] sm:$0xff] %v814_v61 }
  0xc8   : > { %v276_v58 = vpop.f32.mrf.mxu0  ;;  %v809_v59 = vpop.f32.mrf.mxu1 }
  0xc9   : > { %366 = vst [vmem:[%s694_s24 + $0x18] sm:$0xff] %v276_v58  ;;  %v812_v60 = vpop.f32.mrf.mxu2  ;;  %v827_v1 = vpop.f32.mrf.mxu3  ;;  %v439_v12 = vmul.f32 %v276_v58, %v276_v58  ;;  %v398_v16 = vadd.f32 %v397_v11, %v276_v58  ;;  %v447_v44 = vmul.f32 %v809_v59, %v809_v59  ;;  %v453_v11 = vmul.f32 %v799_v56, %v799_v56 }
  0xca   : > { %374 = vst [vmem:[%s694_s24 + $0x58] sm:$0xff] %v809_v59 }
  0xcb   : > { %381 = vst [vmem:[%s694_s24 + $0x90] sm:$0xff] %v812_v60  ;;  %v470_v20 = vadd.f32 %v469_v15, %v439_v12 }
  0xcc   : > { %389 = vst [vmem:[%s694_s24 + $0xd0] sm:$0xff] %v827_v1 }
  0xd0   : > { %v279_v62 = vpop.f32.mrf.mxu0  ;;  %v822_v63 = vpop.f32.mrf.mxu1 }
  0xd1   : > { %367 = vst [vmem:[%s694_s24 + $0x20] sm:$0xff] %v279_v62  ;;  %v825_v0 = vpop.f32.mrf.mxu2  ;;  %v840_v5 = vpop.f32.mrf.mxu3  ;;  %v440_v17 = vmul.f32 %v279_v62, %v279_v62  ;;  %v399_v21 = vadd.f32 %v398_v16, %v279_v62  ;;  %v448_v49 = vmul.f32 %v822_v63, %v822_v63 }
  0xd2   : > { %375 = vst [vmem:[%s694_s24 + $0x60] sm:$0xff] %v822_v63  ;;  %v455_v16 = vmul.f32 %v825_v0, %v825_v0 }
  0xd3   : > { %382 = vst [vmem:[%s694_s24 + $0x98] sm:$0xff] %v825_v0  ;;  %v471_v23 = vadd.f32 %v470_v20, %v440_v17 }
  0xd4   : > { %390 = vst [vmem:[%s694_s24 + $0xd8] sm:$0xff] %v840_v5 }
  0xd8   : > { %v282_v2 = vpop.f32.mrf.mxu0  ;;  %v835_v3 = vpop.f32.mrf.mxu1 }
  0xd9   : > { %368 = vst [vmem:[%s694_s24 + $0x28] sm:$0xff] %v282_v2  ;;  %v838_v4 = vpop.f32.mrf.mxu2  ;;  %v851_v19 = vpop.f32.mrf.mxu3  ;;  %v441_v22 = vmul.f32 %v282_v2, %v282_v2  ;;  %v400_v24 = vadd.f32 %v399_v21, %v282_v2  ;;  %v449_v54 = vmul.f32 %v835_v3, %v835_v3 }
  0xda   : > { %376 = vst [vmem:[%s694_s24 + $0x68] sm:$0xff] %v835_v3 }
  0xdb   : > { %383 = vst [vmem:[%s694_s24 + $0xa0] sm:$0xff] %v838_v4  ;;  %v472_v26 = vadd.f32 %v471_v23, %v441_v22 }
  0xdc   : > { %391 = vst [vmem:[%s694_s24 + $0xe0] sm:$0xff] %v851_v19 }
  0xe0   : > { %v285_v13 = vpop.f32.mrf.mxu0  ;;  %v309_v14 = vpop.f32.mrf.mxu1 }
  0xe1   : > { %369 = vst [vmem:[%s694_s24 + $0x30] sm:$0xff] %v285_v13  ;;  %v849_v18 = vpop.f32.mrf.mxu2  ;;  %v442_v25 = vmul.f32 %v285_v13, %v285_v13  ;;  %v401_v27 = vadd.f32 %v400_v24, %v285_v13  ;;  %v859_v34 = vpop.f32.mrf.mxu3  ;;  %v454_v13 = vmul.f32 %v812_v60, %v812_v60 }
  0xe2   : > { %377 = vst [vmem:[%s694_s24 + $0x70] sm:$0xff] %v309_v14  ;;  %v457_v23 = vmul.f32 %v849_v18, %v849_v18 }
  0xe3   : > { %384 = vst [vmem:[%s694_s24 + $0xa8] sm:$0xff] %v849_v18  ;;  %v473_v30 = vadd.f32 %v472_v26, %v442_v25 }
  0xe4   : > { %392 = vst [vmem:[%s694_s24 + $0xe8] sm:$0xff] %v859_v34 }
  0xe8   : > { %v288_v28 = vpop.f32.mrf.mxu0  ;;  %v312_v29 = vpop.f32.mrf.mxu1 }
  0xe9   : > { %370 = vst [vmem:[%s694_s24 + $0x38] sm:$0xff] %v288_v28  ;;  %v402_v31 = vadd.f32 %v401_v27, %v288_v28  ;;  %v443_v32 = vmul.f32 %v288_v28, %v288_v28  ;;  %v333_v33 = vpop.f32.mrf.mxu2  ;;  %v357_v48 = vpop.f32.mrf.mxu3  ;;  %v451_v2 = vmul.f32 %v312_v29, %v312_v29 }
  0xea   : > { %378 = vst [vmem:[%s694_s24 + $0x78] sm:$0xff] %v312_v29  ;;  %v458_v26 = vmul.f32 %v333_v33, %v333_v33 }
  0xeb   : > { %v403_v36 = vadd.f32 %v402_v31, %v782_v50  ;;  %v474_v37 = vadd.f32 %v473_v30, %v443_v32  ;;  %385 = vst [vmem:[%s694_s24 + $0xb0] sm:$0xff] %v333_v33 }
  0xec   : > { %393 = vst [vmem:[%s694_s24 + $0xf0] sm:$0xff] %v357_v48 }
  0xed   : > { %v404_v39 = vadd.f32 %v403_v36, %v787_v52  ;;  %v475_v40 = vadd.f32 %v474_v37, %v444_v35  ;;  %v463_v37 = vmul.f32 %v840_v5, %v840_v5 }
  0xef   : > { %v405_v42 = vadd.f32 %v404_v39, %v796_v55  ;;  %v476_v43 = vadd.f32 %v475_v40, %v445_v38 }
  0xf1   : > { %v477_v45 = vadd.f32 %v476_v43, %v446_v41  ;;  %v406_v46 = vadd.f32 %v405_v42, %v809_v59  ;;  %v336_v47 = vpop.f32.mrf.mxu2  ;;  %v450_v59 = vmul.f32 %v309_v14, %v309_v14  ;;  %v360_v8 = vpop.f32.mrf.mxu3  ;;  %v465_v42 = vmul.f32 %v859_v34, %v859_v34 }
  0xf2   : > { %386 = vst [vmem:[%s694_s24 + $0xb8] sm:$0xff] %v336_v47  ;;  %v459_v27 = vmul.f32 %v336_v47, %v336_v47 }
  0xf3   : > { %v407_v50 = vadd.f32 %v406_v46, %v822_v63  ;;  %v478_v51 = vadd.f32 %v477_v45, %v447_v44  ;;  %394 = vst [vmem:[%s694_s24 + $0xf8] sm:$0xff] %v360_v8  ;;  %v466_v45 = vmul.f32 %v357_v48, %v357_v48  ;;  %v467_v46 = vmul.f32 %v360_v8, %v360_v8 }
  0xf5   : > { %v408_v52 = vadd.f32 %v407_v50, %v835_v3  ;;  %v479_v55 = vadd.f32 %v478_v51, %v448_v49 }
  0xf7   : > { %v480_v58 = vadd.f32 %v479_v55, %v449_v54  ;;  %v409_v62 = vadd.f32 %v408_v52, %v309_v14 }
  0xf9   : > { %v481_v6 = vadd.f32 %v480_v58, %v450_v59  ;;  %v410_v7 = vadd.f32 %v409_v62, %v312_v29 }
  0xfb   : > { %v411_v63 = vadd.f32 %v410_v7, %v790_v53  ;;  %v482_v10 = vadd.f32 %v481_v6, %v451_v2  ;;  %v456_v53 = vmul.f32 %v838_v4, %v838_v4 }
  0xfd   : > { %v412_v3 = vadd.f32 %v411_v63, %v799_v56  ;;  %v483_v12 = vadd.f32 %v482_v10, %v452_v9 }
  0xff   : > { %v413_v14 = vadd.f32 %v412_v3, %v812_v60  ;;  %v484_v15 = vadd.f32 %v483_v12, %v453_v11 }
 0x101   : > { %v485_v17 = vadd.f32 %v484_v15, %v454_v13  ;;  %v414_v20 = vadd.f32 %v413_v14, %v825_v0  ;;  %v460_v0 = vmul.f32 %v801_v57, %v801_v57 }
 0x103   : > { %v415_v21 = vadd.f32 %v414_v20, %v838_v4  ;;  %v486_v22 = vadd.f32 %v485_v17, %v455_v16  ;;  %v461_v4 = vmul.f32 %v814_v61, %v814_v61 }
 0x105   : > { %v416_v56 = vadd.f32 %v415_v21, %v849_v18  ;;  %v487_v24 = vadd.f32 %v486_v22, %v456_v53  ;;  %v462_v18 = vmul.f32 %v827_v1, %v827_v1 }
 0x107   : > { %v488_v60 = vadd.f32 %v487_v24, %v457_v23  ;;  %v417_v25 = vadd.f32 %v416_v56, %v333_v33 }
 0x109   : > { %v489_v28 = vadd.f32 %v488_v60, %v458_v26  ;;  %v418_v29 = vadd.f32 %v417_v25, %v336_v47 }
 0x10b   : > { %v419_v30 = vadd.f32 %v418_v29, %v801_v57  ;;  %v490_v31 = vadd.f32 %v489_v28, %v459_v27  ;;  %v464_v57 = vmul.f32 %v851_v19, %v851_v19 }
 0x10d   : > { %v420_v32 = vadd.f32 %v419_v30, %v814_v61  ;;  %v491_v35 = vadd.f32 %v490_v31, %v460_v0 }
 0x10f   : > { %v421_v33 = vadd.f32 %v420_v32, %v827_v1  ;;  %v492_v36 = vadd.f32 %v491_v35, %v461_v4 }
 0x111   : > { %v493_v38 = vadd.f32 %v492_v36, %v462_v18  ;;  %v422_v39 = vadd.f32 %v421_v33, %v840_v5 }
 0x113   : > { %v423_v40 = vadd.f32 %v422_v39, %v851_v19  ;;  %v494_v41 = vadd.f32 %v493_v38, %v463_v37 }
 0x115   : > { %v424_v61 = vadd.f32 %v423_v40, %v859_v34  ;;  %v495_v43 = vadd.f32 %v494_v41, %v464_v57  ;;  %v395_v34 = vld [vmem:[%s940_s3] sm:$0x1] }
 0x117   : > { %v496_v1 = vadd.f32 %v495_v43, %v465_v42  ;;  %v425_v44 = vadd.f32 %v424_v61, %v357_v48  ;;  %v435_v48 = vld [vmem:[%s941_s4] sm:$0x1] }
 0x119   : > { %v497_v47 = vadd.f32 %v496_v1, %v466_v45  ;;  %v426_v49 = vadd.f32 %v425_v44, %v360_v8 }
 0x11b   : > { %v427_v50 = vrot.slane %v426_v49, 4  ;;  %v498_v5 = vadd.f32 %v497_v47, %v467_v46 }
 0x11d   : > { %v428_v51 = vadd.f32 %v427_v50, %v426_v49  ;;  %v499_v52 = vrot.slane %v498_v5, 4 }
 0x11f   : > { %v429_v54 = vrot.slane %v428_v51, 2  ;;  %v500_v55 = vadd.f32 %v499_v52, %v498_v5 }
 0x121   : > { %v430_v19 = vadd.f32 %v429_v54, %v428_v51  ;;  %v501_v58 = vrot.slane %v500_v55, 2 }
 0x123   : > { %v431_v62 = vrot.slane %v430_v19, 1  ;;  %v502_v59 = vadd.f32 %v501_v58, %v500_v55 }
 0x125   : > { %v432_v2 = vadd.f32 %v431_v62, %v430_v19  ;;  %v503_v6 = vrot.slane %v502_v59, 1 }
 0x127   : > { %v433_v7 = vadd.f32 %v432_v2, %v395_v34  ;;  %v504_v8 = vadd.f32 %v503_v6, %v502_v59 }
 0x129   : > { %434 = vst [vmem:[%s940_s3] sm:$0x1] %v433_v7  ;;  %v505_v9 = vadd.f32 %v504_v8, %v435_v48 }
 0x12b   : > { %506 = vst [vmem:[%s941_s4] sm:$0x1] %v505_v9 }
 0x12c PF: > { %s15_s15 = sadd.s32 1, %s650_s15  }
 0x12d   : > { %p12_p5 = scmp.ge.s32.totalorder %s15_s15, 4  }
 0x12f   :  { %14 = sbr.rel (!%p12_p5) target bundleno = 1 (0x1), region = 78 }

// kernel: _lambda_.11
= control target key start
LH: loop header
LB: loop body
LE: loop exit
PB: predicated region body
PF: predicated region fallthrough
CT: control target
= control target key end

     0   :  { %s717_s21 = smov 0   ;;  %s992_s0 = inlined_call_operand.vmem [shape: f32[512,128], index: 0, kind: input, shape index: {}]   ;;  %s993_s1 = inlined_call_operand.vmem [shape: f32[1,128], index: 1, kind: input, shape index: {}]   ;;  %s994_s2 = inlined_call_operand.vmem [shape: f32[1,128], index: 2, kind: input, shape index: {}]   ;;  %s995_s3 = inlined_call_operand.vmem [shape: f32[512,128], index: 3, kind: input, shape index: {}]   ;;  %s996_s4 = inlined_call_operand.vmem [shape: f32[1,128], index: 4, kind: input, shape index: {}]   ;;  %s997_s5 = inlined_call_operand.vmem [shape: f32[1,128], index: 5, kind: input, shape index: {}]   ;;  %s998_s6 = inlined_call_operand.vmem [shape: f32[512,128], index: 6, kind: output, shape index: {}]  }
   0x1 LB: > { %s649_s22 = sadd.s32 4294967295, %s680_s21   ;;  %p653_p0 = scmp.ge.s32.totalorder %s680_s21, 1  ;;  %s680_s21 = sphi %s717_s21, %s16_s21  }
   0x2   : > { %p224_p1 = scmp.lt.s32.totalorder %s680_s21, 3 }
   0x4   : > { %p225_p2 = pnand %p653_p0, %p224_p1 }
   0x5   : > { %s654_s23 = sshll.u32 (!%p225_p2), %s649_s22, 5 }
   0x6   : > { %228 = sbr.rel (%p225_p2) target bundleno = 70 (0x46), region = 44  ;;  %p260_p3 = scmp.lt.s32.totalorder (!%p225_p2), %s654_s23, 63 }
   0xb   : > { %s1000_s23 = smov (!%p260_p3, %s654_s23), 63  ;;  %v728_v0 = vld [vmem:[%s993_s1] ss:$0 sm:$0xff] }
   0xc   : > { %v733_v1 = vld [vmem:[%s996_s4] ss:$0 sm:$0xff]  ;;  %s735_s28 = sshll.u32 %s1000_s23, 3 }
   0xd   : > { %s741_s7 = scalar_lea.vmem %s992_s0, %s735_s28  ;;  %s747_s10 = scalar_lea.vmem %s995_s3, %s735_s28  ;;  %v752_v2 = vld [vmem:[%s994_s2] ss:$0 sm:$0xff] }
   0xe   : > { %v277_v3 = vld [vmem:[%s741_s7] sm:$0xff]  ;;  %v278_v5 = vld [vmem:[%s741_s7 + $0x8] sm:$0xff]  ;;  %v279_v11 = vld [vmem:[%s741_s7 + $0x10] sm:$0xff]  ;;  %s800_s17 = scalar_lea.vmem %s998_s6, %s735_s28 }
   0xf   : > { %v381_v4 = vld [vmem:[%s747_s10] sm:$0xff]  ;;  %v313_v6 = vmul.f32 %v728_v0, %v277_v3  ;;  %v314_v9 = vmul.f32 %v728_v0, %v278_v5  ;;  %v382_v10 = vld [vmem:[%s747_s10 + $0x8] sm:$0xff]  ;;  %v383_v12 = vld [vmem:[%s747_s10 + $0x10] sm:$0xff]  ;;  %v315_v14 = vmul.f32 %v728_v0, %v279_v11 }
  0x10   : > { %v417_v7 = vmul.f32 %v733_v1, %v381_v4  ;;  %v762_v8 = vld [vmem:[%s997_s5] ss:$0 sm:$0xff]  ;;  %v418_v13 = vmul.f32 %v733_v1, %v382_v10  ;;  %v419_v15 = vmul.f32 %v733_v1, %v383_v12  ;;  %v280_v16 = vld [vmem:[%s741_s7 + $0x18] sm:$0xff]  ;;  %v282_v24 = vld [vmem:[%s741_s7 + $0x28] sm:$0xff] }
  0x11   : > { %v384_v17 = vld [vmem:[%s747_s10 + $0x18] sm:$0xff]  ;;  %v281_v18 = vld [vmem:[%s741_s7 + $0x20] sm:$0xff]  ;;  %v349_v19 = vadd.f32 %v752_v2, %v313_v6  ;;  %v350_v20 = vadd.f32 %v752_v2, %v314_v9  ;;  %v316_v21 = vmul.f32 %v728_v0, %v280_v16  ;;  %v386_v25 = vld [vmem:[%s747_s10 + $0x28] sm:$0xff]  ;;  %v351_v26 = vadd.f32 %v752_v2, %v315_v14 }
  0x12   : > { %v420_v22 = vmul.f32 %v733_v1, %v384_v17  ;;  %v385_v23 = vld [vmem:[%s747_s10 + $0x20] sm:$0xff]  ;;  %v317_v27 = vmul.f32 %v728_v0, %v281_v18  ;;  %v318_v29 = vmul.f32 %v728_v0, %v282_v24  ;;  %v283_v30 = vld [vmem:[%s741_s7 + $0x30] sm:$0xff]  ;;  %v422_v35 = vmul.f32 %v733_v1, %v386_v25  ;;  %v284_v40 = vld [vmem:[%s741_s7 + $0x38] sm:$0xff] }
  0x13   : > { %v421_v28 = vmul.f32 %v733_v1, %v385_v23  ;;  %v387_v31 = vld [vmem:[%s747_s10 + $0x30] sm:$0xff]  ;;  %v449_v32 = vadd.f32 %v417_v7, %v349_v19  ;;  %v450_v33 = vadd.f32 %v418_v13, %v350_v20  ;;  %v352_v34 = vadd.f32 %v752_v2, %v316_v21  ;;  %v388_v49 = vld [vmem:[%s747_s10 + $0x38] sm:$0xff]  ;;  %v285_v50 = vld [vmem:[%s741_s7 + $0x40] sm:$0xff] }
  0x14   : > { %v451_v36 = vadd.f32 %v419_v15, %v351_v26  ;;  %v353_v37 = vadd.f32 %v752_v2, %v317_v27  ;;  %v354_v38 = vadd.f32 %v752_v2, %v318_v29  ;;  %v319_v39 = vmul.f32 %v728_v0, %v283_v30  ;;  %v389_v55 = vld [vmem:[%s747_s10 + $0x40] sm:$0xff]  ;;  %v286_v60 = vld [vmem:[%s741_s7 + $0x48] sm:$0xff]  ;;  %v287_v5 = vld [vmem:[%s741_s7 + $0x50] sm:$0xff] }
  0x15   : > { %v485_v41 = vadd.f32 %v762_v8, %v449_v32  ;;  %v486_v42 = vadd.f32 %v762_v8, %v450_v33  ;;  %v452_v43 = vadd.f32 %v420_v22, %v352_v34  ;;  %v423_v44 = vmul.f32 %v733_v1, %v387_v31  ;;  %v390_v61 = vld [vmem:[%s747_s10 + $0x48] sm:$0xff]  ;;  %v391_v6 = vld [vmem:[%s747_s10 + $0x50] sm:$0xff]  ;;  %v288_v7 = vld [vmem:[%s741_s7 + $0x58] sm:$0xff] }
  0x16   : > { %v487_v45 = vadd.f32 %v762_v8, %v451_v36  ;;  %v453_v46 = vadd.f32 %v421_v28, %v353_v37  ;;  %v454_v47 = vadd.f32 %v422_v35, %v354_v38  ;;  %v355_v48 = vadd.f32 %v752_v2, %v319_v39  ;;  %v392_v13 = vld [vmem:[%s747_s10 + $0x58] sm:$0xff]  ;;  %v289_v18 = vld [vmem:[%s741_s7 + $0x60] sm:$0xff]  ;;  %v290_v24 = vld [vmem:[%s741_s7 + $0x68] sm:$0xff] }
  0x17   : > { %v517_v51 = vmax.f32 %v485_v41, 0.0  ;;  %v518_v52 = vmax.f32 %v486_v42, 0.0  ;;  %v488_v53 = vadd.f32 %v762_v8, %v452_v43  ;;  %v320_v54 = vmul.f32 %v728_v0, %v284_v40  ;;  %v393_v19 = vld [vmem:[%s747_s10 + $0x60] sm:$0xff]  ;;  %v394_v29 = vld [vmem:[%s747_s10 + $0x68] sm:$0xff]  ;;  %v291_v34 = vld [vmem:[%s741_s7 + $0x70] sm:$0xff] }
  0x18   : > { %v519_v56 = vmax.f32 %v487_v45, 0.0  ;;  %v489_v57 = vadd.f32 %v762_v8, %v453_v46  ;;  %v490_v58 = vadd.f32 %v762_v8, %v454_v47  ;;  %v455_v59 = vadd.f32 %v423_v44, %v355_v48  ;;  %v395_v39 = vld [vmem:[%s747_s10 + $0x70] sm:$0xff]  ;;  %v292_v44 = vld [vmem:[%s741_s7 + $0x78] sm:$0xff] }
  0x19   : > { %549 = vst [vmem:[%s800_s17] sm:$0xff] %v517_v51  ;;  %v520_v62 = vmax.f32 %v488_v53, 0.0  ;;  %v356_v63 = vadd.f32 %v752_v2, %v320_v54  ;;  %v424_v3 = vmul.f32 %v733_v1, %v388_v49  ;;  %v321_v4 = vmul.f32 %v728_v0, %v285_v50  ;;  %v396_v49 = vld [vmem:[%s747_s10 + $0x78] sm:$0xff]  ;;  %v293_v54 = vld [vmem:[%s741_s7 + $0x80] sm:$0xff] }
  0x1a   : > { %550 = vst [vmem:[%s800_s17 + $0x8] sm:$0xff] %v518_v52  ;;  %v521_v9 = vmax.f32 %v489_v57, 0.0  ;;  %v522_v10 = vmax.f32 %v490_v58, 0.0  ;;  %v491_v11 = vadd.f32 %v762_v8, %v455_v59  ;;  %v425_v12 = vmul.f32 %v733_v1, %v389_v55  ;;  %v397_v59 = vld [vmem:[%s747_s10 + $0x80] sm:$0xff] }
  0x1b   : > { %551 = vst [vmem:[%s800_s17 + $0x10] sm:$0xff] %v519_v56  ;;  %v456_v14 = vadd.f32 %v424_v3, %v356_v63  ;;  %v357_v15 = vadd.f32 %v752_v2, %v321_v4  ;;  %v322_v16 = vmul.f32 %v728_v0, %v286_v60  ;;  %v426_v17 = vmul.f32 %v733_v1, %v390_v61  ;;  %v294_v60 = vld [vmem:[%s741_s7 + $0x88] sm:$0xff] }
  0x1c   : > { %552 = vst [vmem:[%s800_s17 + $0x18] sm:$0xff] %v520_v62  ;;  %v523_v20 = vmax.f32 %v491_v11, 0.0  ;;  %v323_v21 = vmul.f32 %v728_v0, %v287_v5  ;;  %v427_v22 = vmul.f32 %v733_v1, %v391_v6  ;;  %v324_v23 = vmul.f32 %v728_v0, %v288_v7  ;;  %v398_v61 = vld [vmem:[%s747_s10 + $0x88] sm:$0xff]  ;;  %v399_v11 = vld [vmem:[%s747_s10 + $0x90] sm:$0xff] }
  0x1d   : > { %553 = vst [vmem:[%s800_s17 + $0x20] sm:$0xff] %v521_v9  ;;  %v492_v25 = vadd.f32 %v762_v8, %v456_v14  ;;  %v457_v26 = vadd.f32 %v425_v12, %v357_v15  ;;  %v358_v27 = vadd.f32 %v752_v2, %v322_v16  ;;  %v428_v28 = vmul.f32 %v733_v1, %v392_v13  ;;  %v296_v12 = vld [vmem:[%s741_s7 + $0x98] sm:$0xff] }
  0x1e   : > { %554 = vst [vmem:[%s800_s17 + $0x28] sm:$0xff] %v522_v10  ;;  %v359_v30 = vadd.f32 %v752_v2, %v323_v21  ;;  %v360_v31 = vadd.f32 %v752_v2, %v324_v23  ;;  %v325_v32 = vmul.f32 %v728_v0, %v289_v18  ;;  %v429_v33 = vmul.f32 %v733_v1, %v393_v19  ;;  %v295_v10 = vld [vmem:[%s741_s7 + $0x90] sm:$0xff] }
  0x1f   : > { %555 = vst [vmem:[%s800_s17 + $0x30] sm:$0xff] %v523_v20  ;;  %v524_v35 = vmax.f32 %v492_v25, 0.0  ;;  %v493_v36 = vadd.f32 %v762_v8, %v457_v26  ;;  %v458_v37 = vadd.f32 %v426_v17, %v358_v27  ;;  %v326_v38 = vmul.f32 %v728_v0, %v290_v24  ;;  %v400_v17 = vld [vmem:[%s747_s10 + $0x98] sm:$0xff]  ;;  %v401_v27 = vld [vmem:[%s747_s10 + $0xa0] sm:$0xff] }
  0x20   : > { %v459_v40 = vadd.f32 %v427_v22, %v359_v30  ;;  %v460_v41 = vadd.f32 %v428_v28, %v360_v31  ;;  %v361_v42 = vadd.f32 %v752_v2, %v325_v32  ;;  %v430_v43 = vmul.f32 %v733_v1, %v394_v29  ;;  %v297_v22 = vld [vmem:[%s741_s7 + $0xa0] sm:$0xff]  ;;  %v298_v28 = vld [vmem:[%s741_s7 + $0xa8] sm:$0xff] }
  0x21   : > { %556 = vst [vmem:[%s800_s17 + $0x38] sm:$0xff] %v524_v35  ;;  %v525_v45 = vmax.f32 %v493_v36, 0.0  ;;  %v494_v46 = vadd.f32 %v762_v8, %v458_v37  ;;  %v362_v47 = vadd.f32 %v752_v2, %v326_v38  ;;  %v327_v48 = vmul.f32 %v728_v0, %v291_v34  ;;  %v402_v37 = vld [vmem:[%s747_s10 + $0xa8] sm:$0xff]  ;;  %v299_v38 = vld [vmem:[%s741_s7 + $0xb0] sm:$0xff] }
  0x22   : > { %v495_v50 = vadd.f32 %v762_v8, %v459_v40  ;;  %v496_v51 = vadd.f32 %v762_v8, %v460_v41  ;;  %v461_v52 = vadd.f32 %v429_v33, %v361_v42  ;;  %v431_v53 = vmul.f32 %v733_v1, %v395_v39 }
  0x23   : > { %557 = vst [vmem:[%s800_s17 + $0x40] sm:$0xff] %v525_v45  ;;  %v526_v55 = vmax.f32 %v494_v46, 0.0  ;;  %v462_v56 = vadd.f32 %v430_v43, %v362_v47  ;;  %v363_v57 = vadd.f32 %v752_v2, %v327_v48  ;;  %v328_v58 = vmul.f32 %v728_v0, %v292_v44  ;;  %v403_v47 = vld [vmem:[%s747_s10 + $0xb0] sm:$0xff]  ;;  %v300_v48 = vld [vmem:[%s741_s7 + $0xb8] sm:$0xff] }
  0x24   : > { %v527_v62 = vmax.f32 %v495_v50, 0.0  ;;  %v528_v63 = vmax.f32 %v496_v51, 0.0  ;;  %v497_v3 = vadd.f32 %v762_v8, %v461_v52  ;;  %v432_v4 = vmul.f32 %v733_v1, %v396_v49 }
  0x25   : > { %558 = vst [vmem:[%s800_s17 + $0x48] sm:$0xff] %v526_v55  ;;  %v498_v5 = vadd.f32 %v762_v8, %v462_v56  ;;  %v463_v6 = vadd.f32 %v431_v53, %v363_v57  ;;  %v364_v7 = vadd.f32 %v752_v2, %v328_v58  ;;  %v329_v9 = vmul.f32 %v728_v0, %v293_v54  ;;  %v404_v53 = vld [vmem:[%s747_s10 + $0xb8] sm:$0xff]  ;;  %v301_v58 = vld [vmem:[%s741_s7 + $0xc0] sm:$0xff] }
  0x26   : > { %559 = vst [vmem:[%s800_s17 + $0x50] sm:$0xff] %v527_v62  ;;  %v529_v13 = vmax.f32 %v497_v3, 0.0  ;;  %v433_v14 = vmul.f32 %v733_v1, %v397_v59  ;;  %v330_v15 = vmul.f32 %v728_v0, %v294_v60  ;;  %v434_v16 = vmul.f32 %v733_v1, %v398_v61  ;;  %v302_v3 = vld [vmem:[%s741_s7 + $0xc8] sm:$0xff] }
  0x27   : > { %560 = vst [vmem:[%s800_s17 + $0x58] sm:$0xff] %v528_v63  ;;  %v530_v18 = vmax.f32 %v498_v5, 0.0  ;;  %v499_v19 = vadd.f32 %v762_v8, %v463_v6  ;;  %v464_v20 = vadd.f32 %v432_v4, %v364_v7  ;;  %v365_v21 = vadd.f32 %v752_v2, %v329_v9  ;;  %v405_v63 = vld [vmem:[%s747_s10 + $0xc0] sm:$0xff]  ;;  %v406_v4 = vld [vmem:[%s747_s10 + $0xc8] sm:$0xff] }
  0x28   : > { %561 = vst [vmem:[%s800_s17 + $0x60] sm:$0xff] %v529_v13  ;;  %v366_v23 = vadd.f32 %v752_v2, %v330_v15  ;;  %v331_v24 = vmul.f32 %v728_v0, %v295_v10  ;;  %v435_v25 = vmul.f32 %v733_v1, %v399_v11  ;;  %v332_v26 = vmul.f32 %v728_v0, %v296_v12  ;;  %v407_v15 = vld [vmem:[%s747_s10 + $0xd0] sm:$0xff] }
  0x29   : > { %562 = vst [vmem:[%s800_s17 + $0x68] sm:$0xff] %v530_v18  ;;  %v531_v29 = vmax.f32 %v499_v19, 0.0  ;;  %v500_v30 = vadd.f32 %v762_v8, %v464_v20  ;;  %v465_v31 = vadd.f32 %v433_v14, %v365_v21  ;;  %v436_v32 = vmul.f32 %v733_v1, %v400_v17  ;;  %v303_v14 = vld [vmem:[%s741_s7 + $0xd0] sm:$0xff]  ;;  %v408_v21 = vld [vmem:[%s747_s10 + $0xd8] sm:$0xff] }
  0x2a   : > { %v466_v33 = vadd.f32 %v434_v16, %v366_v23  ;;  %v367_v34 = vadd.f32 %v752_v2, %v331_v24  ;;  %v368_v35 = vadd.f32 %v752_v2, %v332_v26  ;;  %v333_v36 = vmul.f32 %v728_v0, %v297_v22  ;;  %v304_v16 = vld [vmem:[%s741_s7 + $0xd8] sm:$0xff]  ;;  %v305_v26 = vld [vmem:[%s741_s7 + $0xe0] sm:$0xff] }
  0x2b   : > { %563 = vst [vmem:[%s800_s17 + $0x70] sm:$0xff] %v531_v29  ;;  %v532_v39 = vmax.f32 %v500_v30, 0.0  ;;  %v501_v40 = vadd.f32 %v762_v8, %v465_v31  ;;  %v437_v41 = vmul.f32 %v733_v1, %v401_v27  ;;  %v334_v42 = vmul.f32 %v728_v0, %v298_v28  ;;  %v409_v31 = vld [vmem:[%s747_s10 + $0xe0] sm:$0xff] }
  0x2c   : > { %v502_v43 = vadd.f32 %v762_v8, %v466_v33  ;;  %v467_v44 = vadd.f32 %v435_v25, %v367_v34  ;;  %v468_v45 = vadd.f32 %v436_v32, %v368_v35  ;;  %v369_v46 = vadd.f32 %v752_v2, %v333_v36  ;;  %v306_v32 = vld [vmem:[%s741_s7 + $0xe8] sm:$0xff] }
  0x2d   : > { %564 = vst [vmem:[%s800_s17 + $0x78] sm:$0xff] %v532_v39  ;;  %v533_v49 = vmax.f32 %v501_v40, 0.0  ;;  %v370_v50 = vadd.f32 %v752_v2, %v334_v42  ;;  %v438_v51 = vmul.f32 %v733_v1, %v402_v37  ;;  %v335_v52 = vmul.f32 %v728_v0, %v299_v38  ;;  %v307_v42 = vld [vmem:[%s741_s7 + $0xf0] sm:$0xff] }
  0x2e   : > { %v534_v54 = vmax.f32 %v502_v43, 0.0  ;;  %v503_v55 = vadd.f32 %v762_v8, %v467_v44  ;;  %v504_v56 = vadd.f32 %v762_v8, %v468_v45  ;;  %v469_v57 = vadd.f32 %v437_v41, %v369_v46  ;;  %v410_v41 = vld [vmem:[%s747_s10 + $0xe8] sm:$0xff] }
  0x2f   : > { %565 = vst [vmem:[%s800_s17 + $0x80] sm:$0xff] %v533_v49  ;;  %v470_v59 = vadd.f32 %v438_v51, %v370_v50  ;;  %v371_v60 = vadd.f32 %v752_v2, %v335_v52  ;;  %v439_v61 = vmul.f32 %v733_v1, %v403_v47  ;;  %v336_v62 = vmul.f32 %v728_v0, %v300_v48  ;;  %v411_v51 = vld [vmem:[%s747_s10 + $0xf0] sm:$0xff]  ;;  %v308_v52 = vld [vmem:[%s741_s7 + $0xf8] sm:$0xff] }
  0x30   : > { %566 = vst [vmem:[%s800_s17 + $0x88] sm:$0xff] %v534_v54  ;;  %v535_v5 = vmax.f32 %v503_v55, 0.0  ;;  %v536_v6 = vmax.f32 %v504_v56, 0.0  ;;  %v505_v7 = vadd.f32 %v762_v8, %v469_v57  ;;  %v440_v9 = vmul.f32 %v733_v1, %v404_v53  ;;  %v412_v57 = vld [vmem:[%s747_s10 + $0xf8] sm:$0xff] }
  0x31   : > { %v506_v10 = vadd.f32 %v762_v8, %v470_v59  ;;  %v471_v11 = vadd.f32 %v439_v61, %v371_v60  ;;  %v372_v12 = vadd.f32 %v752_v2, %v336_v62  ;;  %v337_v13 = vmul.f32 %v728_v0, %v301_v58 }
  0x32   : > { %567 = vst [vmem:[%s800_s17 + $0x90] sm:$0xff] %v535_v5  ;;  %v537_v17 = vmax.f32 %v505_v7, 0.0  ;;  %v441_v18 = vmul.f32 %v733_v1, %v405_v63  ;;  %v338_v19 = vmul.f32 %v728_v0, %v302_v3  ;;  %v442_v20 = vmul.f32 %v733_v1, %v406_v4 }
  0x33   : > { %568 = vst [vmem:[%s800_s17 + $0x98] sm:$0xff] %v536_v6  ;;  %v538_v22 = vmax.f32 %v506_v10, 0.0  ;;  %v507_v23 = vadd.f32 %v762_v8, %v471_v11  ;;  %v472_v24 = vadd.f32 %v440_v9, %v372_v12  ;;  %v373_v25 = vadd.f32 %v752_v2, %v337_v13 }
  0x34   : > { %569 = vst [vmem:[%s800_s17 + $0xa0] sm:$0xff] %v537_v17  ;;  %v374_v27 = vadd.f32 %v752_v2, %v338_v19  ;;  %v339_v28 = vmul.f32 %v728_v0, %v303_v14  ;;  %v443_v29 = vmul.f32 %v733_v1, %v407_v15  ;;  %v340_v30 = vmul.f32 %v728_v0, %v304_v16 }
  0x35   : > { %570 = vst [vmem:[%s800_s17 + $0xa8] sm:$0xff] %v538_v22  ;;  %v539_v33 = vmax.f32 %v507_v23, 0.0  ;;  %v508_v34 = vadd.f32 %v762_v8, %v472_v24  ;;  %v473_v35 = vadd.f32 %v441_v18, %v373_v25  ;;  %v444_v36 = vmul.f32 %v733_v1, %v408_v21 }
  0x36   : > { %v474_v37 = vadd.f32 %v442_v20, %v374_v27  ;;  %v375_v38 = vadd.f32 %v752_v2, %v339_v28  ;;  %v376_v39 = vadd.f32 %v752_v2, %v340_v30  ;;  %v341_v40 = vmul.f32 %v728_v0, %v305_v26 }
  0x37   : > { %571 = vst [vmem:[%s800_s17 + $0xb0] sm:$0xff] %v539_v33  ;;  %v540_v43 = vmax.f32 %v508_v34, 0.0  ;;  %v509_v44 = vadd.f32 %v762_v8, %v473_v35  ;;  %v445_v45 = vmul.f32 %v733_v1, %v409_v31  ;;  %v342_v46 = vmul.f32 %v728_v0, %v306_v32 }
  0x38   : > { %v510_v47 = vadd.f32 %v762_v8, %v474_v37  ;;  %v475_v48 = vadd.f32 %v443_v29, %v375_v38  ;;  %v476_v49 = vadd.f32 %v444_v36, %v376_v39  ;;  %v377_v50 = vadd.f32 %v752_v2, %v341_v40 }
  0x39   : > { %572 = vst [vmem:[%s800_s17 + $0xb8] sm:$0xff] %v540_v43  ;;  %v541_v53 = vmax.f32 %v509_v44, 0.0  ;;  %v378_v54 = vadd.f32 %v752_v2, %v342_v46  ;;  %v446_v55 = vmul.f32 %v733_v1, %v410_v41  ;;  %v343_v56 = vmul.f32 %v728_v0, %v307_v42 }
  0x3a   : > { %v542_v58 = vmax.f32 %v510_v47, 0.0  ;;  %v511_v59 = vadd.f32 %v762_v8, %v475_v48  ;;  %v512_v60 = vadd.f32 %v762_v8, %v476_v49  ;;  %v477_v61 = vadd.f32 %v445_v45, %v377_v50 }
  0x3b   : > { %573 = vst [vmem:[%s800_s17 + $0xc0] sm:$0xff] %v541_v53  ;;  %v478_v62 = vadd.f32 %v446_v55, %v378_v54  ;;  %v379_v63 = vadd.f32 %v752_v2, %v343_v56  ;;  %v447_v3 = vmul.f32 %v733_v1, %v411_v51  ;;  %v344_v4 = vmul.f32 %v728_v0, %v308_v52 }
  0x3c   : > { %574 = vst [vmem:[%s800_s17 + $0xc8] sm:$0xff] %v542_v58  ;;  %v543_v5 = vmax.f32 %v511_v59, 0.0  ;;  %v544_v6 = vmax.f32 %v512_v60, 0.0  ;;  %v513_v7 = vadd.f32 %v762_v8, %v477_v61  ;;  %v448_v9 = vmul.f32 %v733_v1, %v412_v57 }
  0x3d   : > { %v514_v10 = vadd.f32 %v762_v8, %v478_v62  ;;  %v479_v11 = vadd.f32 %v447_v3, %v379_v63  ;;  %v380_v12 = vadd.f32 %v752_v2, %v344_v4 }
  0x3e   : > { %575 = vst [vmem:[%s800_s17 + $0xd0] sm:$0xff] %v543_v5  ;;  %v545_v13 = vmax.f32 %v513_v7, 0.0 }
  0x3f   : > { %576 = vst [vmem:[%s800_s17 + $0xd8] sm:$0xff] %v544_v6  ;;  %v546_v14 = vmax.f32 %v514_v10, 0.0  ;;  %v515_v0 = vadd.f32 %v762_v8, %v479_v11  ;;  %v480_v15 = vadd.f32 %v448_v9, %v380_v12 }
  0x40   : > { %577 = vst [vmem:[%s800_s17 + $0xe0] sm:$0xff] %v545_v13 }
  0x41   : > { %578 = vst [vmem:[%s800_s17 + $0xe8] sm:$0xff] %v546_v14  ;;  %v547_v16 = vmax.f32 %v515_v0, 0.0  ;;  %v516_v17 = vadd.f32 %v762_v8, %v480_v15 }
  0x43   : > { %579 = vst [vmem:[%s800_s17 + $0xf0] sm:$0xff] %v547_v16  ;;  %v548_v1 = vmax.f32 %v516_v17, 0.0 }
  0x45   : > { %580 = vst [vmem:[%s800_s17 + $0xf8] sm:$0xff] %v548_v1 }
  0x46 PF: > { %s16_s21 = sadd.s32 1, %s680_s21  }
  0x47   : > { %p13_p4 = scmp.ge.s32.totalorder %s16_s21, 4  }
  0x49   :  { %15 = sbr.rel (!%p13_p4) target bundleno = 1 (0x1), region = 77 }

// kernel: _lambda_.10
= control target key start
LH: loop header
LB: loop body
LE: loop exit
PB: predicated region body
PF: predicated region fallthrough
CT: control target
= control target key end

     0   :  { %s1220_s30 = smov 0   ;;  %s1811_s0 = inlined_call_operand.vmem [shape: f32[512,128], index: 0, kind: input, shape index: {}]   ;;  %s1812_s1 = inlined_call_operand.vmem [shape: f32[128,128], index: 1, kind: input, shape index: {}]   ;;  %s1813_s2 = inlined_call_operand.vmem [shape: f32[512,128], index: 2, kind: input, shape index: {}]   ;;  %s1814_s3 = inlined_call_operand.vmem [shape: f32[128,128], index: 3, kind: input, shape index: {}]   ;;  %s1815_s4 = inlined_call_operand.vmem [shape: f32[512,128], index: 4, kind: output, shape index: {0}]   ;;  %s1816_s5 = inlined_call_operand.vmem [shape: f32[512,128], index: 5, kind: output, shape index: {1}]   ;;  %s1817_s6 = inlined_call_operand.vmem [shape: f32[1,128], index: 6, kind: output, shape index: {2}]   ;;  %s1818_s7 = inlined_call_operand.vmem [shape: f32[1,128], index: 7, kind: output, shape index: {3}]   ;;  %s1819_s8 = inlined_call_operand.vmem [shape: f32[1,128], index: 8, kind: output, shape index: {4}]   ;;  %s1820_s9 = inlined_call_operand.vmem [shape: f32[1,128], index: 9, kind: output, shape index: {5}]  }
   0x1 LB: > { %s1104_s10 = sadd.s32 4294967295, %s1167_s30   ;;  %p1108_p0 = scmp.ge.s32.totalorder %s1167_s30, 1  ;;  %s1167_s30 = sphi %s1220_s30, %s20_s30  }
   0x2   : > { %p290_p1 = scmp.lt.s32.totalorder %s1167_s30, 3 }
   0x4   : > { %p291_p2 = pnand %p1108_p0, %p290_p1 }
   0x5   : > { %s1109_s11 = sshll.u32 (!%p291_p2), %s1104_s10, 5  ;;  %p1117_p4 = scmp.ne.s32.totalorder (!%p291_p2), %s1104_s10, 0 }
   0x6   : > { %294 = sbr.rel (%p291_p2) target bundleno = 351 (0x15f), region = 36  ;;  %p337_p3 = scmp.lt.s32.totalorder (!%p291_p2), %s1109_s11, 63 }
   0xb   : > { %s1822_s11 = smov (!%p337_p3, %s1109_s11), 63  ;;  %363 = sbr.rel (%p1117_p4) target bundleno = 21 (0x15), region = 40 }
   0xc   : > { %s1110_s12 = sshll.u32 %s1822_s11, 3 }
   0xd   : > { %s1231_s15 = scalar_lea.vmem %s1811_s0, %s1110_s12  ;;  %s1236_s18 = scalar_lea.vmem %s1813_s2, %s1110_s12 }
   0xe   : > { %s1241_s21 = scalar_lea.vmem %s1815_s4, %s1110_s12  ;;  %s1246_s24 = scalar_lea.vmem %s1816_s5, %s1110_s12 }
  0x10   : > { %v1169_v0 = vmov 0.0  }
  0x11   : > { %364 = vst [vmem:[%s1817_s6] sm:$0x1] %v1169_v0 }
  0x12   : > { %365 = vst [vmem:[%s1818_s7] sm:$0x1] %v1169_v0 }
  0x13   : > { %366 = vst [vmem:[%s1819_s8] sm:$0x1] %v1169_v0 }
  0x14   : > { %367 = vst [vmem:[%s1820_s9] sm:$0x1] %v1169_v0 }
  0x15 PF: > { %v415_v1 = vld [vmem:[%s1812_s1 + $0x78] sm:$0xff]  ;;  %v414_v3 = vld [vmem:[%s1812_s1 + $0x70] sm:$0xff]  ;;  %v413_v5 = vld [vmem:[%s1812_s1 + $0x68] sm:$0xff] }
  0x16   : > { %v576_v2 = vld [vmem:[%s1814_s3 + $0x78] sm:$0xff]  ;;  %416 = vmatpush.msra.mxu0 %v415_v1  ;;  %v575_v4 = vld [vmem:[%s1814_s3 + $0x70] sm:$0xff]  ;;  %v574_v6 = vld [vmem:[%s1814_s3 + $0x68] sm:$0xff]  ;;  %1120 = vmatpush.msra.mxu2 %v415_v1 }
  0x17   : > { %577 = vmatpush.msra.mxu1 %v576_v2  ;;  %1136 = vmatpush.msra.mxu3 %v576_v2  ;;  %v412_v7 = vld [vmem:[%s1812_s1 + $0x60] sm:$0xff]  ;;  %v411_v9 = vld [vmem:[%s1812_s1 + $0x58] sm:$0xff]  ;;  %v410_v11 = vld [vmem:[%s1812_s1 + $0x50] sm:$0xff] }
  0x18   : > { %417 = vmatpush.msra.mxu0 %v414_v3  ;;  %v573_v8 = vld [vmem:[%s1814_s3 + $0x60] sm:$0xff]  ;;  %1121 = vmatpush.msra.mxu2 %v414_v3  ;;  %v572_v10 = vld [vmem:[%s1814_s3 + $0x58] sm:$0xff]  ;;  %v571_v12 = vld [vmem:[%s1814_s3 + $0x50] sm:$0xff] }
  0x19   : > { %578 = vmatpush.msra.mxu1 %v575_v4  ;;  %1137 = vmatpush.msra.mxu3 %v575_v4  ;;  %v409_v13 = vld [vmem:[%s1812_s1 + $0x48] sm:$0xff]  ;;  %v408_v15 = vld [vmem:[%s1812_s1 + $0x40] sm:$0xff]  ;;  %v407_v17 = vld [vmem:[%s1812_s1 + $0x38] sm:$0xff] }
  0x1a   : > { %418 = vmatpush.msra.mxu0 %v413_v5  ;;  %1122 = vmatpush.msra.mxu2 %v413_v5  ;;  %v570_v14 = vld [vmem:[%s1814_s3 + $0x48] sm:$0xff]  ;;  %v569_v16 = vld [vmem:[%s1814_s3 + $0x40] sm:$0xff]  ;;  %v568_v18 = vld [vmem:[%s1814_s3 + $0x38] sm:$0xff] }
  0x1b   : > { %579 = vmatpush.msra.mxu1 %v574_v6  ;;  %1138 = vmatpush.msra.mxu3 %v574_v6  ;;  %v406_v19 = vld [vmem:[%s1812_s1 + $0x30] sm:$0xff]  ;;  %v405_v21 = vld [vmem:[%s1812_s1 + $0x28] sm:$0xff]  ;;  %v404_v23 = vld [vmem:[%s1812_s1 + $0x20] sm:$0xff] }
  0x1c   : > { %419 = vmatpush.msra.mxu0 %v412_v7  ;;  %1123 = vmatpush.msra.mxu2 %v412_v7  ;;  %v567_v20 = vld [vmem:[%s1814_s3 + $0x30] sm:$0xff]  ;;  %v566_v22 = vld [vmem:[%s1814_s3 + $0x28] sm:$0xff]  ;;  %v565_v24 = vld [vmem:[%s1814_s3 + $0x20] sm:$0xff] }
  0x1d   : > { %580 = vmatpush.msra.mxu1 %v573_v8  ;;  %1139 = vmatpush.msra.mxu3 %v573_v8  ;;  %v403_v25 = vld [vmem:[%s1812_s1 + $0x18] sm:$0xff]  ;;  %v402_v27 = vld [vmem:[%s1812_s1 + $0x10] sm:$0xff]  ;;  %v401_v29 = vld [vmem:[%s1812_s1 + $0x8] sm:$0xff] }
  0x1e   : > { %420 = vmatpush.msra.mxu0 %v411_v9  ;;  %1124 = vmatpush.msra.mxu2 %v411_v9  ;;  %v564_v26 = vld [vmem:[%s1814_s3 + $0x18] sm:$0xff]  ;;  %v563_v28 = vld [vmem:[%s1814_s3 + $0x10] sm:$0xff]  ;;  %v562_v30 = vld [vmem:[%s1814_s3 + $0x8] sm:$0xff] }
  0x1f   : > { %581 = vmatpush.msra.mxu1 %v572_v10  ;;  %1140 = vmatpush.msra.mxu3 %v572_v10  ;;  %v400_v31 = vld [vmem:[%s1812_s1] sm:$0xff]  ;;  %v369_v37 = vld [vmem:[%s1231_s15 + $0x8] sm:$0xff]  ;;  %v370_v41 = vld [vmem:[%s1231_s15 + $0x10] sm:$0xff] }
  0x20   : > { %421 = vmatpush.msra.mxu0 %v410_v11  ;;  %1125 = vmatpush.msra.mxu2 %v410_v11  ;;  %v561_v32 = vld [vmem:[%s1814_s3] sm:$0xff]  ;;  %v530_v38 = vld [vmem:[%s1236_s18 + $0x8] sm:$0xff]  ;;  %v531_v42 = vld [vmem:[%s1236_s18 + $0x10] sm:$0xff] }
  0x21   : > { %582 = vmatpush.msra.mxu1 %v571_v12  ;;  %1141 = vmatpush.msra.mxu3 %v571_v12  ;;  %v368_v33 = vld [vmem:[%s1231_s15] sm:$0xff]  ;;  %v385_v39 = vld [vmem:[%s1231_s15 + $0x88] sm:$0xff]  ;;  %v386_v43 = vld [vmem:[%s1231_s15 + $0x90] sm:$0xff] }
  0x22   : > { %422 = vmatpush.msra.mxu0 %v409_v13  ;;  %1126 = vmatpush.msra.mxu2 %v409_v13  ;;  %v529_v34 = vld [vmem:[%s1236_s18] sm:$0xff]  ;;  %v546_v40 = vld [vmem:[%s1236_s18 + $0x88] sm:$0xff]  ;;  %v547_v44 = vld [vmem:[%s1236_s18 + $0x90] sm:$0xff] }
  0x23   : > { %583 = vmatpush.msra.mxu1 %v570_v14  ;;  %1142 = vmatpush.msra.mxu3 %v570_v14  ;;  %v384_v35 = vld [vmem:[%s1231_s15 + $0x80] sm:$0xff]  ;;  %v371_v45 = vld [vmem:[%s1231_s15 + $0x18] sm:$0xff]  ;;  %v373_v53 = vld [vmem:[%s1231_s15 + $0x28] sm:$0xff] }
  0x24   : > { %423 = vmatpush.msra.mxu0 %v408_v15  ;;  %1127 = vmatpush.msra.mxu2 %v408_v15  ;;  %v545_v36 = vld [vmem:[%s1236_s18 + $0x80] sm:$0xff]  ;;  %v532_v46 = vld [vmem:[%s1236_s18 + $0x18] sm:$0xff]  ;;  %v534_v54 = vld [vmem:[%s1236_s18 + $0x28] sm:$0xff] }
  0x25   : > { %584 = vmatpush.msra.mxu1 %v569_v16  ;;  %1143 = vmatpush.msra.mxu3 %v569_v16  ;;  %v387_v47 = vld [vmem:[%s1231_s15 + $0x98] sm:$0xff]  ;;  %v372_v49 = vld [vmem:[%s1231_s15 + $0x20] sm:$0xff]  ;;  %v389_v55 = vld [vmem:[%s1231_s15 + $0xa8] sm:$0xff] }
  0x26   : > { %424 = vmatpush.msra.mxu0 %v407_v17  ;;  %1128 = vmatpush.msra.mxu2 %v407_v17  ;;  %v548_v48 = vld [vmem:[%s1236_s18 + $0x98] sm:$0xff]  ;;  %v533_v50 = vld [vmem:[%s1236_s18 + $0x20] sm:$0xff]  ;;  %v550_v56 = vld [vmem:[%s1236_s18 + $0xa8] sm:$0xff] }
  0x27   : > { %585 = vmatpush.msra.mxu1 %v568_v18  ;;  %1144 = vmatpush.msra.mxu3 %v568_v18  ;;  %v388_v51 = vld [vmem:[%s1231_s15 + $0xa0] sm:$0xff]  ;;  %v374_v57 = vld [vmem:[%s1231_s15 + $0x30] sm:$0xff]  ;;  %v375_v61 = vld [vmem:[%s1231_s15 + $0x38] sm:$0xff] }
  0x28   : > { %425 = vmatpush.msra.mxu0 %v406_v19  ;;  %1129 = vmatpush.msra.mxu2 %v406_v19  ;;  %v549_v52 = vld [vmem:[%s1236_s18 + $0xa0] sm:$0xff]  ;;  %v535_v58 = vld [vmem:[%s1236_s18 + $0x30] sm:$0xff]  ;;  %v536_v62 = vld [vmem:[%s1236_s18 + $0x38] sm:$0xff] }
  0x29   : > { %586 = vmatpush.msra.mxu1 %v567_v20  ;;  %1145 = vmatpush.msra.mxu3 %v567_v20  ;;  %v390_v59 = vld [vmem:[%s1231_s15 + $0xb0] sm:$0xff]  ;;  %v391_v63 = vld [vmem:[%s1231_s15 + $0xb8] sm:$0xff]  ;;  %v376_v1 = vld [vmem:[%s1231_s15 + $0x40] sm:$0xff] }
  0x2a   : > { %426 = vmatpush.msra.mxu0 %v405_v21  ;;  %1130 = vmatpush.msra.mxu2 %v405_v21  ;;  %v551_v60 = vld [vmem:[%s1236_s18 + $0xb0] sm:$0xff]  ;;  %v552_v0 = vld [vmem:[%s1236_s18 + $0xb8] sm:$0xff]  ;;  %v537_v2 = vld [vmem:[%s1236_s18 + $0x40] sm:$0xff] }
  0x2b   : > { %587 = vmatpush.msra.mxu1 %v566_v22  ;;  %1146 = vmatpush.msra.mxu3 %v566_v22  ;;  %v392_v3 = vld [vmem:[%s1231_s15 + $0xc0] sm:$0xff]  ;;  %v377_v5 = vld [vmem:[%s1231_s15 + $0x48] sm:$0xff]  ;;  %v378_v9 = vld [vmem:[%s1231_s15 + $0x50] sm:$0xff] }
  0x2c   : > { %427 = vmatpush.msra.mxu0 %v404_v23  ;;  %1131 = vmatpush.msra.mxu2 %v404_v23  ;;  %v553_v4 = vld [vmem:[%s1236_s18 + $0xc0] sm:$0xff]  ;;  %v538_v6 = vld [vmem:[%s1236_s18 + $0x48] sm:$0xff]  ;;  %v539_v10 = vld [vmem:[%s1236_s18 + $0x50] sm:$0xff] }
  0x2d   : > { %588 = vmatpush.msra.mxu1 %v565_v24  ;;  %1147 = vmatpush.msra.mxu3 %v565_v24  ;;  %v393_v7 = vld [vmem:[%s1231_s15 + $0xc8] sm:$0xff]  ;;  %v394_v11 = vld [vmem:[%s1231_s15 + $0xd0] sm:$0xff]  ;;  %v379_v13 = vld [vmem:[%s1231_s15 + $0x58] sm:$0xff] }
  0x2e   : > { %428 = vmatpush.msra.mxu0 %v403_v25  ;;  %1132 = vmatpush.msra.mxu2 %v403_v25  ;;  %v554_v8 = vld [vmem:[%s1236_s18 + $0xc8] sm:$0xff]  ;;  %v555_v12 = vld [vmem:[%s1236_s18 + $0xd0] sm:$0xff]  ;;  %v540_v14 = vld [vmem:[%s1236_s18 + $0x58] sm:$0xff] }
  0x2f   : > { %589 = vmatpush.msra.mxu1 %v564_v26  ;;  %1148 = vmatpush.msra.mxu3 %v564_v26  ;;  %v395_v15 = vld [vmem:[%s1231_s15 + $0xd8] sm:$0xff]  ;;  %v380_v17 = vld [vmem:[%s1231_s15 + $0x60] sm:$0xff]  ;;  %v381_v21 = vld [vmem:[%s1231_s15 + $0x68] sm:$0xff] }
  0x30   : > { %429 = vmatpush.msra.mxu0 %v402_v27  ;;  %1133 = vmatpush.msra.mxu2 %v402_v27  ;;  %v556_v16 = vld [vmem:[%s1236_s18 + $0xd8] sm:$0xff]  ;;  %v541_v18 = vld [vmem:[%s1236_s18 + $0x60] sm:$0xff]  ;;  %v542_v22 = vld [vmem:[%s1236_s18 + $0x68] sm:$0xff] }
  0x31   : > { %590 = vmatpush.msra.mxu1 %v563_v28  ;;  %1149 = vmatpush.msra.mxu3 %v563_v28  ;;  %v396_v19 = vld [vmem:[%s1231_s15 + $0xe0] sm:$0xff]  ;;  %v397_v23 = vld [vmem:[%s1231_s15 + $0xe8] sm:$0xff]  ;;  %v382_v25 = vld [vmem:[%s1231_s15 + $0x70] sm:$0xff] }
  0x32   : > { %430 = vmatpush.msra.mxu0 %v401_v29  ;;  %1134 = vmatpush.msra.mxu2 %v401_v29  ;;  %v557_v20 = vld [vmem:[%s1236_s18 + $0xe0] sm:$0xff]  ;;  %v558_v24 = vld [vmem:[%s1236_s18 + $0xe8] sm:$0xff]  ;;  %v543_v26 = vld [vmem:[%s1236_s18 + $0x70] sm:$0xff] }
  0x33   : > { %591 = vmatpush.msra.mxu1 %v562_v30  ;;  %1150 = vmatpush.msra.mxu3 %v562_v30  ;;  %v398_v27 = vld [vmem:[%s1231_s15 + $0xf0] sm:$0xff]  ;;  %v383_v29 = vld [vmem:[%s1231_s15 + $0x78] sm:$0xff] }
  0x34   : > { %431 = vmatpush.msra.mxu0 %v400_v31  ;;  %1135 = vmatpush.msra.mxu2 %v400_v31  ;;  %v559_v28 = vld [vmem:[%s1236_s18 + $0xf0] sm:$0xff]  ;;  %v544_v30 = vld [vmem:[%s1236_s18 + $0x78] sm:$0xff] }
  0x35   : > { %592 = vmatpush.msra.mxu1 %v561_v32  ;;  %432 = vmatmul.f32.vlgmr.msra.gmra.mxu0 %v368_v33  ;;  %v399_v31 = vld [vmem:[%s1231_s15 + $0xf8] sm:$0xff] }
  0x36   : > { %593 = vmatmul.f32.vlgmr.msra.gmra.mxu1 %v529_v34  ;;  %1151 = vmatpush.msra.mxu3 %v561_v32  ;;  %v560_v32 = vld [vmem:[%s1236_s18 + $0xf8] sm:$0xff] }
  0x37   : > { %480 = vmatmul.f32.vlgmr.msra.gmra.mxu2 %v384_v35  ;;  %641 = vmatmul.f32.vlgmr.msra.gmra.mxu3 %v545_v36 }
  0x3d   : > { %435 = vmatmul.f32.gmra.mxu0 %v369_v37 }
  0x3e   : > { %596 = vmatmul.f32.gmra.mxu1 %v530_v38 }
  0x3f   : > { %483 = vmatmul.f32.gmra.mxu2 %v385_v39  ;;  %644 = vmatmul.f32.gmra.mxu3 %v546_v40 }
  0x45   : > { %438 = vmatmul.f32.gmra.mxu0 %v370_v41 }
  0x46   : > { %599 = vmatmul.f32.gmra.mxu1 %v531_v42 }
  0x47   : > { %486 = vmatmul.f32.gmra.mxu2 %v386_v43  ;;  %647 = vmatmul.f32.gmra.mxu3 %v547_v44 }
  0x4d   : > { %441 = vmatmul.f32.gmra.mxu0 %v371_v45 }
  0x4e   : > { %602 = vmatmul.f32.gmra.mxu1 %v532_v46 }
  0x4f   : > { %489 = vmatmul.f32.gmra.mxu2 %v387_v47  ;;  %650 = vmatmul.f32.gmra.mxu3 %v548_v48 }
  0x55   : > { %444 = vmatmul.f32.gmra.mxu0 %v372_v49 }
  0x56   : > { %605 = vmatmul.f32.gmra.mxu1 %v533_v50 }
  0x57   : > { %492 = vmatmul.f32.gmra.mxu2 %v388_v51  ;;  %653 = vmatmul.f32.gmra.mxu3 %v549_v52 }
  0x5d   : > { %447 = vmatmul.f32.gmra.mxu0 %v373_v53 }
  0x5e   : > { %608 = vmatmul.f32.gmra.mxu1 %v534_v54 }
  0x5f   : > { %495 = vmatmul.f32.gmra.mxu2 %v389_v55  ;;  %656 = vmatmul.f32.gmra.mxu3 %v550_v56 }
  0x65   : > { %450 = vmatmul.f32.gmra.mxu0 %v374_v57 }
  0x66   : > { %611 = vmatmul.f32.gmra.mxu1 %v535_v58 }
  0x67   : > { %498 = vmatmul.f32.gmra.mxu2 %v390_v59  ;;  %659 = vmatmul.f32.gmra.mxu3 %v551_v60 }
  0x6d   : > { %453 = vmatmul.f32.gmra.mxu0 %v375_v61 }
  0x6e   : > { %614 = vmatmul.f32.gmra.mxu1 %v536_v62 }
  0x6f   : > { %501 = vmatmul.f32.gmra.mxu2 %v391_v63  ;;  %662 = vmatmul.f32.gmra.mxu3 %v552_v0 }
  0x75   : > { %456 = vmatmul.f32.gmra.mxu0 %v376_v1 }
  0x76   : > { %617 = vmatmul.f32.gmra.mxu1 %v537_v2 }
  0x77   : > { %504 = vmatmul.f32.gmra.mxu2 %v392_v3  ;;  %665 = vmatmul.f32.gmra.mxu3 %v553_v4 }
  0x7d   : > { %459 = vmatmul.f32.gmra.mxu0 %v377_v5 }
  0x7e   : > { %620 = vmatmul.f32.gmra.mxu1 %v538_v6 }
  0x7f   : > { %507 = vmatmul.f32.gmra.mxu2 %v393_v7  ;;  %668 = vmatmul.f32.gmra.mxu3 %v554_v8 }
  0x85   : > { %462 = vmatmul.f32.gmra.mxu0 %v378_v9 }
  0x86   : > { %623 = vmatmul.f32.gmra.mxu1 %v539_v10 }
  0x87   : > { %510 = vmatmul.f32.gmra.mxu2 %v394_v11  ;;  %671 = vmatmul.f32.gmra.mxu3 %v555_v12 }
  0x8d   : > { %465 = vmatmul.f32.gmra.mxu0 %v379_v13 }
  0x8e   : > { %626 = vmatmul.f32.gmra.mxu1 %v540_v14 }
  0x8f   : > { %513 = vmatmul.f32.gmra.mxu2 %v395_v15  ;;  %674 = vmatmul.f32.gmra.mxu3 %v556_v16 }
  0x95   : > { %468 = vmatmul.f32.gmra.mxu0 %v380_v17 }
  0x96   : > { %629 = vmatmul.f32.gmra.mxu1 %v541_v18 }
  0x97   : > { %516 = vmatmul.f32.gmra.mxu2 %v396_v19  ;;  %677 = vmatmul.f32.gmra.mxu3 %v557_v20 }
  0x9d   : > { %471 = vmatmul.f32.gmra.mxu0 %v381_v21 }
  0x9e   : > { %632 = vmatmul.f32.gmra.mxu1 %v542_v22 }
  0x9f   : > { %519 = vmatmul.f32.gmra.mxu2 %v397_v23  ;;  %680 = vmatmul.f32.gmra.mxu3 %v558_v24 }
  0xa5   : > { %474 = vmatmul.f32.gmra.mxu0 %v382_v25 }
  0xa6   : > { %635 = vmatmul.f32.gmra.mxu1 %v543_v26 }
  0xa7   : > { %522 = vmatmul.f32.gmra.mxu2 %v398_v27  ;;  %683 = vmatmul.f32.gmra.mxu3 %v559_v28 }
  0xad   : > { %477 = vmatmul.f32.gmra.mxu0 %v383_v29 }
  0xae   : > { %638 = vmatmul.f32.gmra.mxu1 %v544_v30 }
  0xaf   : > { %525 = vmatmul.f32.gmra.mxu2 %v399_v31  ;;  %686 = vmatmul.f32.gmra.mxu3 %v560_v32 }
  0xb2   : > { %v433_v33 = vpop.f32.mrf.mxu0 }
  0xb3   : > { %v594_v34 = vpop.f32.mrf.mxu1  ;;  %690 = vst [vmem:[%s1241_s21] sm:$0xff] %v433_v33  ;;  %v795_v35 = vmul.f32 %v433_v33, %v433_v33 }
  0xb4   : > { %722 = vst [vmem:[%s1246_s24] sm:$0xff] %v594_v34  ;;  %v907_v36 = vmul.f32 %v594_v34, %v594_v34 }
  0xba   : > { %v436_v37 = vpop.f32.mrf.mxu0  ;;  %v1423_v43 = vpop.f32.mrf.mxu2 }
  0xbb   : > { %v597_v38 = vpop.f32.mrf.mxu1  ;;  %691 = vst [vmem:[%s1241_s21 + $0x8] sm:$0xff] %v436_v37  ;;  %v755_v39 = vadd.f32 %v436_v37, %v433_v33  ;;  %v796_v40 = vmul.f32 %v436_v37, %v436_v37  ;;  %v1425_v44 = vpop.f32.mrf.mxu3 }
  0xbc   : > { %v867_v41 = vadd.f32 %v597_v38, %v594_v34  ;;  %v908_v42 = vmul.f32 %v597_v38, %v597_v38  ;;  %723 = vst [vmem:[%s1246_s24 + $0x8] sm:$0xff] %v597_v38 }
  0xbd   : > { %v827_v45 = vadd.f32 %v796_v40, %v795_v35  ;;  %706 = vst [vmem:[%s1241_s21 + $0x80] sm:$0xff] %v1423_v43 }
  0xbe   : > { %v939_v46 = vadd.f32 %v908_v42, %v907_v36  ;;  %738 = vst [vmem:[%s1246_s24 + $0x80] sm:$0xff] %v1425_v44 }
  0xc2   : > { %v439_v47 = vpop.f32.mrf.mxu0  ;;  %v1433_v53 = vpop.f32.mrf.mxu2 }
  0xc3   : > { %v600_v48 = vpop.f32.mrf.mxu1  ;;  %692 = vst [vmem:[%s1241_s21 + $0x10] sm:$0xff] %v439_v47  ;;  %v756_v49 = vadd.f32 %v755_v39, %v439_v47  ;;  %v797_v50 = vmul.f32 %v439_v47, %v439_v47  ;;  %v1435_v54 = vpop.f32.mrf.mxu3 }
  0xc4   : > { %v868_v51 = vadd.f32 %v867_v41, %v600_v48  ;;  %v909_v52 = vmul.f32 %v600_v48, %v600_v48  ;;  %724 = vst [vmem:[%s1246_s24 + $0x10] sm:$0xff] %v600_v48 }
  0xc5   : > { %v828_v55 = vadd.f32 %v827_v45, %v797_v50  ;;  %707 = vst [vmem:[%s1241_s21 + $0x88] sm:$0xff] %v1433_v53 }
  0xc6   : > { %v940_v56 = vadd.f32 %v939_v46, %v909_v52  ;;  %739 = vst [vmem:[%s1246_s24 + $0x88] sm:$0xff] %v1435_v54 }
  0xca   : > { %v442_v57 = vpop.f32.mrf.mxu0  ;;  %v1443_v63 = vpop.f32.mrf.mxu2 }
  0xcb   : > { %v603_v58 = vpop.f32.mrf.mxu1  ;;  %693 = vst [vmem:[%s1241_s21 + $0x18] sm:$0xff] %v442_v57  ;;  %v757_v59 = vadd.f32 %v756_v49, %v442_v57  ;;  %v798_v60 = vmul.f32 %v442_v57, %v442_v57  ;;  %v1445_v0 = vpop.f32.mrf.mxu3 }
  0xcc   : > { %v869_v61 = vadd.f32 %v868_v51, %v603_v58  ;;  %v910_v62 = vmul.f32 %v603_v58, %v603_v58  ;;  %725 = vst [vmem:[%s1246_s24 + $0x18] sm:$0xff] %v603_v58 }
  0xcd   : > { %v829_v1 = vadd.f32 %v828_v55, %v798_v60  ;;  %708 = vst [vmem:[%s1241_s21 + $0x90] sm:$0xff] %v1443_v63 }
  0xce   : > { %v941_v2 = vadd.f32 %v940_v56, %v910_v62  ;;  %740 = vst [vmem:[%s1246_s24 + $0x90] sm:$0xff] %v1445_v0 }
  0xd2   : > { %v445_v3 = vpop.f32.mrf.mxu0  ;;  %v1457_v9 = vpop.f32.mrf.mxu2 }
  0xd3   : > { %v606_v4 = vpop.f32.mrf.mxu1  ;;  %694 = vst [vmem:[%s1241_s21 + $0x20] sm:$0xff] %v445_v3  ;;  %v1453_v5 = vadd.f32 %v757_v59, %v445_v3  ;;  %v799_v6 = vmul.f32 %v445_v3, %v445_v3  ;;  %v1459_v10 = vpop.f32.mrf.mxu3 }
  0xd4   : > { %v1455_v7 = vadd.f32 %v869_v61, %v606_v4  ;;  %v911_v8 = vmul.f32 %v606_v4, %v606_v4  ;;  %726 = vst [vmem:[%s1246_s24 + $0x20] sm:$0xff] %v606_v4 }
  0xd5   : > { %v1462_v11 = vadd.f32 %v829_v1, %v799_v6  ;;  %709 = vst [vmem:[%s1241_s21 + $0x98] sm:$0xff] %v1457_v9 }
  0xd6   : > { %v1464_v12 = vadd.f32 %v941_v2, %v911_v8  ;;  %741 = vst [vmem:[%s1246_s24 + $0x98] sm:$0xff] %v1459_v10 }
  0xda   : > { %v1470_v13 = vpop.f32.mrf.mxu0  ;;  %v1476_v15 = vpop.f32.mrf.mxu2 }
  0xdb   : > { %v1472_v14 = vpop.f32.mrf.mxu1  ;;  %695 = vst [vmem:[%s1241_s21 + $0x28] sm:$0xff] %v1470_v13  ;;  %v1478_v16 = vpop.f32.mrf.mxu3  ;;  %v800_v47 = vmul.f32 %v1470_v13, %v1470_v13  ;;  %v759_v51 = vadd.f32 %v1453_v5, %v1470_v13 }
  0xdc   : > { %727 = vst [vmem:[%s1246_s24 + $0x28] sm:$0xff] %v1472_v14  ;;  %v912_v48 = vmul.f32 %v1472_v14, %v1472_v14  ;;  %v871_v52 = vadd.f32 %v1455_v7, %v1472_v14 }
  0xdd   : > { %710 = vst [vmem:[%s1241_s21 + $0xa0] sm:$0xff] %v1476_v15  ;;  %v831_v55 = vadd.f32 %v1462_v11, %v800_v47 }
  0xde   : > { %742 = vst [vmem:[%s1246_s24 + $0xa0] sm:$0xff] %v1478_v16  ;;  %v943_v56 = vadd.f32 %v1464_v12, %v912_v48 }
  0xe2   : > { %v1486_v17 = vpop.f32.mrf.mxu0  ;;  %v1492_v19 = vpop.f32.mrf.mxu2 }
  0xe3   : > { %v1488_v18 = vpop.f32.mrf.mxu1  ;;  %696 = vst [vmem:[%s1241_s21 + $0x30] sm:$0xff] %v1486_v17  ;;  %v1494_v20 = vpop.f32.mrf.mxu3  ;;  %v801_v49 = vmul.f32 %v1486_v17, %v1486_v17  ;;  %v760_v59 = vadd.f32 %v759_v51, %v1486_v17 }
  0xe4   : > { %728 = vst [vmem:[%s1246_s24 + $0x30] sm:$0xff] %v1488_v18  ;;  %v913_v50 = vmul.f32 %v1488_v18, %v1488_v18  ;;  %v872_v60 = vadd.f32 %v871_v52, %v1488_v18 }
  0xe5   : > { %711 = vst [vmem:[%s1241_s21 + $0xa8] sm:$0xff] %v1492_v19  ;;  %v832_v61 = vadd.f32 %v831_v55, %v801_v49 }
  0xe6   : > { %743 = vst [vmem:[%s1246_s24 + $0xa8] sm:$0xff] %v1494_v20  ;;  %v944_v62 = vadd.f32 %v943_v56, %v913_v50 }
  0xea   : > { %v1502_v21 = vpop.f32.mrf.mxu0  ;;  %v1508_v23 = vpop.f32.mrf.mxu2 }
  0xeb   : > { %v1504_v22 = vpop.f32.mrf.mxu1  ;;  %697 = vst [vmem:[%s1241_s21 + $0x38] sm:$0xff] %v1502_v21  ;;  %v1510_v24 = vpop.f32.mrf.mxu3  ;;  %v802_v57 = vmul.f32 %v1502_v21, %v1502_v21  ;;  %v761_v5 = vadd.f32 %v760_v59, %v1502_v21 }
  0xec   : > { %729 = vst [vmem:[%s1246_s24 + $0x38] sm:$0xff] %v1504_v22  ;;  %v914_v58 = vmul.f32 %v1504_v22, %v1504_v22  ;;  %v873_v6 = vadd.f32 %v872_v60, %v1504_v22 }
  0xed   : > { %712 = vst [vmem:[%s1241_s21 + $0xb0] sm:$0xff] %v1508_v23  ;;  %v833_v11 = vadd.f32 %v832_v61, %v802_v57 }
  0xee   : > { %744 = vst [vmem:[%s1246_s24 + $0xb0] sm:$0xff] %v1510_v24  ;;  %v945_v12 = vadd.f32 %v944_v62, %v914_v58 }
  0xf2   : > { %v1518_v25 = vpop.f32.mrf.mxu0  ;;  %v1524_v27 = vpop.f32.mrf.mxu2 }
  0xf3   : > { %v1520_v26 = vpop.f32.mrf.mxu1  ;;  %698 = vst [vmem:[%s1241_s21 + $0x40] sm:$0xff] %v1518_v25  ;;  %v1526_v28 = vpop.f32.mrf.mxu3  ;;  %v803_v1 = vmul.f32 %v1518_v25, %v1518_v25  ;;  %v762_v17 = vadd.f32 %v761_v5, %v1518_v25 }
  0xf4   : > { %730 = vst [vmem:[%s1246_s24 + $0x40] sm:$0xff] %v1520_v26  ;;  %v915_v2 = vmul.f32 %v1520_v26, %v1520_v26  ;;  %v874_v18 = vadd.f32 %v873_v6, %v1520_v26 }
  0xf5   : > { %713 = vst [vmem:[%s1241_s21 + $0xb8] sm:$0xff] %v1524_v27  ;;  %v834_v21 = vadd.f32 %v833_v11, %v803_v1 }
  0xf6   : > { %745 = vst [vmem:[%s1246_s24 + $0xb8] sm:$0xff] %v1526_v28  ;;  %v946_v22 = vadd.f32 %v945_v12, %v915_v2 }
  0xfa   : > { %v1534_v29 = vpop.f32.mrf.mxu0  ;;  %v1540_v31 = vpop.f32.mrf.mxu2 }
  0xfb   : > { %v1536_v30 = vpop.f32.mrf.mxu1  ;;  %699 = vst [vmem:[%s1241_s21 + $0x48] sm:$0xff] %v1534_v29  ;;  %v1542_v32 = vpop.f32.mrf.mxu3  ;;  %v804_v13 = vmul.f32 %v1534_v29, %v1534_v29  ;;  %v763_v49 = vadd.f32 %v762_v17, %v1534_v29 }
  0xfc   : > { %731 = vst [vmem:[%s1246_s24 + $0x48] sm:$0xff] %v1536_v30  ;;  %v916_v14 = vmul.f32 %v1536_v30, %v1536_v30  ;;  %v875_v50 = vadd.f32 %v874_v18, %v1536_v30 }
  0xfd   : > { %714 = vst [vmem:[%s1241_s21 + $0xc0] sm:$0xff] %v1540_v31  ;;  %v835_v25 = vadd.f32 %v834_v21, %v804_v13 }
  0xfe   : > { %746 = vst [vmem:[%s1246_s24 + $0xc0] sm:$0xff] %v1542_v32  ;;  %v947_v51 = vadd.f32 %v946_v22, %v916_v14 }
 0x102   : > { %v1550_v33 = vpop.f32.mrf.mxu0  ;;  %v1556_v35 = vpop.f32.mrf.mxu2 }
 0x103   : > { %v1552_v34 = vpop.f32.mrf.mxu1  ;;  %700 = vst [vmem:[%s1241_s21 + $0x50] sm:$0xff] %v1550_v33  ;;  %v1558_v36 = vpop.f32.mrf.mxu3  ;;  %v805_v47 = vmul.f32 %v1550_v33, %v1550_v33  ;;  %v764_v55 = vadd.f32 %v763_v49, %v1550_v33 }
 0x104   : > { %732 = vst [vmem:[%s1246_s24 + $0x50] sm:$0xff] %v1552_v34  ;;  %v917_v48 = vmul.f32 %v1552_v34, %v1552_v34  ;;  %v876_v56 = vadd.f32 %v875_v50, %v1552_v34 }
 0x105   : > { %715 = vst [vmem:[%s1241_s21 + $0xc8] sm:$0xff] %v1556_v35  ;;  %v836_v57 = vadd.f32 %v835_v25, %v805_v47 }
 0x106   : > { %747 = vst [vmem:[%s1246_s24 + $0xc8] sm:$0xff] %v1558_v36  ;;  %v948_v58 = vadd.f32 %v947_v51, %v917_v48 }
 0x10a   : > { %v1566_v37 = vpop.f32.mrf.mxu0  ;;  %v1572_v39 = vpop.f32.mrf.mxu2 }
 0x10b   : > { %v1568_v38 = vpop.f32.mrf.mxu1  ;;  %701 = vst [vmem:[%s1241_s21 + $0x58] sm:$0xff] %v1566_v37  ;;  %v1574_v40 = vpop.f32.mrf.mxu3  ;;  %v806_v26 = vmul.f32 %v1566_v37, %v1566_v37  ;;  %v765_v61 = vadd.f32 %v764_v55, %v1566_v37 }
 0x10c   : > { %733 = vst [vmem:[%s1246_s24 + $0x58] sm:$0xff] %v1568_v38  ;;  %v918_v52 = vmul.f32 %v1568_v38, %v1568_v38  ;;  %v877_v62 = vadd.f32 %v876_v56, %v1568_v38  ;;  %v923_v56 = vmul.f32 %v1425_v44, %v1425_v44 }
 0x10d   : > { %716 = vst [vmem:[%s1241_s21 + $0xd0] sm:$0xff] %v1572_v39  ;;  %v837_v1 = vadd.f32 %v836_v57, %v806_v26 }
 0x10e   : > { %748 = vst [vmem:[%s1246_s24 + $0xd0] sm:$0xff] %v1574_v40  ;;  %v949_v2 = vadd.f32 %v948_v58, %v918_v52 }
 0x112   : > { %v1582_v41 = vpop.f32.mrf.mxu0  ;;  %v1588_v45 = vpop.f32.mrf.mxu2 }
 0x113   : > { %v1584_v42 = vpop.f32.mrf.mxu1  ;;  %702 = vst [vmem:[%s1241_s21 + $0x60] sm:$0xff] %v1582_v41  ;;  %v1590_v46 = vpop.f32.mrf.mxu3  ;;  %v807_v29 = vmul.f32 %v1582_v41, %v1582_v41  ;;  %v766_v11 = vadd.f32 %v765_v61, %v1582_v41 }
 0x114   : > { %734 = vst [vmem:[%s1246_s24 + $0x60] sm:$0xff] %v1584_v42  ;;  %v919_v30 = vmul.f32 %v1584_v42, %v1584_v42  ;;  %v878_v12 = vadd.f32 %v877_v62, %v1584_v42 }
 0x115   : > { %717 = vst [vmem:[%s1241_s21 + $0xd8] sm:$0xff] %v1588_v45  ;;  %v838_v37 = vadd.f32 %v837_v1, %v807_v29 }
 0x116   : > { %749 = vst [vmem:[%s1246_s24 + $0xd8] sm:$0xff] %v1590_v46  ;;  %v950_v38 = vadd.f32 %v949_v2, %v919_v30  ;;  %v925_v2 = vmul.f32 %v1445_v0, %v1445_v0 }
 0x11a   : > { %v472_v3 = vpop.f32.mrf.mxu0  ;;  %v1625_v7 = vpop.f32.mrf.mxu2 }
 0x11b   : > { %v633_v4 = vpop.f32.mrf.mxu1  ;;  %703 = vst [vmem:[%s1241_s21 + $0x68] sm:$0xff] %v472_v3  ;;  %v1627_v8 = vpop.f32.mrf.mxu3  ;;  %v808_v5 = vmul.f32 %v472_v3, %v472_v3  ;;  %v767_v17 = vadd.f32 %v766_v11, %v472_v3 }
 0x11c   : > { %735 = vst [vmem:[%s1246_s24 + $0x68] sm:$0xff] %v633_v4  ;;  %v920_v6 = vmul.f32 %v633_v4, %v633_v4  ;;  %v879_v18 = vadd.f32 %v878_v12, %v633_v4  ;;  %v811_v4 = vmul.f32 %v1423_v43, %v1423_v43 }
 0x11d   : > { %718 = vst [vmem:[%s1241_s21 + $0xe0] sm:$0xff] %v1625_v7  ;;  %v839_v21 = vadd.f32 %v838_v37, %v808_v5 }
 0x11e   : > { %750 = vst [vmem:[%s1246_s24 + $0xe0] sm:$0xff] %v1627_v8  ;;  %v951_v22 = vadd.f32 %v950_v38, %v920_v6 }
 0x122   : > { %v475_v59 = vpop.f32.mrf.mxu0  ;;  %v1659_v33 = vpop.f32.mrf.mxu2 }
 0x123   : > { %v636_v60 = vpop.f32.mrf.mxu1  ;;  %704 = vst [vmem:[%s1241_s21 + $0x70] sm:$0xff] %v475_v59  ;;  %v1661_v34 = vpop.f32.mrf.mxu3  ;;  %v809_v13 = vmul.f32 %v475_v59, %v475_v59  ;;  %v768_v47 = vadd.f32 %v767_v17, %v475_v59  ;;  %v812_v59 = vmul.f32 %v1433_v53, %v1433_v53 }
 0x124   : > { %736 = vst [vmem:[%s1246_s24 + $0x70] sm:$0xff] %v636_v60  ;;  %v921_v14 = vmul.f32 %v636_v60, %v636_v60  ;;  %v880_v48 = vadd.f32 %v879_v18, %v636_v60  ;;  %v924_v60 = vmul.f32 %v1435_v54, %v1435_v54  ;;  %v927_v18 = vmul.f32 %v1478_v16, %v1478_v16 }
 0x125   : > { %719 = vst [vmem:[%s1241_s21 + $0xe8] sm:$0xff] %v1659_v33  ;;  %v840_v49 = vadd.f32 %v839_v21, %v809_v13 }
 0x126   : > { %751 = vst [vmem:[%s1246_s24 + $0xe8] sm:$0xff] %v1661_v34  ;;  %v952_v41 = vadd.f32 %v951_v22, %v921_v14 }
 0x12a   : > { %v478_v50 = vpop.f32.mrf.mxu0  ;;  %v1671_v55 = vpop.f32.mrf.mxu2 }
 0x12b   : > { %v639_v42 = vpop.f32.mrf.mxu1  ;;  %705 = vst [vmem:[%s1241_s21 + $0x78] sm:$0xff] %v478_v50  ;;  %v769_v25 = vadd.f32 %v768_v47, %v478_v50  ;;  %v810_v51 = vmul.f32 %v478_v50, %v478_v50  ;;  %v1673_v3 = vpop.f32.mrf.mxu3 }
 0x12c   : > { %v881_v26 = vadd.f32 %v880_v48, %v639_v42  ;;  %v922_v52 = vmul.f32 %v639_v42, %v639_v42  ;;  %737 = vst [vmem:[%s1246_s24 + $0x78] sm:$0xff] %v639_v42  ;;  %v928_v48 = vmul.f32 %v1494_v20, %v1494_v20 }
 0x12d   : > { %v770_v57 = vadd.f32 %v769_v25, %v1423_v43  ;;  %v841_v58 = vadd.f32 %v840_v49, %v810_v51  ;;  %720 = vst [vmem:[%s1241_s21 + $0xf0] sm:$0xff] %v1671_v55 }
 0x12e   : > { %v882_v29 = vadd.f32 %v881_v26, %v1425_v44  ;;  %v953_v30 = vadd.f32 %v952_v41, %v922_v52  ;;  %752 = vst [vmem:[%s1246_s24 + $0xf0] sm:$0xff] %v1673_v3  ;;  %v813_v44 = vmul.f32 %v1443_v63, %v1443_v63 }
 0x12f   : > { %v771_v61 = vadd.f32 %v770_v57, %v1433_v53  ;;  %v842_v62 = vadd.f32 %v841_v58, %v811_v4  ;;  %v814_v53 = vmul.f32 %v1457_v9, %v1457_v9  ;;  %v818_v4 = vmul.f32 %v1524_v27, %v1524_v27 }
 0x130   : > { %v883_v1 = vadd.f32 %v882_v29, %v1435_v54  ;;  %v954_v43 = vadd.f32 %v953_v30, %v923_v56  ;;  %v926_v54 = vmul.f32 %v1459_v10, %v1459_v10  ;;  %v819_v29 = vmul.f32 %v1540_v31, %v1540_v31 }
 0x131   : > { %v772_v5 = vadd.f32 %v771_v61, %v1443_v63  ;;  %v843_v6 = vadd.f32 %v842_v62, %v812_v59  ;;  %v820_v61 = vmul.f32 %v1556_v35, %v1556_v35 }
 0x132   : > { %v884_v11 = vadd.f32 %v883_v1, %v1445_v0  ;;  %v955_v12 = vadd.f32 %v954_v43, %v924_v60  ;;  %v1704_v17 = vpop.f32.mrf.mxu2  ;;  %v815_v0 = vmul.f32 %v1476_v15, %v1476_v15 }
 0x133   : > { %v773_v37 = vadd.f32 %v772_v5, %v1457_v9  ;;  %v844_v38 = vadd.f32 %v843_v6, %v813_v44  ;;  %v1706_v63 = vpop.f32.mrf.mxu3  ;;  %721 = vst [vmem:[%s1241_s21 + $0xf8] sm:$0xff] %v1704_v17  ;;  %v821_v44 = vmul.f32 %v1572_v39, %v1572_v39 }
 0x134   : > { %v885_v13 = vadd.f32 %v884_v11, %v1459_v10  ;;  %v956_v14 = vadd.f32 %v955_v12, %v925_v2  ;;  %753 = vst [vmem:[%s1246_s24 + $0xf8] sm:$0xff] %v1706_v63  ;;  %v816_v10 = vmul.f32 %v1492_v19, %v1492_v19  ;;  %v822_v11 = vmul.f32 %v1588_v45, %v1588_v45 }
 0x135   : > { %v774_v21 = vadd.f32 %v773_v37, %v1476_v15  ;;  %v845_v22 = vadd.f32 %v844_v38, %v814_v53  ;;  %v817_v15 = vmul.f32 %v1508_v23, %v1508_v23  ;;  %v823_v37 = vmul.f32 %v1625_v7, %v1625_v7 }
 0x136   : > { %v886_v9 = vadd.f32 %v885_v13, %v1478_v16  ;;  %v957_v47 = vadd.f32 %v956_v14, %v926_v54  ;;  %v929_v16 = vmul.f32 %v1510_v24, %v1510_v24 }
 0x137   : > { %v775_v49 = vadd.f32 %v774_v21, %v1492_v19  ;;  %v846_v41 = vadd.f32 %v845_v22, %v815_v0  ;;  %v930_v19 = vmul.f32 %v1526_v28, %v1526_v28  ;;  %v824_v0 = vmul.f32 %v1659_v33, %v1659_v33 }
 0x138   : > { %v887_v50 = vadd.f32 %v886_v9, %v1494_v20  ;;  %v958_v42 = vadd.f32 %v957_v47, %v927_v18  ;;  %v825_v9 = vmul.f32 %v1671_v55, %v1671_v55  ;;  %v938_v47 = vmul.f32 %v1706_v63, %v1706_v63 }
 0x139   : > { %v847_v25 = vadd.f32 %v846_v41, %v816_v10  ;;  %v776_v51 = vadd.f32 %v775_v49, %v1508_v23  ;;  %v931_v23 = vmul.f32 %v1542_v32, %v1542_v32 }
 0x13a   : > { %v959_v26 = vadd.f32 %v958_v42, %v928_v48  ;;  %v888_v52 = vadd.f32 %v887_v50, %v1510_v24 }
 0x13b   : > { %v777_v20 = vadd.f32 %v776_v51, %v1524_v27  ;;  %v848_v56 = vadd.f32 %v847_v25, %v817_v15  ;;  %v932_v27 = vmul.f32 %v1558_v36, %v1558_v36 }
 0x13c   : > { %v889_v57 = vadd.f32 %v888_v52, %v1526_v28  ;;  %v960_v58 = vadd.f32 %v959_v26, %v929_v16 }
 0x13d   : > { %v778_v24 = vadd.f32 %v777_v20, %v1540_v31  ;;  %v849_v30 = vadd.f32 %v848_v56, %v818_v4  ;;  %v933_v31 = vmul.f32 %v1574_v40, %v1574_v40 }
 0x13e   : > { %v890_v59 = vadd.f32 %v889_v57, %v1542_v32  ;;  %v961_v60 = vadd.f32 %v960_v58, %v930_v19 }
 0x13f   : > { %v779_v28 = vadd.f32 %v778_v24, %v1556_v35  ;;  %v850_v62 = vadd.f32 %v849_v30, %v819_v29  ;;  %v934_v35 = vmul.f32 %v1590_v46, %v1590_v46 }
 0x140   : > { %v891_v1 = vadd.f32 %v890_v59, %v1558_v36  ;;  %v962_v43 = vadd.f32 %v961_v60, %v931_v23  ;;  %v754_v59 = vld [vmem:[%s1817_s6] sm:$0x1] }
 0x141   : > { %v780_v32 = vadd.f32 %v779_v28, %v1572_v39  ;;  %v851_v2 = vadd.f32 %v850_v62, %v820_v61  ;;  %v935_v39 = vmul.f32 %v1627_v8, %v1627_v8  ;;  %v866_v60 = vld [vmem:[%s1819_s8] sm:$0x1] }
 0x142   : > { %v892_v5 = vadd.f32 %v891_v1, %v1574_v40  ;;  %v963_v6 = vadd.f32 %v962_v43, %v932_v27  ;;  %v794_v1 = vld [vmem:[%s1818_s7] sm:$0x1] }
 0x143   : > { %v781_v36 = vadd.f32 %v780_v32, %v1588_v45  ;;  %v852_v12 = vadd.f32 %v851_v2, %v821_v44  ;;  %v936_v45 = vmul.f32 %v1661_v34, %v1661_v34  ;;  %v906_v43 = vld [vmem:[%s1820_s9] sm:$0x1] }
 0x144   : > { %v893_v53 = vadd.f32 %v892_v5, %v1590_v46  ;;  %v964_v54 = vadd.f32 %v963_v6, %v933_v31 }
 0x145   : > { %v853_v40 = vadd.f32 %v852_v12, %v822_v11  ;;  %v782_v13 = vadd.f32 %v781_v36, %v1625_v7  ;;  %v937_v7 = vmul.f32 %v1673_v3, %v1673_v3 }
 0x146   : > { %v965_v38 = vadd.f32 %v964_v54, %v934_v35  ;;  %v894_v14 = vadd.f32 %v893_v53, %v1627_v8  ;;  %v826_v8 = vmul.f32 %v1704_v17, %v1704_v17 }
 0x147   : > { %v854_v46 = vadd.f32 %v853_v40, %v823_v37  ;;  %v783_v21 = vadd.f32 %v782_v13, %v1659_v33 }
 0x148   : > { %v966_v18 = vadd.f32 %v965_v38, %v935_v39  ;;  %v895_v22 = vadd.f32 %v894_v14, %v1661_v34 }
 0x149   : > { %v855_v10 = vadd.f32 %v854_v46, %v824_v0  ;;  %v784_v49 = vadd.f32 %v783_v21, %v1671_v55 }
 0x14a   : > { %v967_v48 = vadd.f32 %v966_v18, %v936_v45  ;;  %v896_v33 = vadd.f32 %v895_v22, %v1673_v3 }
 0x14b   : > { %v856_v41 = vadd.f32 %v855_v10, %v825_v9  ;;  %v785_v50 = vadd.f32 %v784_v49, %v1704_v17 }
 0x14c   : > { %v968_v34 = vadd.f32 %v967_v48, %v937_v7  ;;  %v897_v42 = vadd.f32 %v896_v33, %v1706_v63 }
 0x14d   : > { %v786_v15 = vrot.slane %v785_v50, 4  ;;  %v857_v16 = vadd.f32 %v856_v41, %v826_v8 }
 0x14e   : > { %v898_v25 = vrot.slane %v897_v42, 4  ;;  %v969_v51 = vadd.f32 %v968_v34, %v938_v47 }
 0x14f   : > { %v787_v26 = vadd.f32 %v786_v15, %v785_v50  ;;  %v858_v52 = vrot.slane %v857_v16, 4 }
 0x150   : > { %v899_v4 = vadd.f32 %v898_v25, %v897_v42  ;;  %v970_v19 = vrot.slane %v969_v51, 4 }
 0x151   : > { %v788_v20 = vrot.slane %v787_v26, 2  ;;  %v859_v56 = vadd.f32 %v858_v52, %v857_v16 }
 0x152   : > { %v900_v57 = vrot.slane %v899_v4, 2  ;;  %v971_v55 = vadd.f32 %v970_v19, %v969_v51 }
 0x153   : > { %v789_v58 = vadd.f32 %v788_v20, %v787_v26  ;;  %v860_v3 = vrot.slane %v859_v56, 2 }
 0x154   : > { %v901_v29 = vadd.f32 %v900_v57, %v899_v4  ;;  %v972_v23 = vrot.slane %v971_v55, 2 }
 0x155   : > { %v790_v24 = vrot.slane %v789_v58, 1  ;;  %v861_v17 = vadd.f32 %v860_v3, %v859_v56 }
 0x156   : > { %v902_v30 = vrot.slane %v901_v29, 1  ;;  %v973_v63 = vadd.f32 %v972_v23, %v971_v55 }
 0x157   : > { %v791_v61 = vadd.f32 %v790_v24, %v789_v58  ;;  %v862_v27 = vrot.slane %v861_v17, 1 }
 0x158   : > { %v903_v28 = vadd.f32 %v902_v30, %v901_v29  ;;  %v974_v62 = vrot.slane %v973_v63, 1 }
 0x159   : > { %v792_v44 = vadd.f32 %v791_v61, %v754_v59  ;;  %v863_v31 = vadd.f32 %v862_v27, %v861_v17 }
 0x15a   : > { %v904_v32 = vadd.f32 %v903_v28, %v866_v60  ;;  %v975_v2 = vadd.f32 %v974_v62, %v973_v63 }
 0x15b   : > { %793 = vst [vmem:[%s1817_s6] sm:$0x1] %v792_v44  ;;  %v864_v5 = vadd.f32 %v863_v31, %v794_v1 }
 0x15c   : > { %v976_v6 = vadd.f32 %v975_v2, %v906_v43  ;;  %905 = vst [vmem:[%s1819_s8] sm:$0x1] %v904_v32 }
 0x15d   : > { %865 = vst [vmem:[%s1818_s7] sm:$0x1] %v864_v5 }
 0x15e   : > { %977 = vst [vmem:[%s1820_s9] sm:$0x1] %v976_v6 }
 0x15f PF: > { %s20_s30 = sadd.s32 1, %s1167_s30  }
 0x160   : > { %p17_p5 = scmp.ge.s32.totalorder %s20_s30, 4  }
 0x162   :  { %19 = sbr.rel (!%p17_p5) target bundleno = 1 (0x1), region = 117 }

// kernel: _lambda_.8
= control target key start
LH: loop header
LB: loop body
LE: loop exit
PB: predicated region body
PF: predicated region fallthrough
CT: control target
= control target key end

     0   :  { %s1970_s15 = smov 0   ;;  %s2953_s0 = inlined_call_operand.vmem [shape: f32[512,1152], index: 0, kind: input, shape index: {}]   ;;  %s2954_s1 = inlined_call_operand.vmem [shape: f32[1152,128], index: 1, kind: input, shape index: {}]   ;;  %s2955_s2 = inlined_call_operand.vmem [shape: f32[512,128], index: 2, kind: output, shape index: {0}]   ;;  %s2956_s3 = inlined_call_operand.vmem [shape: f32[1,128], index: 3, kind: output, shape index: {1}]   ;;  %s2957_s4 = inlined_call_operand.vmem [shape: f32[1,128], index: 4, kind: output, shape index: {2}]  }
   0x1 LB: > { %s1866_s16 = sadd.s32 4294967295, %s1942_s15   ;;  %p1870_p0 = scmp.ge.s32.totalorder %s1942_s15, 1  ;;  %s1942_s15 = sphi %s1970_s15, %s15_s15  }
   0x2   : > { %p159_p1 = scmp.lt.s32.totalorder %s1942_s15, 3 }
   0x4   : > { %p160_p2 = pnand %p1870_p0, %p159_p1 }
   0x5   : > { %s1871_s17 = sshll.u32 (!%p160_p2), %s1866_s16, 5  ;;  %p1875_p4 = scmp.ne.s32.totalorder (!%p160_p2), %s1866_s16, 0 }
   0x6   : > { %163 = sbr.rel (%p160_p2) target bundleno = 776 (0x308), region = 28  ;;  %p187_p3 = scmp.lt.s32.totalorder (!%p160_p2), %s1871_s17, 63 }
   0xb   : > { %s2959_s17 = smov (!%p187_p3, %s1871_s17), 63  ;;  %202 = sbr.rel (%p1875_p4) target bundleno = 19 (0x13), region = 32 }
   0xc   : > { %s1926_s18 = smul.u32 72, %s2959_s17  ;;  %s1874_s19 = sshll.u32 %s2959_s17, 3 }
   0xd   : > { %s1981_s22 = scalar_lea.vmem %s2955_s2, %s1874_s19 }
   0xe   : > { %s1986_s25 = scalar_lea.vmem %s2953_s0, %s1926_s18 }
  0x10   : > { %v1944_v0 = vmov 0.0  }
  0x11   : > { %203 = vst [vmem:[%s2956_s3] sm:$0x1] %v1944_v0 }
  0x12   : > { %204 = vst [vmem:[%s2957_s4] sm:$0x1] %v1944_v0 }
  0x13 PF: > { %v508_v1 = vld [vmem:[%s2954_s1 + $0x78] sm:$0xff]  ;;  %v507_v2 = vld [vmem:[%s2954_s1 + $0x70] sm:$0xff]  ;;  %v506_v3 = vld [vmem:[%s2954_s1 + $0x68] sm:$0xff] }
  0x14   : > { %1878 = vmatpush.msra.mxu1 %v508_v1  ;;  %1879 = vmatpush.msra.mxu2 %v508_v1  ;;  %v505_v4 = vld [vmem:[%s2954_s1 + $0x60] sm:$0xff]  ;;  %v504_v5 = vld [vmem:[%s2954_s1 + $0x58] sm:$0xff]  ;;  %v503_v6 = vld [vmem:[%s2954_s1 + $0x50] sm:$0xff] }
  0x15   : > { %1880 = vmatpush.msra.mxu3 %v508_v1  ;;  %637 = vmatpush.msra.mxu0 %v508_v1  ;;  %v502_v7 = vld [vmem:[%s2954_s1 + $0x48] sm:$0xff]  ;;  %v501_v8 = vld [vmem:[%s2954_s1 + $0x40] sm:$0xff]  ;;  %v500_v9 = vld [vmem:[%s2954_s1 + $0x38] sm:$0xff] }
  0x16   : > { %1881 = vmatpush.msra.mxu1 %v507_v2  ;;  %1882 = vmatpush.msra.mxu2 %v507_v2  ;;  %v499_v10 = vld [vmem:[%s2954_s1 + $0x30] sm:$0xff]  ;;  %v498_v11 = vld [vmem:[%s2954_s1 + $0x28] sm:$0xff]  ;;  %v497_v12 = vld [vmem:[%s2954_s1 + $0x20] sm:$0xff] }
  0x17   : > { %1883 = vmatpush.msra.mxu3 %v507_v2  ;;  %638 = vmatpush.msra.mxu0 %v507_v2  ;;  %v496_v13 = vld [vmem:[%s2954_s1 + $0x18] sm:$0xff]  ;;  %v495_v14 = vld [vmem:[%s2954_s1 + $0x10] sm:$0xff]  ;;  %v494_v15 = vld [vmem:[%s2954_s1 + $0x8] sm:$0xff] }
  0x18   : > { %1884 = vmatpush.msra.mxu1 %v506_v3  ;;  %1885 = vmatpush.msra.mxu2 %v506_v3  ;;  %v493_v16 = vld [vmem:[%s2954_s1] sm:$0xff]  ;;  %v540_v19 = vld [vmem:[%s2954_s1 + $0x178] sm:$0xff]  ;;  %v539_v23 = vld [vmem:[%s2954_s1 + $0x170] sm:$0xff] }
  0x19   : > { %1886 = vmatpush.msra.mxu3 %v506_v3  ;;  %639 = vmatpush.msra.mxu0 %v506_v3  ;;  %v277_v17 = vld [vmem:[%s1986_s25 + $0x240] sm:$0xff]  ;;  %v524_v21 = vld [vmem:[%s2954_s1 + $0xf8] sm:$0xff]  ;;  %v523_v24 = vld [vmem:[%s2954_s1 + $0xf0] sm:$0xff] }
  0x1a   : > { %1887 = vmatpush.msra.mxu1 %v505_v4  ;;  %1888 = vmatpush.msra.mxu2 %v505_v4  ;;  %v349_v18 = vld [vmem:[%s1986_s25 + $0x480] sm:$0xff]  ;;  %v556_v22 = vld [vmem:[%s2954_s1 + $0x1f8] sm:$0xff]  ;;  %v555_v25 = vld [vmem:[%s2954_s1 + $0x1f0] sm:$0xff] }
  0x1b   : > { %1889 = vmatpush.msra.mxu3 %v505_v4  ;;  %640 = vmatpush.msra.mxu0 %v505_v4  ;;  %v421_v20 = vld [vmem:[%s1986_s25 + $0x6c0] sm:$0xff]  ;;  %v538_v26 = vld [vmem:[%s2954_s1 + $0x168] sm:$0xff]  ;;  %v572_v30 = vld [vmem:[%s2954_s1 + $0x278] sm:$0xff] }
  0x1c   : > { %1890 = vmatpush.msra.mxu1 %v504_v5  ;;  %1891 = vmatpush.msra.mxu2 %v504_v5  ;;  %v205_v27 = vld [vmem:[%s1986_s25] sm:$0xff]  ;;  %v522_v28 = vld [vmem:[%s2954_s1 + $0xe8] sm:$0xff]  ;;  %v571_v36 = vld [vmem:[%s2954_s1 + $0x270] sm:$0xff] }
  0x1d   : > { %1892 = vmatpush.msra.mxu3 %v504_v5  ;;  %641 = vmatpush.msra.mxu0 %v504_v5  ;;  %v554_v29 = vld [vmem:[%s2954_s1 + $0x1e8] sm:$0xff]  ;;  %v537_v33 = vld [vmem:[%s2954_s1 + $0x160] sm:$0xff]  ;;  %v536_v38 = vld [vmem:[%s2954_s1 + $0x158] sm:$0xff] }
  0x1e   : > { %1893 = vmatpush.msra.mxu1 %v503_v6  ;;  %1894 = vmatpush.msra.mxu2 %v503_v6  ;;  %v286_v31 = vld [vmem:[%s1986_s25 + $0x288] sm:$0xff]  ;;  %v553_v34 = vld [vmem:[%s2954_s1 + $0x1e0] sm:$0xff]  ;;  %v552_v39 = vld [vmem:[%s2954_s1 + $0x1d8] sm:$0xff] }
  0x1f   : > { %1895 = vmatpush.msra.mxu3 %v503_v6  ;;  %642 = vmatpush.msra.mxu0 %v503_v6  ;;  %v358_v32 = vld [vmem:[%s1986_s25 + $0x4c8] sm:$0xff]  ;;  %v521_v37 = vld [vmem:[%s2954_s1 + $0xe0] sm:$0xff]  ;;  %v520_v41 = vld [vmem:[%s2954_s1 + $0xd8] sm:$0xff] }
  0x20   : > { %1896 = vmatpush.msra.mxu1 %v502_v7  ;;  %1897 = vmatpush.msra.mxu2 %v502_v7  ;;  %v430_v35 = vld [vmem:[%s1986_s25 + $0x708] sm:$0xff]  ;;  %v535_v42 = vld [vmem:[%s2954_s1 + $0x150] sm:$0xff]  ;;  %v569_v45 = vld [vmem:[%s2954_s1 + $0x260] sm:$0xff] }
  0x21   : > { %1898 = vmatpush.msra.mxu3 %v502_v7  ;;  %643 = vmatpush.msra.mxu0 %v502_v7  ;;  %v570_v40 = vld [vmem:[%s2954_s1 + $0x268] sm:$0xff]  ;;  %v551_v44 = vld [vmem:[%s2954_s1 + $0x1d0] sm:$0xff]  ;;  %v568_v52 = vld [vmem:[%s2954_s1 + $0x258] sm:$0xff] }
  0x22   : > { %1899 = vmatpush.msra.mxu1 %v501_v8  ;;  %1900 = vmatpush.msra.mxu2 %v501_v8  ;;  %v214_v43 = vld [vmem:[%s1986_s25 + $0x48] sm:$0xff]  ;;  %v519_v46 = vld [vmem:[%s2954_s1 + $0xd0] sm:$0xff]  ;;  %v533_v54 = vld [vmem:[%s2954_s1 + $0x140] sm:$0xff] }
  0x23   : > { %1901 = vmatpush.msra.mxu3 %v501_v8  ;;  %644 = vmatpush.msra.mxu0 %v501_v8  ;;  %v295_v47 = vld [vmem:[%s1986_s25 + $0x2d0] sm:$0xff]  ;;  %v534_v49 = vld [vmem:[%s2954_s1 + $0x148] sm:$0xff]  ;;  %v549_v55 = vld [vmem:[%s2954_s1 + $0x1c0] sm:$0xff] }
  0x24   : > { %1902 = vmatpush.msra.mxu1 %v500_v9  ;;  %1903 = vmatpush.msra.mxu2 %v500_v9  ;;  %v367_v48 = vld [vmem:[%s1986_s25 + $0x510] sm:$0xff]  ;;  %v550_v50 = vld [vmem:[%s2954_s1 + $0x1c8] sm:$0xff]  ;;  %v517_v57 = vld [vmem:[%s2954_s1 + $0xc0] sm:$0xff] }
  0x25   : > { %1904 = vmatpush.msra.mxu3 %v500_v9  ;;  %645 = vmatpush.msra.mxu0 %v500_v9  ;;  %v439_v51 = vld [vmem:[%s1986_s25 + $0x750] sm:$0xff]  ;;  %v518_v53 = vld [vmem:[%s2954_s1 + $0xc8] sm:$0xff]  ;;  %v532_v58 = vld [vmem:[%s2954_s1 + $0x138] sm:$0xff] }
  0x26   : > { %1905 = vmatpush.msra.mxu1 %v499_v10  ;;  %1906 = vmatpush.msra.mxu2 %v499_v10  ;;  %v567_v56 = vld [vmem:[%s2954_s1 + $0x250] sm:$0xff]  ;;  %v548_v60 = vld [vmem:[%s2954_s1 + $0x1b8] sm:$0xff]  ;;  %v566_v61 = vld [vmem:[%s2954_s1 + $0x248] sm:$0xff] }
  0x27   : > { %1907 = vmatpush.msra.mxu3 %v499_v10  ;;  %646 = vmatpush.msra.mxu0 %v499_v10  ;;  %v223_v59 = vld [vmem:[%s1986_s25 + $0x90] sm:$0xff]  ;;  %v516_v62 = vld [vmem:[%s2954_s1 + $0xb8] sm:$0xff]  ;;  %v565_v4 = vld [vmem:[%s2954_s1 + $0x240] sm:$0xff] }
  0x28   : > { %1908 = vmatpush.msra.mxu1 %v498_v11  ;;  %1909 = vmatpush.msra.mxu2 %v498_v11  ;;  %v304_v63 = vld [vmem:[%s1986_s25 + $0x318] sm:$0xff]  ;;  %v531_v1 = vld [vmem:[%s2954_s1 + $0x130] sm:$0xff]  ;;  %v530_v6 = vld [vmem:[%s2954_s1 + $0x128] sm:$0xff] }
  0x29   : > { %1910 = vmatpush.msra.mxu3 %v498_v11  ;;  %647 = vmatpush.msra.mxu0 %v498_v11  ;;  %v376_v0 = vld [vmem:[%s1986_s25 + $0x558] sm:$0xff]  ;;  %v547_v2 = vld [vmem:[%s2954_s1 + $0x1b0] sm:$0xff]  ;;  %v546_v7 = vld [vmem:[%s2954_s1 + $0x1a8] sm:$0xff] }
  0x2a   : > { %1911 = vmatpush.msra.mxu1 %v497_v12  ;;  %1912 = vmatpush.msra.mxu2 %v497_v12  ;;  %v448_v3 = vld [vmem:[%s1986_s25 + $0x798] sm:$0xff]  ;;  %v515_v5 = vld [vmem:[%s2954_s1 + $0xb0] sm:$0xff]  ;;  %v514_v9 = vld [vmem:[%s2954_s1 + $0xa8] sm:$0xff] }
  0x2b   : > { %1913 = vmatpush.msra.mxu3 %v497_v12  ;;  %648 = vmatpush.msra.mxu0 %v497_v12  ;;  %v564_v8 = vld [vmem:[%s2954_s1 + $0x238] sm:$0xff]  ;;  %v529_v10 = vld [vmem:[%s2954_s1 + $0x120] sm:$0xff] }
  0x2c   : > { %1914 = vmatpush.msra.mxu1 %v496_v13  ;;  %1915 = vmatpush.msra.mxu2 %v496_v13  ;;  %v232_v11 = vld [vmem:[%s1986_s25 + $0xd8] sm:$0xff]  ;;  %v545_v12 = vld [vmem:[%s2954_s1 + $0x1a0] sm:$0xff] }
  0x2d   : > { %1916 = vmatpush.msra.mxu3 %v496_v13  ;;  %649 = vmatpush.msra.mxu0 %v496_v13  ;;  %v563_v13 = vld [vmem:[%s2954_s1 + $0x230] sm:$0xff] }
  0x2e   : > { %1917 = vmatpush.msra.mxu1 %v495_v14  ;;  %1918 = vmatpush.msra.mxu2 %v495_v14 }
  0x2f   : > { %1919 = vmatpush.msra.mxu3 %v495_v14  ;;  %650 = vmatpush.msra.mxu0 %v495_v14  ;;  %v513_v14 = vld [vmem:[%s2954_s1 + $0xa0] sm:$0xff] }
  0x30   : > { %1920 = vmatpush.msra.mxu1 %v494_v15  ;;  %1921 = vmatpush.msra.mxu2 %v494_v15 }
  0x31   : > { %1922 = vmatpush.msra.mxu3 %v494_v15  ;;  %651 = vmatpush.msra.mxu0 %v494_v15  ;;  %v313_v15 = vld [vmem:[%s1986_s25 + $0x360] sm:$0xff] }
  0x32   : > { %1923 = vmatpush.msra.mxu1 %v493_v16  ;;  %1924 = vmatpush.msra.mxu2 %v493_v16 }
  0x33   : > { %677 = vmatmul.f32.vlgmr.msra.gmra.mxu1 %v277_v17  ;;  %701 = vmatmul.f32.vlgmr.msra.gmra.mxu2 %v349_v18  ;;  %v528_v17 = vld [vmem:[%s2954_s1 + $0x118] sm:$0xff] }
  0x34   : > { %863 = vmatpush.msrb.mxu2 %v540_v19  ;;  %1925 = vmatpush.msra.mxu3 %v493_v16  ;;  %v544_v18 = vld [vmem:[%s2954_s1 + $0x198] sm:$0xff]  ;;  %v457_v19 = vld [vmem:[%s1986_s25 + $0x7e0] sm:$0xff] }
  0x35   : > { %725 = vmatmul.f32.vlgmr.msra.gmra.mxu3 %v421_v20  ;;  %750 = vmatpush.msrb.mxu1 %v524_v21  ;;  %v562_v20 = vld [vmem:[%s2954_s1 + $0x228] sm:$0xff]  ;;  %v512_v21 = vld [vmem:[%s2954_s1 + $0x98] sm:$0xff] }
  0x36   : > { %976 = vmatpush.msrb.mxu3 %v556_v22  ;;  %864 = vmatpush.msrb.mxu2 %v539_v23  ;;  %v527_v22 = vld [vmem:[%s2954_s1 + $0x110] sm:$0xff] }
  0x37   : > { %751 = vmatpush.msrb.mxu1 %v523_v24  ;;  %652 = vmatpush.msra.mxu0 %v493_v16  ;;  %v385_v16 = vld [vmem:[%s1986_s25 + $0x5a0] sm:$0xff]  ;;  %v543_v23 = vld [vmem:[%s2954_s1 + $0x190] sm:$0xff] }
  0x38   : > { %977 = vmatpush.msrb.mxu3 %v555_v25  ;;  %865 = vmatpush.msrb.mxu2 %v538_v26  ;;  %v561_v24 = vld [vmem:[%s2954_s1 + $0x220] sm:$0xff]  ;;  %v511_v25 = vld [vmem:[%s2954_s1 + $0x90] sm:$0xff]  ;;  %v526_v26 = vld [vmem:[%s2954_s1 + $0x108] sm:$0xff] }
  0x39   : > { %653 = vmatmul.f32.vlgmr.msra.gmra.mxu0 %v205_v27  ;;  %752 = vmatpush.msrb.mxu1 %v522_v28  ;;  %v241_v27 = vld [vmem:[%s1986_s25 + $0x120] sm:$0xff]  ;;  %v542_v28 = vld [vmem:[%s2954_s1 + $0x188] sm:$0xff] }
  0x3a   : > { %978 = vmatpush.msrb.mxu3 %v554_v29  ;;  %1089 = vmatpush.msrb.mxu0 %v572_v30  ;;  %v560_v29 = vld [vmem:[%s2954_s1 + $0x218] sm:$0xff]  ;;  %v510_v30 = vld [vmem:[%s2954_s1 + $0x88] sm:$0xff] }
  0x3b   : > { %680 = vmatmul.f32.gmra.mxu1 %v286_v31  ;;  %704 = vmatmul.f32.gmra.mxu2 %v358_v32  ;;  %v322_v31 = vld [vmem:[%s1986_s25 + $0x3a8] sm:$0xff] }
  0x3c   : > { %866 = vmatpush.msrb.mxu2 %v537_v33  ;;  %979 = vmatpush.msrb.mxu3 %v553_v34  ;;  %v394_v32 = vld [vmem:[%s1986_s25 + $0x5e8] sm:$0xff]  ;;  %v525_v33 = vld [vmem:[%s2954_s1 + $0x100] sm:$0xff] }
  0x3d   : > { %728 = vmatmul.f32.gmra.mxu3 %v430_v35  ;;  %1090 = vmatpush.msrb.mxu0 %v571_v36  ;;  %v541_v34 = vld [vmem:[%s2954_s1 + $0x180] sm:$0xff]  ;;  %v466_v35 = vld [vmem:[%s1986_s25 + $0x828] sm:$0xff]  ;;  %v559_v36 = vld [vmem:[%s2954_s1 + $0x210] sm:$0xff] }
  0x3e   : > { %753 = vmatpush.msrb.mxu1 %v521_v37  ;;  %867 = vmatpush.msrb.mxu2 %v536_v38  ;;  %v509_v37 = vld [vmem:[%s2954_s1 + $0x80] sm:$0xff]  ;;  %v604_v38 = vld [vmem:[%s2954_s1 + $0x378] sm:$0xff] }
  0x3f   : > { %980 = vmatpush.msrb.mxu3 %v552_v39  ;;  %1091 = vmatpush.msrb.mxu0 %v570_v40  ;;  %v558_v39 = vld [vmem:[%s2954_s1 + $0x208] sm:$0xff]  ;;  %v620_v40 = vld [vmem:[%s2954_s1 + $0x3f8] sm:$0xff] }
  0x40   : > { %754 = vmatpush.msrb.mxu1 %v520_v41  ;;  %868 = vmatpush.msrb.mxu2 %v535_v42  ;;  %v588_v41 = vld [vmem:[%s2954_s1 + $0x2f8] sm:$0xff]  ;;  %v250_v42 = vld [vmem:[%s1986_s25 + $0x168] sm:$0xff] }
  0x41   : > { %656 = vmatmul.f32.gmra.mxu0 %v214_v43  ;;  %981 = vmatpush.msrb.mxu3 %v551_v44  ;;  %v557_v43 = vld [vmem:[%s2954_s1 + $0x200] sm:$0xff]  ;;  %v331_v44 = vld [vmem:[%s1986_s25 + $0x3f0] sm:$0xff] }
  0x42   : > { %1092 = vmatpush.msrb.mxu0 %v569_v45  ;;  %755 = vmatpush.msrb.mxu1 %v519_v46  ;;  %v403_v45 = vld [vmem:[%s1986_s25 + $0x630] sm:$0xff]  ;;  %v636_v46 = vld [vmem:[%s2954_s1 + $0x478] sm:$0xff] }
  0x43   : > { %683 = vmatmul.f32.gmra.mxu1 %v295_v47  ;;  %707 = vmatmul.f32.gmra.mxu2 %v367_v48  ;;  %v475_v47 = vld [vmem:[%s1986_s25 + $0x870] sm:$0xff] }
  0x44   : > { %869 = vmatpush.msrb.mxu2 %v534_v49  ;;  %982 = vmatpush.msrb.mxu3 %v550_v50  ;;  %v603_v48 = vld [vmem:[%s2954_s1 + $0x370] sm:$0xff] }
  0x45   : > { %731 = vmatmul.f32.gmra.mxu3 %v439_v51  ;;  %1093 = vmatpush.msrb.mxu0 %v568_v52  ;;  %v619_v49 = vld [vmem:[%s2954_s1 + $0x3f0] sm:$0xff]  ;;  %v340_v52 = vld [vmem:[%s1986_s25 + $0x438] sm:$0xff] }
  0x46   : > { %756 = vmatpush.msrb.mxu1 %v518_v53  ;;  %870 = vmatpush.msrb.mxu2 %v533_v54  ;;  %v587_v50 = vld [vmem:[%s2954_s1 + $0x2f0] sm:$0xff]  ;;  %v412_v53 = vld [vmem:[%s1986_s25 + $0x678] sm:$0xff] }
  0x47   : > { %983 = vmatpush.msrb.mxu3 %v549_v55  ;;  %1094 = vmatpush.msrb.mxu0 %v567_v56  ;;  %v259_v51 = vld [vmem:[%s1986_s25 + $0x1b0] sm:$0xff]  ;;  %v484_v54 = vld [vmem:[%s1986_s25 + $0x8b8] sm:$0xff] }
  0x48   : > { %757 = vmatpush.msrb.mxu1 %v517_v57  ;;  %871 = vmatpush.msrb.mxu2 %v532_v58  ;;  %v635_v55 = vld [vmem:[%s2954_s1 + $0x470] sm:$0xff]  ;;  %v268_v56 = vld [vmem:[%s1986_s25 + $0x1f8] sm:$0xff]  ;;  %v206_v57 = vld [vmem:[%s1986_s25 + $0x8] sm:$0xff] }
  0x49   : > { %659 = vmatmul.f32.gmra.mxu0 %v223_v59  ;;  %984 = vmatpush.msrb.mxu3 %v548_v60  ;;  %v207_v58 = vld [vmem:[%s1986_s25 + $0x10] sm:$0xff]  ;;  %v208_v59 = vld [vmem:[%s1986_s25 + $0x18] sm:$0xff]  ;;  %v602_v60 = vld [vmem:[%s2954_s1 + $0x368] sm:$0xff] }
  0x4a   : > { %1095 = vmatpush.msrb.mxu0 %v566_v61  ;;  %758 = vmatpush.msrb.mxu1 %v516_v62  ;;  %v618_v61 = vld [vmem:[%s2954_s1 + $0x3e8] sm:$0xff] }
  0x4b   : > { %686 = vmatmul.f32.gmra.mxu1 %v304_v63  ;;  %710 = vmatmul.f32.gmra.mxu2 %v376_v0  ;;  %v586_v62 = vld [vmem:[%s2954_s1 + $0x2e8] sm:$0xff]  ;;  %v209_v63 = vld [vmem:[%s1986_s25 + $0x20] sm:$0xff]  ;;  %v215_v0 = vld [vmem:[%s1986_s25 + $0x50] sm:$0xff] }
  0x4c   : > { %872 = vmatpush.msrb.mxu2 %v531_v1  ;;  %985 = vmatpush.msrb.mxu3 %v547_v2  ;;  %v216_v1 = vld [vmem:[%s1986_s25 + $0x58] sm:$0xff]  ;;  %v217_v2 = vld [vmem:[%s1986_s25 + $0x60] sm:$0xff] }
  0x4d   : > { %734 = vmatmul.f32.gmra.mxu3 %v448_v3  ;;  %1096 = vmatpush.msrb.mxu0 %v565_v4  ;;  %v634_v3 = vld [vmem:[%s2954_s1 + $0x468] sm:$0xff] }
  0x4e   : > { %759 = vmatpush.msrb.mxu1 %v515_v5  ;;  %873 = vmatpush.msrb.mxu2 %v530_v6  ;;  %v218_v4 = vld [vmem:[%s1986_s25 + $0x68] sm:$0xff]  ;;  %v224_v5 = vld [vmem:[%s1986_s25 + $0x98] sm:$0xff]  ;;  %v225_v6 = vld [vmem:[%s1986_s25 + $0xa0] sm:$0xff] }
  0x4f   : > { %986 = vmatpush.msrb.mxu3 %v546_v7  ;;  %1097 = vmatpush.msrb.mxu0 %v564_v8  ;;  %v226_v7 = vld [vmem:[%s1986_s25 + $0xa8] sm:$0xff]  ;;  %v601_v8 = vld [vmem:[%s2954_s1 + $0x360] sm:$0xff] }
  0x50   : > { %760 = vmatpush.msrb.mxu1 %v514_v9  ;;  %874 = vmatpush.msrb.mxu2 %v529_v10  ;;  %v617_v9 = vld [vmem:[%s2954_s1 + $0x3e0] sm:$0xff] }
  0x51   : > { %662 = vmatmul.f32.gmra.mxu0 %v232_v11  ;;  %987 = vmatpush.msrb.mxu3 %v545_v12  ;;  %v585_v10 = vld [vmem:[%s2954_s1 + $0x2e0] sm:$0xff]  ;;  %v227_v11 = vld [vmem:[%s1986_s25 + $0xb0] sm:$0xff] }
  0x52   : > { %1098 = vmatpush.msrb.mxu0 %v563_v13  ;;  %761 = vmatpush.msrb.mxu1 %v513_v14  ;;  %v233_v12 = vld [vmem:[%s1986_s25 + $0xe0] sm:$0xff]  ;;  %v234_v13 = vld [vmem:[%s1986_s25 + $0xe8] sm:$0xff]  ;;  %v235_v14 = vld [vmem:[%s1986_s25 + $0xf0] sm:$0xff] }
  0x53   : > { %689 = vmatmul.f32.gmra.mxu1 %v313_v15  ;;  %713 = vmatmul.f32.gmra.mxu2 %v385_v16  ;;  %v633_v15 = vld [vmem:[%s2954_s1 + $0x460] sm:$0xff]  ;;  %v236_v16 = vld [vmem:[%s1986_s25 + $0xf8] sm:$0xff] }
  0x54   : > { %875 = vmatpush.msrb.mxu2 %v528_v17  ;;  %988 = vmatpush.msrb.mxu3 %v544_v18  ;;  %v242_v17 = vld [vmem:[%s1986_s25 + $0x128] sm:$0xff]  ;;  %v243_v18 = vld [vmem:[%s1986_s25 + $0x130] sm:$0xff] }
  0x55   : > { %737 = vmatmul.f32.gmra.mxu3 %v457_v19  ;;  %1099 = vmatpush.msrb.mxu0 %v562_v20  ;;  %v244_v19 = vld [vmem:[%s1986_s25 + $0x138] sm:$0xff] }
  0x56   : > { %762 = vmatpush.msrb.mxu1 %v512_v21  ;;  %876 = vmatpush.msrb.mxu2 %v527_v22  ;;  %v600_v20 = vld [vmem:[%s2954_s1 + $0x358] sm:$0xff]  ;;  %v245_v22 = vld [vmem:[%s1986_s25 + $0x140] sm:$0xff] }
  0x57   : > { %989 = vmatpush.msrb.mxu3 %v543_v23  ;;  %1100 = vmatpush.msrb.mxu0 %v561_v24  ;;  %v616_v21 = vld [vmem:[%s2954_s1 + $0x3d8] sm:$0xff]  ;;  %v251_v24 = vld [vmem:[%s1986_s25 + $0x170] sm:$0xff] }
  0x58   : > { %763 = vmatpush.msrb.mxu1 %v511_v25  ;;  %877 = vmatpush.msrb.mxu2 %v526_v26  ;;  %v584_v23 = vld [vmem:[%s2954_s1 + $0x2d8] sm:$0xff]  ;;  %v253_v26 = vld [vmem:[%s1986_s25 + $0x180] sm:$0xff] }
  0x59   : > { %665 = vmatmul.f32.gmra.mxu0 %v241_v27  ;;  %990 = vmatpush.msrb.mxu3 %v542_v28  ;;  %v252_v25 = vld [vmem:[%s1986_s25 + $0x178] sm:$0xff]  ;;  %v254_v28 = vld [vmem:[%s1986_s25 + $0x188] sm:$0xff] }
  0x5a   : > { %1101 = vmatpush.msrb.mxu0 %v560_v29  ;;  %764 = vmatpush.msrb.mxu1 %v510_v30  ;;  %v632_v27 = vld [vmem:[%s2954_s1 + $0x458] sm:$0xff]  ;;  %v261_v30 = vld [vmem:[%s1986_s25 + $0x1c0] sm:$0xff] }
  0x5b   : > { %692 = vmatmul.f32.gmra.mxu1 %v322_v31  ;;  %716 = vmatmul.f32.gmra.mxu2 %v394_v32  ;;  %v260_v29 = vld [vmem:[%s1986_s25 + $0x1b8] sm:$0xff]  ;;  %v262_v31 = vld [vmem:[%s1986_s25 + $0x1c8] sm:$0xff]  ;;  %v599_v32 = vld [vmem:[%s2954_s1 + $0x350] sm:$0xff] }
  0x5c   : > { %878 = vmatpush.msrb.mxu2 %v525_v33  ;;  %991 = vmatpush.msrb.mxu3 %v541_v34  ;;  %v615_v33 = vld [vmem:[%s2954_s1 + $0x3d0] sm:$0xff] }
  0x5d   : > { %740 = vmatmul.f32.gmra.mxu3 %v466_v35  ;;  %1102 = vmatpush.msrb.mxu0 %v559_v36  ;;  %v263_v34 = vld [vmem:[%s1986_s25 + $0x1d0] sm:$0xff]  ;;  %v269_v36 = vld [vmem:[%s1986_s25 + $0x200] sm:$0xff] }
  0x5e   : > { %765 = vmatpush.msrb.mxu1 %v509_v37  ;;  %1315 = vmatpush.msra.mxu2 %v604_v38  ;;  %v583_v35 = vld [vmem:[%s2954_s1 + $0x2d0] sm:$0xff]  ;;  %v270_v37 = vld [vmem:[%s1986_s25 + $0x208] sm:$0xff] }
  0x5f   : > { %1103 = vmatpush.msrb.mxu0 %v558_v39  ;;  %1428 = vmatpush.msra.mxu3 %v620_v40  ;;  %v271_v38 = vld [vmem:[%s1986_s25 + $0x210] sm:$0xff]  ;;  %v272_v40 = vld [vmem:[%s1986_s25 + $0x218] sm:$0xff] }
  0x60   : > { %1202 = vmatpush.msra.mxu1 %v588_v41  ;;  %1316 = vmatpush.msra.mxu2 %v603_v48  ;;  %v631_v39 = vld [vmem:[%s2954_s1 + $0x450] sm:$0xff] }
  0x61   : > { %668 = vmatmul.f32.gmra.mxu0 %v250_v42  ;;  %1429 = vmatpush.msra.mxu3 %v619_v49  ;;  %v278_v42 = vld [vmem:[%s1986_s25 + $0x248] sm:$0xff]  ;;  %v281_v49 = vld [vmem:[%s1986_s25 + $0x260] sm:$0xff] }
  0x62   : > { %1104 = vmatpush.msrb.mxu0 %v557_v43  ;;  %1203 = vmatpush.msra.mxu1 %v587_v50  ;;  %v279_v43 = vld [vmem:[%s1986_s25 + $0x250] sm:$0xff]  ;;  %v582_v50 = vld [vmem:[%s2954_s1 + $0x2c8] sm:$0xff] }
  0x63   : > { %695 = vmatmul.f32.gmra.mxu1 %v331_v44  ;;  %719 = vmatmul.f32.gmra.mxu2 %v403_v45  ;;  %v280_v44 = vld [vmem:[%s1986_s25 + $0x258] sm:$0xff]  ;;  %v598_v45 = vld [vmem:[%s2954_s1 + $0x348] sm:$0xff] }
  0x64   : > { %1541 = vmatpush.msra.mxu0 %v636_v46  ;;  %1317 = vmatpush.msra.mxu2 %v602_v60  ;;  %v614_v46 = vld [vmem:[%s2954_s1 + $0x3c8] sm:$0xff] }
  0x65   : > { %743 = vmatmul.f32.gmra.mxu3 %v475_v47  ;;  %1204 = vmatpush.msra.mxu1 %v586_v62  ;;  %v296_v62 = vld [vmem:[%s1986_s25 + $0x2d8] sm:$0xff] }
  0x66   : > { %1542 = vmatpush.msra.mxu0 %v635_v55  ;;  %1430 = vmatpush.msra.mxu3 %v618_v61  ;;  %v289_v55 = vld [vmem:[%s1986_s25 + $0x2a0] sm:$0xff] }
  0x67   : > { %1318 = vmatpush.msra.mxu2 %v601_v8  ;;  %1205 = vmatpush.msra.mxu1 %v585_v10  ;;  %v306_v10 = vld [vmem:[%s1986_s25 + $0x328] sm:$0xff] }
  0x68   : > { %1543 = vmatpush.msra.mxu0 %v634_v3  ;;  %1431 = vmatpush.msra.mxu3 %v617_v9  ;;  %v305_v9 = vld [vmem:[%s1986_s25 + $0x320] sm:$0xff] }
  0x69   : > { %671 = vmatmul.f32.gmra.mxu0 %v259_v51  ;;  %1319 = vmatpush.msra.mxu2 %v600_v20  ;;  %v316_v20 = vld [vmem:[%s1986_s25 + $0x378] sm:$0xff] }
  0x6a   : > { %1544 = vmatpush.msra.mxu0 %v633_v15  ;;  %1432 = vmatpush.msra.mxu3 %v616_v21  ;;  %v308_v15 = vld [vmem:[%s1986_s25 + $0x338] sm:$0xff] }
  0x6b   : > { %698 = vmatmul.f32.gmra.mxu1 %v340_v52  ;;  %722 = vmatmul.f32.gmra.mxu2 %v412_v53  ;;  %v287_v53 = vld [vmem:[%s1986_s25 + $0x290] sm:$0xff]  ;;  %v596_v21 = vld [vmem:[%s2954_s1 + $0x338] sm:$0xff] }
  0x6c   : > { %1206 = vmatpush.msra.mxu1 %v584_v23  ;;  %1545 = vmatpush.msra.mxu0 %v632_v27 }
  0x6d   : > { %746 = vmatmul.f32.gmra.mxu3 %v484_v54  ;;  %1320 = vmatpush.msra.mxu2 %v599_v32  ;;  %v288_v54 = vld [vmem:[%s1986_s25 + $0x298] sm:$0xff] }
  0x6e   : > { %1433 = vmatpush.msra.mxu3 %v615_v33  ;;  %1207 = vmatpush.msra.mxu1 %v583_v35  ;;  %v628_v32 = vld [vmem:[%s2954_s1 + $0x438] sm:$0xff]  ;;  %v326_v35 = vld [vmem:[%s1986_s25 + $0x3c8] sm:$0xff] }
  0x6f   : > { %1546 = vmatpush.msra.mxu0 %v631_v39  ;;  %1321 = vmatpush.msra.mxu2 %v598_v45  ;;  %v333_v39 = vld [vmem:[%s1986_s25 + $0x400] sm:$0xff] }
  0x70   : > { %1434 = vmatpush.msra.mxu3 %v614_v46  ;;  %1208 = vmatpush.msra.mxu1 %v582_v50  ;;  %v335_v46 = vld [vmem:[%s1986_s25 + $0x410] sm:$0xff] }
  0x71   : > { %674 = vmatmul.f32.gmra.mxu0 %v268_v56  ;;  %v630_v56 = vld [vmem:[%s2954_s1 + $0x448] sm:$0xff] }
  0x72   : > { %1547 = vmatpush.msra.mxu0 %v630_v56  ;;  %v343_v56 = vld [vmem:[%s1986_s25 + $0x450] sm:$0xff] }
  0x73   : > { %766 = vmatmul.f32.vlgmr.msrb.gmra.mxu1 %v206_v57  ;;  %879 = vmatmul.f32.vlgmr.msrb.gmra.mxu2 %v207_v58 }
  0x75   : > { %992 = vmatmul.f32.vlgmr.msrb.gmra.mxu3 %v208_v59  ;;  %v290_v59 = vld [vmem:[%s1986_s25 + $0x2a8] sm:$0xff] }
  0x79   : > { %1105 = vmatmul.f32.vlgmr.msrb.gmra.mxu0 %v209_v63  ;;  %v297_v63 = vld [vmem:[%s1986_s25 + $0x2e0] sm:$0xff] }
  0x7b   : > { %769 = vmatmul.f32.gmra.mxu1 %v215_v0  ;;  %882 = vmatmul.f32.gmra.mxu2 %v216_v1  ;;  %v298_v0 = vld [vmem:[%s1986_s25 + $0x2e8] sm:$0xff]  ;;  %v597_v1 = vld [vmem:[%s2954_s1 + $0x340] sm:$0xff] }
  0x7c   : > { %1322 = vmatpush.msra.mxu2 %v597_v1 }
  0x7d   : > { %995 = vmatmul.f32.gmra.mxu3 %v217_v2  ;;  %v613_v2 = vld [vmem:[%s2954_s1 + $0x3c0] sm:$0xff] }
  0x7e   : > { %1435 = vmatpush.msra.mxu3 %v613_v2  ;;  %1323 = vmatpush.msra.mxu2 %v596_v21  ;;  %v578_v21 = vld [vmem:[%s2954_s1 + $0x2a8] sm:$0xff] }
  0x81   : > { %1108 = vmatmul.f32.gmra.mxu0 %v218_v4 }
  0x83   : > { %772 = vmatmul.f32.gmra.mxu1 %v224_v5  ;;  %885 = vmatmul.f32.gmra.mxu2 %v225_v6  ;;  %v299_v5 = vld [vmem:[%s1986_s25 + $0x2f0] sm:$0xff]  ;;  %v581_v6 = vld [vmem:[%s2954_s1 + $0x2c0] sm:$0xff] }
  0x84   : > { %1209 = vmatpush.msra.mxu1 %v581_v6  ;;  %v351_v6 = vld [vmem:[%s1986_s25 + $0x490] sm:$0xff] }
  0x85   : > { %998 = vmatmul.f32.gmra.mxu3 %v226_v7 }
  0x89   : > { %1111 = vmatmul.f32.gmra.mxu0 %v227_v11  ;;  %v307_v11 = vld [vmem:[%s1986_s25 + $0x330] sm:$0xff] }
  0x8b   : > { %775 = vmatmul.f32.gmra.mxu1 %v233_v12  ;;  %888 = vmatmul.f32.gmra.mxu2 %v234_v13  ;;  %v629_v12 = vld [vmem:[%s2954_s1 + $0x440] sm:$0xff] }
  0x8c   : > { %1548 = vmatpush.msra.mxu0 %v629_v12  ;;  %v610_v12 = vld [vmem:[%s2954_s1 + $0x3a8] sm:$0xff] }
  0x8d   : > { %1001 = vmatmul.f32.gmra.mxu3 %v235_v14 }
  0x8e   : > { %1549 = vmatpush.msra.mxu0 %v628_v32 }
  0x91   : > { %1114 = vmatmul.f32.gmra.mxu0 %v236_v16 }
  0x93   : > { %778 = vmatmul.f32.gmra.mxu1 %v242_v17  ;;  %891 = vmatmul.f32.gmra.mxu2 %v243_v18  ;;  %v314_v18 = vld [vmem:[%s1986_s25 + $0x368] sm:$0xff] }
  0x95   : > { %1004 = vmatmul.f32.gmra.mxu3 %v244_v19  ;;  %v315_v19 = vld [vmem:[%s1986_s25 + $0x370] sm:$0xff] }
  0x99   : > { %1117 = vmatmul.f32.gmra.mxu0 %v245_v22  ;;  %v612_v22 = vld [vmem:[%s2954_s1 + $0x3b8] sm:$0xff] }
  0x9a   : > { %1436 = vmatpush.msra.mxu3 %v612_v22 }
  0x9b   : > { %781 = vmatmul.f32.gmra.mxu1 %v251_v24  ;;  %894 = vmatmul.f32.gmra.mxu2 %v252_v25  ;;  %v317_v25 = vld [vmem:[%s1986_s25 + $0x380] sm:$0xff] }
  0x9d   : > { %1007 = vmatmul.f32.gmra.mxu3 %v253_v26  ;;  %v580_v26 = vld [vmem:[%s2954_s1 + $0x2b8] sm:$0xff] }
  0x9e   : > { %1210 = vmatpush.msra.mxu1 %v580_v26  ;;  %v359_v26 = vld [vmem:[%s1986_s25 + $0x4d0] sm:$0xff] }
  0xa1   : > { %1120 = vmatmul.f32.gmra.mxu0 %v254_v28 }
  0xa3   : > { %784 = vmatmul.f32.gmra.mxu1 %v260_v29  ;;  %897 = vmatmul.f32.gmra.mxu2 %v261_v30  ;;  %v323_v29 = vld [vmem:[%s1986_s25 + $0x3b0] sm:$0xff]  ;;  %v324_v30 = vld [vmem:[%s1986_s25 + $0x3b8] sm:$0xff] }
  0xa5   : > { %1010 = vmatmul.f32.gmra.mxu3 %v262_v31  ;;  %v325_v31 = vld [vmem:[%s1986_s25 + $0x3c0] sm:$0xff] }
  0xa9   : > { %1123 = vmatmul.f32.gmra.mxu0 %v263_v34 }
  0xab   : > { %787 = vmatmul.f32.gmra.mxu1 %v269_v36  ;;  %900 = vmatmul.f32.gmra.mxu2 %v270_v37 }
  0xad   : > { %1013 = vmatmul.f32.gmra.mxu3 %v271_v38  ;;  %v332_v38 = vld [vmem:[%s1986_s25 + $0x3f8] sm:$0xff] }
  0xb0   : > { %v2370_v41 = vpop.f32.mrf.mxu1 }
  0xb1   : > { %1126 = vmatmul.f32.gmra.mxu0 %v272_v40  ;;  %v334_v40 = vld [vmem:[%s1986_s25 + $0x408] sm:$0xff] }
  0xb3   : > { %790 = vmatmul.f32.gmra.mxu1 %v278_v42  ;;  %903 = vmatmul.f32.gmra.mxu2 %v279_v43  ;;  %v595_v42 = vld [vmem:[%s2954_s1 + $0x330] sm:$0xff] }
  0xb4   : > { %1324 = vmatpush.msra.mxu2 %v595_v42  ;;  %v611_v43 = vld [vmem:[%s2954_s1 + $0x3b0] sm:$0xff] }
  0xb5   : > { %1016 = vmatmul.f32.gmra.mxu3 %v280_v44 }
  0xb6   : > { %v2381_v47 = vpop.f32.mrf.mxu2  ;;  %v2383_v48 = vpop.f32.mrf.mxu0  ;;  %1437 = vmatpush.msra.mxu3 %v611_v43 }
  0xb8   : > { %v2389_v51 = vpop.f32.mrf.mxu1  ;;  %v2391_v52 = vpop.f32.mrf.mxu3  ;;  %1438 = vmatpush.msra.mxu3 %v610_v12 }
  0xb9   : > { %1129 = vmatmul.f32.gmra.mxu0 %v281_v49  ;;  %v579_v49 = vld [vmem:[%s2954_s1 + $0x2b0] sm:$0xff] }
  0xba   : > { %1211 = vmatpush.msra.mxu1 %v579_v49  ;;  %v368_v49 = vld [vmem:[%s1986_s25 + $0x518] sm:$0xff] }
  0xbb   : > { %793 = vmatmul.f32.gmra.mxu1 %v287_v53  ;;  %906 = vmatmul.f32.gmra.mxu2 %v288_v54  ;;  %v341_v54 = vld [vmem:[%s1986_s25 + $0x440] sm:$0xff] }
  0xbc   : > { %1212 = vmatpush.msra.mxu1 %v578_v21 }
  0xbd   : > { %1019 = vmatmul.f32.gmra.mxu3 %v289_v55  ;;  %v342_v55 = vld [vmem:[%s1986_s25 + $0x448] sm:$0xff] }
  0xbe   : > { %v2399_v57 = vpop.f32.mrf.mxu2  ;;  %v2401_v58 = vpop.f32.mrf.mxu0 }
  0xc0   : > { %v2404_v60 = vpop.f32.mrf.mxu1  ;;  %v2406_v61 = vpop.f32.mrf.mxu3 }
  0xc1   : > { %1132 = vmatmul.f32.gmra.mxu0 %v290_v59  ;;  %v627_v59 = vld [vmem:[%s2954_s1 + $0x430] sm:$0xff] }
  0xc2   : > { %1550 = vmatpush.msra.mxu0 %v627_v59 }
  0xc3   : > { %796 = vmatmul.f32.gmra.mxu1 %v296_v62  ;;  %909 = vmatmul.f32.gmra.mxu2 %v297_v63 }
  0xc5   : > { %1022 = vmatmul.f32.gmra.mxu3 %v298_v0  ;;  %v344_v0 = vld [vmem:[%s1986_s25 + $0x458] sm:$0xff] }
  0xc6   : > { %v2417_v3 = vpop.f32.mrf.mxu2  ;;  %v2419_v4 = vpop.f32.mrf.mxu0 }
  0xc8   : > { %v2425_v7 = vpop.f32.mrf.mxu1  ;;  %v2427_v8 = vpop.f32.mrf.mxu3 }
  0xc9   : > { %1135 = vmatmul.f32.gmra.mxu0 %v299_v5  ;;  %v350_v5 = vld [vmem:[%s1986_s25 + $0x488] sm:$0xff] }
  0xcb   : > { %799 = vmatmul.f32.gmra.mxu1 %v305_v9  ;;  %912 = vmatmul.f32.gmra.mxu2 %v306_v10  ;;  %v352_v9 = vld [vmem:[%s1986_s25 + $0x498] sm:$0xff]  ;;  %v594_v10 = vld [vmem:[%s2954_s1 + $0x328] sm:$0xff] }
  0xcc   : > { %1325 = vmatpush.msra.mxu2 %v594_v10 }
  0xcd   : > { %1025 = vmatmul.f32.gmra.mxu3 %v307_v11 }
  0xce   : > { %v2435_v13 = vpop.f32.mrf.mxu2  ;;  %v2437_v14 = vpop.f32.mrf.mxu0 }
  0xd0   : > { %v2440_v16 = vpop.f32.mrf.mxu1  ;;  %v2442_v17 = vpop.f32.mrf.mxu3 }
  0xd1   : > { %1138 = vmatmul.f32.gmra.mxu0 %v308_v15 }
  0xd3   : > { %802 = vmatmul.f32.gmra.mxu1 %v314_v18  ;;  %915 = vmatmul.f32.gmra.mxu2 %v315_v19  ;;  %v353_v19 = vld [vmem:[%s1986_s25 + $0x4a0] sm:$0xff] }
  0xd5   : > { %1028 = vmatmul.f32.gmra.mxu3 %v316_v20 }
  0xd6   : > { %v2453_v23 = vpop.f32.mrf.mxu2  ;;  %v2455_v24 = vpop.f32.mrf.mxu0 }
  0xd8   : > { %v2461_v27 = vpop.f32.mrf.mxu1  ;;  %v2463_v28 = vpop.f32.mrf.mxu3 }
  0xd9   : > { %1141 = vmatmul.f32.gmra.mxu0 %v317_v25 }
  0xdb   : > { %805 = vmatmul.f32.gmra.mxu1 %v323_v29  ;;  %918 = vmatmul.f32.gmra.mxu2 %v324_v30  ;;  %v361_v30 = vld [vmem:[%s1986_s25 + $0x4e0] sm:$0xff] }
  0xdd   : > { %1031 = vmatmul.f32.gmra.mxu3 %v325_v31 }
  0xde   : > { %v2471_v33 = vpop.f32.mrf.mxu2  ;;  %v2473_v34 = vpop.f32.mrf.mxu0 }
  0xe0   : > { %v2476_v36 = vpop.f32.mrf.mxu1  ;;  %v2478_v37 = vpop.f32.mrf.mxu3 }
  0xe1   : > { %1144 = vmatmul.f32.gmra.mxu0 %v326_v35  ;;  %v626_v35 = vld [vmem:[%s2954_s1 + $0x428] sm:$0xff] }
  0xe2   : > { %1551 = vmatpush.msra.mxu0 %v626_v35 }
  0xe3   : > { %808 = vmatmul.f32.gmra.mxu1 %v332_v38  ;;  %921 = vmatmul.f32.gmra.mxu2 %v333_v39 }
  0xe5   : > { %1034 = vmatmul.f32.gmra.mxu3 %v334_v40  ;;  %v362_v40 = vld [vmem:[%s1986_s25 + $0x4e8] sm:$0xff] }
  0xe6   : > { %v2489_v44 = vpop.f32.mrf.mxu2  ;;  %v2491_v45 = vpop.f32.mrf.mxu0 }
  0xe8   : > { %v2497_v50 = vpop.f32.mrf.mxu1  ;;  %v2499_v53 = vpop.f32.mrf.mxu3 }
  0xe9   : > { %1147 = vmatmul.f32.gmra.mxu0 %v335_v46 }
  0xeb   : > { %811 = vmatmul.f32.gmra.mxu1 %v341_v54  ;;  %924 = vmatmul.f32.gmra.mxu2 %v342_v55  ;;  %v369_v54 = vld [vmem:[%s1986_s25 + $0x520] sm:$0xff] }
  0xed   : > { %1037 = vmatmul.f32.gmra.mxu3 %v343_v56  ;;  %v370_v56 = vld [vmem:[%s1986_s25 + $0x528] sm:$0xff] }
  0xee   : > { %v2507_v62 = vpop.f32.mrf.mxu2  ;;  %v2509_v63 = vpop.f32.mrf.mxu0 }
  0xf0   : > { %v2512_v1 = vpop.f32.mrf.mxu3  ;;  %v767_v2 = vpop.f32.mrf.mxu1 }
  0xf1   : > { %1150 = vmatmul.f32.gmra.mxu0 %v344_v0  ;;  %v768_v11 = vadd.f32 %v767_v2, %v2383_v48  ;;  %v360_v48 = vld [vmem:[%s1986_s25 + $0x4d8] sm:$0xff]  ;;  %v609_v2 = vld [vmem:[%s2954_s1 + $0x3a0] sm:$0xff] }
  0xf2   : > { %1439 = vmatpush.msra.mxu3 %v609_v2 }
  0xf3   : > { %814 = vmatmul.f32.gmra.mxu1 %v350_v5  ;;  %927 = vmatmul.f32.gmra.mxu2 %v351_v6 }
  0xf5   : > { %1040 = vmatmul.f32.gmra.mxu3 %v352_v9  ;;  %v371_v9 = vld [vmem:[%s1986_s25 + $0x530] sm:$0xff] }
  0xf6   : > { %v880_v15 = vpop.f32.mrf.mxu2  ;;  %v1106_v18 = vpop.f32.mrf.mxu0 }
  0xf7   : > { %v881_v20 = vadd.f32 %v880_v15, %v768_v11  ;;  %v577_v11 = vld [vmem:[%s2954_s1 + $0x2a0] sm:$0xff] }
  0xf8   : > { %v770_v22 = vpop.f32.mrf.mxu1  ;;  %v993_v25 = vpop.f32.mrf.mxu3  ;;  %1213 = vmatpush.msra.mxu1 %v577_v11 }
  0xf9   : > { %v994_v29 = vadd.f32 %v993_v25, %v881_v20  ;;  %1153 = vmatmul.f32.gmra.mxu0 %v353_v19  ;;  %v771_v32 = vadd.f32 %v770_v22, %v2401_v58  ;;  %v593_v58 = vld [vmem:[%s2954_s1 + $0x320] sm:$0xff]  ;;  %v379_v20 = vld [vmem:[%s1986_s25 + $0x570] sm:$0xff] }
  0xfa   : > { %1326 = vmatpush.msra.mxu2 %v593_v58  ;;  %v625_v25 = vld [vmem:[%s2954_s1 + $0x420] sm:$0xff] }
  0xfb   : > { %v2531_v31 = vadd.f32 %v1106_v18, %v994_v29  ;;  %817 = vmatmul.f32.gmra.mxu1 %v359_v26  ;;  %930 = vmatmul.f32.gmra.mxu2 %v360_v48  ;;  %v377_v18 = vld [vmem:[%s1986_s25 + $0x560] sm:$0xff]  ;;  %v380_v29 = vld [vmem:[%s1986_s25 + $0x578] sm:$0xff] }
  0xfc   : > { %1552 = vmatpush.msra.mxu0 %v625_v25 }
  0xfd   : > { %1043 = vmatmul.f32.gmra.mxu3 %v361_v30 }
  0xfe   : > { %v883_v38 = vpop.f32.mrf.mxu2  ;;  %v1109_v39 = vpop.f32.mrf.mxu0 }
  0xff   : > { %v884_v42 = vadd.f32 %v883_v38, %v771_v32  ;;  %v386_v38 = vld [vmem:[%s1986_s25 + $0x5a8] sm:$0xff] }
 0x100   : > { %v773_v43 = vpop.f32.mrf.mxu1  ;;  %v996_v46 = vpop.f32.mrf.mxu3 }
 0x101   : > { %v997_v55 = vadd.f32 %v996_v46, %v884_v42  ;;  %1156 = vmatmul.f32.gmra.mxu0 %v362_v40  ;;  %v774_v0 = vadd.f32 %v773_v43, %v2419_v4  ;;  %v378_v4 = vld [vmem:[%s1986_s25 + $0x568] sm:$0xff]  ;;  %v388_v42 = vld [vmem:[%s1986_s25 + $0x5b8] sm:$0xff] }
 0x103   : > { %v2541_v59 = vadd.f32 %v1109_v39, %v997_v55  ;;  %820 = vmatmul.f32.gmra.mxu1 %v368_v49  ;;  %933 = vmatmul.f32.gmra.mxu2 %v369_v54  ;;  %v387_v39 = vld [vmem:[%s1986_s25 + $0x5b0] sm:$0xff]  ;;  %v608_v49 = vld [vmem:[%s2954_s1 + $0x398] sm:$0xff] }
 0x104   : > { %1440 = vmatpush.msra.mxu3 %v608_v49 }
 0x105   : > { %1046 = vmatmul.f32.gmra.mxu3 %v370_v56  ;;  %v389_v56 = vld [vmem:[%s1986_s25 + $0x5c0] sm:$0xff] }
 0x106   : > { %v886_v5 = vpop.f32.mrf.mxu2  ;;  %v1112_v6 = vpop.f32.mrf.mxu0 }
 0x107   : > { %v887_v10 = vadd.f32 %v886_v5, %v774_v0  ;;  %v576_v0 = vld [vmem:[%s2954_s1 + $0x298] sm:$0xff] }
 0x108   : > { %v776_v12 = vpop.f32.mrf.mxu1  ;;  %v999_v15 = vpop.f32.mrf.mxu3  ;;  %1214 = vmatpush.msra.mxu1 %v576_v0 }
 0x109   : > { %v1000_v19 = vadd.f32 %v999_v15, %v887_v10  ;;  %1159 = vmatmul.f32.gmra.mxu0 %v371_v9  ;;  %v777_v22 = vadd.f32 %v776_v12, %v2437_v14  ;;  %v592_v14 = vld [vmem:[%s2954_s1 + $0x318] sm:$0xff]  ;;  %v397_v10 = vld [vmem:[%s1986_s25 + $0x600] sm:$0xff] }
 0x10a   : > { %1327 = vmatpush.msra.mxu2 %v592_v14  ;;  %v624_v15 = vld [vmem:[%s2954_s1 + $0x418] sm:$0xff] }
 0x10b   : > { %v2557_v21 = vadd.f32 %v1112_v6, %v1000_v19  ;;  %823 = vmatmul.f32.gmra.mxu1 %v377_v18  ;;  %936 = vmatmul.f32.gmra.mxu2 %v378_v4  ;;  %v395_v6 = vld [vmem:[%s1986_s25 + $0x5f0] sm:$0xff]  ;;  %v398_v19 = vld [vmem:[%s1986_s25 + $0x608] sm:$0xff] }
 0x10c   : > { %1553 = vmatpush.msra.mxu0 %v624_v15 }
 0x10d   : > { %1049 = vmatmul.f32.gmra.mxu3 %v379_v20 }
 0x10e   : > { %v889_v26 = vpop.f32.mrf.mxu2  ;;  %v1115_v48 = vpop.f32.mrf.mxu0 }
 0x10f   : > { %v890_v30 = vadd.f32 %v889_v26, %v777_v22  ;;  %v404_v26 = vld [vmem:[%s1986_s25 + $0x638] sm:$0xff] }
 0x110   : > { %v779_v32 = vpop.f32.mrf.mxu1  ;;  %v1002_v35 = vpop.f32.mrf.mxu3 }
 0x111   : > { %v1003_v40 = vadd.f32 %v1002_v35, %v890_v30  ;;  %1162 = vmatmul.f32.gmra.mxu0 %v380_v29  ;;  %v780_v46 = vadd.f32 %v779_v32, %v2455_v24  ;;  %v396_v24 = vld [vmem:[%s1986_s25 + $0x5f8] sm:$0xff]  ;;  %v406_v30 = vld [vmem:[%s1986_s25 + $0x648] sm:$0xff] }
 0x113   : > { %v2567_v43 = vadd.f32 %v1115_v48, %v1003_v40  ;;  %826 = vmatmul.f32.gmra.mxu1 %v386_v38  ;;  %939 = vmatmul.f32.gmra.mxu2 %v387_v39  ;;  %v405_v48 = vld [vmem:[%s1986_s25 + $0x640] sm:$0xff]  ;;  %v607_v38 = vld [vmem:[%s2954_s1 + $0x390] sm:$0xff] }
 0x114   : > { %1441 = vmatpush.msra.mxu3 %v607_v38 }
 0x115   : > { %1052 = vmatmul.f32.gmra.mxu3 %v388_v42  ;;  %v407_v42 = vld [vmem:[%s1986_s25 + $0x650] sm:$0xff] }
 0x116   : > { %v892_v54 = vpop.f32.mrf.mxu2  ;;  %v1118_v55 = vpop.f32.mrf.mxu0 }
 0x117   : > { %v893_v58 = vadd.f32 %v892_v54, %v780_v46  ;;  %v575_v46 = vld [vmem:[%s2954_s1 + $0x290] sm:$0xff] }
 0x118   : > { %v782_v2 = vpop.f32.mrf.mxu1  ;;  %v1005_v5 = vpop.f32.mrf.mxu3  ;;  %1215 = vmatpush.msra.mxu1 %v575_v46 }
 0x119   : > { %v1006_v9 = vadd.f32 %v1005_v5, %v893_v58  ;;  %1165 = vmatmul.f32.gmra.mxu0 %v389_v56  ;;  %v783_v12 = vadd.f32 %v782_v2, %v2473_v34  ;;  %v591_v34 = vld [vmem:[%s2954_s1 + $0x310] sm:$0xff] }
 0x11a   : > { %1328 = vmatpush.msra.mxu2 %v591_v34  ;;  %v415_v58 = vld [vmem:[%s1986_s25 + $0x690] sm:$0xff] }
 0x11b   : > { %v2583_v11 = vadd.f32 %v1118_v55, %v1006_v9  ;;  %829 = vmatmul.f32.gmra.mxu1 %v395_v6  ;;  %942 = vmatmul.f32.gmra.mxu2 %v396_v24  ;;  %v413_v55 = vld [vmem:[%s1986_s25 + $0x680] sm:$0xff]  ;;  %v623_v5 = vld [vmem:[%s2954_s1 + $0x410] sm:$0xff]  ;;  %v416_v9 = vld [vmem:[%s1986_s25 + $0x698] sm:$0xff] }
 0x11c   : > { %1554 = vmatpush.msra.mxu0 %v623_v5 }
 0x11d   : > { %1055 = vmatmul.f32.gmra.mxu3 %v397_v10 }
 0x11e   : > { %v895_v18 = vpop.f32.mrf.mxu2  ;;  %v1121_v4 = vpop.f32.mrf.mxu0 }
 0x11f   : > { %v896_v20 = vadd.f32 %v895_v18, %v783_v12  ;;  %v422_v18 = vld [vmem:[%s1986_s25 + $0x6c8] sm:$0xff] }
 0x120   : > { %v785_v22 = vpop.f32.mrf.mxu1  ;;  %v1008_v25 = vpop.f32.mrf.mxu3 }
 0x121   : > { %v1009_v29 = vadd.f32 %v1008_v25, %v896_v20  ;;  %1168 = vmatmul.f32.gmra.mxu0 %v398_v19  ;;  %v786_v35 = vadd.f32 %v785_v22, %v2491_v45  ;;  %v414_v45 = vld [vmem:[%s1986_s25 + $0x688] sm:$0xff]  ;;  %v424_v20 = vld [vmem:[%s1986_s25 + $0x6d8] sm:$0xff] }
 0x123   : > { %v2593_v32 = vadd.f32 %v1121_v4, %v1009_v29  ;;  %832 = vmatmul.f32.gmra.mxu1 %v404_v26  ;;  %945 = vmatmul.f32.gmra.mxu2 %v405_v48  ;;  %v423_v4 = vld [vmem:[%s1986_s25 + $0x6d0] sm:$0xff]  ;;  %v606_v26 = vld [vmem:[%s2954_s1 + $0x388] sm:$0xff] }
 0x124   : > { %1442 = vmatpush.msra.mxu3 %v606_v26 }
 0x125   : > { %1058 = vmatmul.f32.gmra.mxu3 %v406_v30  ;;  %v425_v30 = vld [vmem:[%s1986_s25 + $0x6e0] sm:$0xff] }
 0x126   : > { %v898_v39 = vpop.f32.mrf.mxu2  ;;  %v1124_v40 = vpop.f32.mrf.mxu0 }
 0x127   : > { %v899_v14 = vadd.f32 %v898_v39, %v786_v35  ;;  %v574_v35 = vld [vmem:[%s2954_s1 + $0x288] sm:$0xff] }
 0x128   : > { %v788_v49 = vpop.f32.mrf.mxu1  ;;  %v1011_v54 = vpop.f32.mrf.mxu3  ;;  %1216 = vmatpush.msra.mxu1 %v574_v35 }
 0x129   : > { %v1012_v56 = vadd.f32 %v1011_v54, %v899_v14  ;;  %1171 = vmatmul.f32.gmra.mxu0 %v407_v42  ;;  %v789_v2 = vadd.f32 %v788_v49, %v2509_v63  ;;  %v590_v63 = vld [vmem:[%s2954_s1 + $0x308] sm:$0xff]  ;;  %v433_v14 = vld [vmem:[%s1986_s25 + $0x720] sm:$0xff] }
 0x12a   : > { %1329 = vmatpush.msra.mxu2 %v590_v63  ;;  %v622_v54 = vld [vmem:[%s2954_s1 + $0x408] sm:$0xff] }
 0x12b   : > { %v2609_v0 = vadd.f32 %v1124_v40, %v1012_v56  ;;  %835 = vmatmul.f32.gmra.mxu1 %v413_v55  ;;  %948 = vmatmul.f32.gmra.mxu2 %v414_v45  ;;  %v431_v40 = vld [vmem:[%s1986_s25 + $0x710] sm:$0xff]  ;;  %v434_v56 = vld [vmem:[%s1986_s25 + $0x728] sm:$0xff] }
 0x12c   : > { %1555 = vmatpush.msra.mxu0 %v622_v54 }
 0x12d   : > { %1061 = vmatmul.f32.gmra.mxu3 %v415_v58 }
 0x12e   : > { %v901_v6 = vpop.f32.mrf.mxu2  ;;  %v1127_v24 = vpop.f32.mrf.mxu0 }
 0x12f   : > { %v902_v10 = vadd.f32 %v901_v6, %v789_v2  ;;  %v440_v6 = vld [vmem:[%s1986_s25 + $0x758] sm:$0xff] }
 0x130   : > { %v791_v12 = vpop.f32.mrf.mxu1  ;;  %v1014_v15 = vpop.f32.mrf.mxu3 }
 0x131   : > { %v1015_v19 = vadd.f32 %v1014_v15, %v902_v10  ;;  %1174 = vmatmul.f32.gmra.mxu0 %v416_v9  ;;  %v792_v25 = vadd.f32 %v791_v12, %v2370_v41  ;;  %v432_v41 = vld [vmem:[%s1986_s25 + $0x718] sm:$0xff]  ;;  %v442_v10 = vld [vmem:[%s1986_s25 + $0x768] sm:$0xff] }
 0x133   : > { %v2619_v22 = vadd.f32 %v1127_v24, %v1015_v19  ;;  %838 = vmatmul.f32.gmra.mxu1 %v422_v18  ;;  %951 = vmatmul.f32.gmra.mxu2 %v423_v4  ;;  %v441_v24 = vld [vmem:[%s1986_s25 + $0x760] sm:$0xff] }
 0x134   : > { %v605_v18 = vld [vmem:[%s2954_s1 + $0x380] sm:$0xff] }
 0x135   : > { %1064 = vmatmul.f32.gmra.mxu3 %v424_v20  ;;  %v443_v20 = vld [vmem:[%s1986_s25 + $0x770] sm:$0xff] }
 0x136   : > { %v904_v48 = vpop.f32.mrf.mxu2  ;;  %v1130_v29 = vpop.f32.mrf.mxu0  ;;  %1443 = vmatpush.msra.mxu3 %v605_v18  ;;  %v468_v18 = vld [vmem:[%s1986_s25 + $0x838] sm:$0xff] }
 0x137   : > { %v905_v34 = vadd.f32 %v904_v48, %v792_v25  ;;  %v573_v25 = vld [vmem:[%s2954_s1 + $0x280] sm:$0xff] }
 0x138   : > { %v794_v38 = vpop.f32.mrf.mxu1  ;;  %v1017_v39 = vpop.f32.mrf.mxu3  ;;  %1217 = vmatpush.msra.mxu1 %v573_v25 }
 0x139   : > { %v1018_v42 = vadd.f32 %v1017_v39, %v905_v34  ;;  %1177 = vmatmul.f32.gmra.mxu0 %v425_v30  ;;  %v795_v49 = vadd.f32 %v794_v38, %v2389_v51  ;;  %v589_v51 = vld [vmem:[%s2954_s1 + $0x300] sm:$0xff]  ;;  %v451_v34 = vld [vmem:[%s1986_s25 + $0x7b0] sm:$0xff] }
 0x13a   : > { %1330 = vmatpush.msra.mxu2 %v589_v51  ;;  %v621_v39 = vld [vmem:[%s2954_s1 + $0x400] sm:$0xff] }
 0x13b   : > { %v2635_v46 = vadd.f32 %v1130_v29, %v1018_v42  ;;  %841 = vmatmul.f32.gmra.mxu1 %v431_v40  ;;  %954 = vmatmul.f32.gmra.mxu2 %v432_v41  ;;  %v449_v29 = vld [vmem:[%s1986_s25 + $0x7a0] sm:$0xff]  ;;  %v452_v42 = vld [vmem:[%s1986_s25 + $0x7b8] sm:$0xff] }
 0x13c   : > { %1556 = vmatpush.msra.mxu0 %v621_v39  ;;  %v478_v39 = vld [vmem:[%s1986_s25 + $0x888] sm:$0xff] }
 0x13d   : > { %1067 = vmatmul.f32.gmra.mxu3 %v433_v14 }
 0x13e   : > { %v907_v55 = vpop.f32.mrf.mxu2  ;;  %v1133_v45 = vpop.f32.mrf.mxu0 }
 0x13f   : > { %v908_v58 = vadd.f32 %v907_v55, %v795_v49  ;;  %v458_v55 = vld [vmem:[%s1986_s25 + $0x7e8] sm:$0xff] }
 0x140   : > { %v797_v2 = vpop.f32.mrf.mxu1  ;;  %v1020_v5 = vpop.f32.mrf.mxu3 }
 0x141   : > { %v1021_v9 = vadd.f32 %v1020_v5, %v908_v58  ;;  %1180 = vmatmul.f32.gmra.mxu0 %v434_v56  ;;  %v798_v15 = vadd.f32 %v797_v2, %v2404_v60  ;;  %v450_v60 = vld [vmem:[%s1986_s25 + $0x7a8] sm:$0xff] }
 0x143   : > { %v2645_v12 = vadd.f32 %v1133_v45, %v1021_v9  ;;  %844 = vmatmul.f32.gmra.mxu1 %v440_v6  ;;  %957 = vmatmul.f32.gmra.mxu2 %v441_v24  ;;  %v459_v45 = vld [vmem:[%s1986_s25 + $0x7f0] sm:$0xff]  ;;  %v461_v24 = vld [vmem:[%s1986_s25 + $0x800] sm:$0xff] }
 0x145   : > { %1070 = vmatmul.f32.gmra.mxu3 %v442_v10 }
 0x146   : > { %v910_v4 = vpop.f32.mrf.mxu2  ;;  %v1136_v19 = vpop.f32.mrf.mxu0 }
 0x147   : > { %v911_v63 = vadd.f32 %v910_v4, %v798_v15  ;;  %v467_v15 = vld [vmem:[%s1986_s25 + $0x830] sm:$0xff] }
 0x148   : > { %v800_v26 = vpop.f32.mrf.mxu1  ;;  %v1023_v48 = vpop.f32.mrf.mxu3 }
 0x149   : > { %v1024_v30 = vadd.f32 %v1023_v48, %v911_v63  ;;  %1183 = vmatmul.f32.gmra.mxu0 %v443_v20  ;;  %v801_v38 = vadd.f32 %v800_v26, %v2425_v7  ;;  %v460_v7 = vld [vmem:[%s1986_s25 + $0x7f8] sm:$0xff]  ;;  %v470_v26 = vld [vmem:[%s1986_s25 + $0x848] sm:$0xff] }
 0x14b   : > { %v2661_v35 = vadd.f32 %v1136_v19, %v1024_v30  ;;  %847 = vmatmul.f32.gmra.mxu1 %v449_v29  ;;  %960 = vmatmul.f32.gmra.mxu2 %v450_v60  ;;  %v469_v19 = vld [vmem:[%s1986_s25 + $0x840] sm:$0xff]  ;;  %v476_v30 = vld [vmem:[%s1986_s25 + $0x878] sm:$0xff] }
 0x14d   : > { %1073 = vmatmul.f32.gmra.mxu3 %v451_v34  ;;  %v477_v34 = vld [vmem:[%s1986_s25 + $0x880] sm:$0xff] }
 0x14e   : > { %v913_v40 = vpop.f32.mrf.mxu2  ;;  %v1139_v41 = vpop.f32.mrf.mxu0 }
 0x14f   : > { %v914_v14 = vadd.f32 %v913_v40, %v801_v38 }
 0x150   : > { %v803_v49 = vpop.f32.mrf.mxu1  ;;  %v1026_v54 = vpop.f32.mrf.mxu3 }
 0x151   : > { %v1027_v56 = vadd.f32 %v1026_v54, %v914_v14  ;;  %1186 = vmatmul.f32.gmra.mxu0 %v452_v42  ;;  %v804_v2 = vadd.f32 %v803_v49, %v2440_v16  ;;  %v479_v14 = vld [vmem:[%s1986_s25 + $0x890] sm:$0xff] }
 0x153   : > { %v2671_v58 = vadd.f32 %v1139_v41, %v1027_v56  ;;  %850 = vmatmul.f32.gmra.mxu1 %v458_v55  ;;  %963 = vmatmul.f32.gmra.mxu2 %v459_v45  ;;  %v485_v45 = vld [vmem:[%s1986_s25 + $0x8c0] sm:$0xff]  ;;  %v486_v56 = vld [vmem:[%s1986_s25 + $0x8c8] sm:$0xff] }
 0x155   : > { %1076 = vmatmul.f32.gmra.mxu3 %v460_v7 }
 0x156   : > { %v916_v5 = vpop.f32.mrf.mxu2  ;;  %v1142_v6 = vpop.f32.mrf.mxu0 }
 0x157   : > { %v917_v9 = vadd.f32 %v916_v5, %v804_v2  ;;  %v487_v2 = vld [vmem:[%s1986_s25 + $0x8d0] sm:$0xff] }
 0x158   : > { %v806_v10 = vpop.f32.mrf.mxu1  ;;  %v1029_v51 = vpop.f32.mrf.mxu3 }
 0x159   : > { %v1030_v4 = vadd.f32 %v1029_v51, %v917_v9  ;;  %1189 = vmatmul.f32.gmra.mxu0 %v461_v24  ;;  %v807_v16 = vadd.f32 %v806_v10, %v2461_v27  ;;  %v488_v9 = vld [vmem:[%s1986_s25 + $0x8d8] sm:$0xff] }
 0x15b   : > { %v2678_v20 = vadd.f32 %v1142_v6, %v1030_v4  ;;  %853 = vmatmul.f32.gmra.mxu1 %v467_v15  ;;  %966 = vmatmul.f32.gmra.mxu2 %v468_v18  ;;  %v210_v18 = vld [vmem:[%s1986_s25 + $0x28] sm:$0xff]  ;;  %v211_v4 = vld [vmem:[%s1986_s25 + $0x30] sm:$0xff] }
 0x15d   : > { %1079 = vmatmul.f32.gmra.mxu3 %v469_v19 }
 0x15e   : > { %v919_v63 = vpop.f32.mrf.mxu2  ;;  %v1145_v25 = vpop.f32.mrf.mxu0 }
 0x15f   : > { %v920_v48 = vadd.f32 %v919_v63, %v807_v16  ;;  %v212_v16 = vld [vmem:[%s1986_s25 + $0x38] sm:$0xff] }
 0x160   : > { %v809_v29 = vpop.f32.mrf.mxu1  ;;  %v1032_v60 = vpop.f32.mrf.mxu3 }
 0x161   : > { %v1033_v38 = vadd.f32 %v1032_v60, %v920_v48  ;;  %1192 = vmatmul.f32.gmra.mxu0 %v470_v26  ;;  %v810_v27 = vadd.f32 %v809_v29, %v2476_v36  ;;  %v213_v48 = vld [vmem:[%s1986_s25 + $0x40] sm:$0xff] }
 0x163   : > { %v2685_v40 = vadd.f32 %v1145_v25, %v1033_v38  ;;  %856 = vmatmul.f32.gmra.mxu1 %v476_v30  ;;  %969 = vmatmul.f32.gmra.mxu2 %v477_v34  ;;  %v219_v34 = vld [vmem:[%s1986_s25 + $0x70] sm:$0xff]  ;;  %v220_v38 = vld [vmem:[%s1986_s25 + $0x78] sm:$0xff] }
 0x165   : > { %1082 = vmatmul.f32.gmra.mxu3 %v478_v39 }
 0x166   : > { %v922_v41 = vpop.f32.mrf.mxu2  ;;  %v1148_v42 = vpop.f32.mrf.mxu0 }
 0x167   : > { %v923_v49 = vadd.f32 %v922_v41, %v810_v27  ;;  %v221_v27 = vld [vmem:[%s1986_s25 + $0x80] sm:$0xff] }
 0x168   : > { %v812_v54 = vpop.f32.mrf.mxu1  ;;  %v1035_v55 = vpop.f32.mrf.mxu3 }
 0x169   : > { %v1036_v7 = vadd.f32 %v1035_v55, %v923_v49  ;;  %1195 = vmatmul.f32.gmra.mxu0 %v479_v14  ;;  %v813_v36 = vadd.f32 %v812_v54, %v2497_v50  ;;  %v222_v49 = vld [vmem:[%s1986_s25 + $0x88] sm:$0xff] }
 0x16b   : > { %v2692_v5 = vadd.f32 %v1148_v42, %v1036_v7  ;;  %859 = vmatmul.f32.gmra.mxu1 %v485_v45  ;;  %972 = vmatmul.f32.gmra.mxu2 %v486_v56  ;;  %v228_v56 = vld [vmem:[%s1986_s25 + $0xb8] sm:$0xff]  ;;  %v229_v7 = vld [vmem:[%s1986_s25 + $0xc0] sm:$0xff] }
 0x16d   : > { %1085 = vmatmul.f32.gmra.mxu3 %v487_v2 }
 0x16e   : > { %v925_v6 = vpop.f32.mrf.mxu2  ;;  %v1151_v24 = vpop.f32.mrf.mxu0 }
 0x16f   : > { %v926_v10 = vadd.f32 %v925_v6, %v813_v36  ;;  %v230_v36 = vld [vmem:[%s1986_s25 + $0xc8] sm:$0xff] }
 0x170   : > { %v815_v51 = vpop.f32.mrf.mxu1  ;;  %v1038_v15 = vpop.f32.mrf.mxu3 }
 0x171   : > { %v1039_v19 = vadd.f32 %v1038_v15, %v926_v10  ;;  %1198 = vmatmul.f32.gmra.mxu0 %v488_v9  ;;  %v816_v50 = vadd.f32 %v815_v51, %v2381_v47  ;;  %v231_v10 = vld [vmem:[%s1986_s25 + $0xd0] sm:$0xff] }
 0x173   : > { %v2699_v63 = vadd.f32 %v1151_v24, %v1039_v19  ;;  %1218 = vmatmul.f32.vlgmr.msra.gmra.mxu1 %v210_v18  ;;  %1331 = vmatmul.f32.vlgmr.msra.gmra.mxu2 %v211_v4  ;;  %v237_v4 = vld [vmem:[%s1986_s25 + $0x100] sm:$0xff]  ;;  %v238_v19 = vld [vmem:[%s1986_s25 + $0x108] sm:$0xff] }
 0x175   : > { %1444 = vmatmul.f32.vlgmr.msra.gmra.mxu3 %v212_v16 }
 0x176   : > { %v928_v25 = vpop.f32.mrf.mxu2  ;;  %v1154_v26 = vpop.f32.mrf.mxu0 }
 0x177   : > { %v929_v29 = vadd.f32 %v928_v25, %v816_v50  ;;  %v239_v50 = vld [vmem:[%s1986_s25 + $0x110] sm:$0xff] }
 0x178   : > { %v818_v60 = vpop.f32.mrf.mxu1  ;;  %v1041_v30 = vpop.f32.mrf.mxu3 }
 0x179   : > { %v1042_v39 = vadd.f32 %v1041_v30, %v929_v29  ;;  %1557 = vmatmul.f32.vlgmr.msra.gmra.mxu0 %v213_v48  ;;  %v819_v47 = vadd.f32 %v818_v60, %v2399_v57  ;;  %v240_v29 = vld [vmem:[%s1986_s25 + $0x118] sm:$0xff] }
 0x17b   : > { %v2706_v41 = vadd.f32 %v1154_v26, %v1042_v39  ;;  %1221 = vmatmul.f32.gmra.mxu1 %v219_v34  ;;  %1334 = vmatmul.f32.gmra.mxu2 %v220_v38  ;;  %v246_v38 = vld [vmem:[%s1986_s25 + $0x148] sm:$0xff]  ;;  %v247_v39 = vld [vmem:[%s1986_s25 + $0x150] sm:$0xff] }
 0x17d   : > { %1447 = vmatmul.f32.gmra.mxu3 %v221_v27 }
 0x17e   : > { %v931_v42 = vpop.f32.mrf.mxu2  ;;  %v1157_v14 = vpop.f32.mrf.mxu0 }
 0x17f   : > { %v932_v54 = vadd.f32 %v931_v42, %v819_v47  ;;  %v248_v47 = vld [vmem:[%s1986_s25 + $0x158] sm:$0xff] }
 0x180   : > { %v821_v55 = vpop.f32.mrf.mxu1  ;;  %v1044_v45 = vpop.f32.mrf.mxu3 }
 0x181   : > { %v1045_v2 = vadd.f32 %v1044_v45, %v932_v54  ;;  %1560 = vmatmul.f32.gmra.mxu0 %v222_v49  ;;  %v822_v57 = vadd.f32 %v821_v55, %v2417_v3  ;;  %v249_v54 = vld [vmem:[%s1986_s25 + $0x160] sm:$0xff] }
 0x183   : > { %v2713_v6 = vadd.f32 %v1157_v14, %v1045_v2  ;;  %1224 = vmatmul.f32.gmra.mxu1 %v228_v56  ;;  %1337 = vmatmul.f32.gmra.mxu2 %v229_v7  ;;  %v255_v7 = vld [vmem:[%s1986_s25 + $0x190] sm:$0xff]  ;;  %v256_v2 = vld [vmem:[%s1986_s25 + $0x198] sm:$0xff] }
 0x185   : > { %1450 = vmatmul.f32.gmra.mxu3 %v230_v36 }
 0x186   : > { %v934_v24 = vpop.f32.mrf.mxu2  ;;  %v1160_v9 = vpop.f32.mrf.mxu0 }
 0x187   : > { %v935_v51 = vadd.f32 %v934_v24, %v822_v57  ;;  %v257_v57 = vld [vmem:[%s1986_s25 + $0x1a0] sm:$0xff] }
 0x188   : > { %v824_v15 = vpop.f32.mrf.mxu1  ;;  %v1047_v18 = vpop.f32.mrf.mxu3 }
 0x189   : > { %v1048_v16 = vadd.f32 %v1047_v18, %v935_v51  ;;  %1563 = vmatmul.f32.gmra.mxu0 %v231_v10  ;;  %v825_v3 = vadd.f32 %v824_v15, %v2435_v13  ;;  %v258_v51 = vld [vmem:[%s1986_s25 + $0x1a8] sm:$0xff] }
 0x18b   : > { %v2720_v25 = vadd.f32 %v1160_v9, %v1048_v16  ;;  %1227 = vmatmul.f32.gmra.mxu1 %v237_v4  ;;  %1340 = vmatmul.f32.gmra.mxu2 %v238_v19  ;;  %v264_v19 = vld [vmem:[%s1986_s25 + $0x1d8] sm:$0xff]  ;;  %v265_v16 = vld [vmem:[%s1986_s25 + $0x1e0] sm:$0xff] }
 0x18d   : > { %1453 = vmatmul.f32.gmra.mxu3 %v239_v50 }
 0x18e   : > { %v937_v26 = vpop.f32.mrf.mxu2  ;;  %v1163_v48 = vpop.f32.mrf.mxu0 }
 0x18f   : > { %v938_v60 = vadd.f32 %v937_v26, %v825_v3  ;;  %v266_v3 = vld [vmem:[%s1986_s25 + $0x1e8] sm:$0xff] }
 0x190   : > { %v827_v30 = vpop.f32.mrf.mxu1  ;;  %v1050_v34 = vpop.f32.mrf.mxu3 }
 0x191   : > { %v1051_v27 = vadd.f32 %v1050_v34, %v938_v60  ;;  %1566 = vmatmul.f32.gmra.mxu0 %v240_v29  ;;  %v828_v13 = vadd.f32 %v827_v30, %v2453_v23  ;;  %v267_v60 = vld [vmem:[%s1986_s25 + $0x1f0] sm:$0xff] }
 0x193   : > { %v2727_v42 = vadd.f32 %v1163_v48, %v1051_v27  ;;  %1230 = vmatmul.f32.gmra.mxu1 %v246_v38  ;;  %1343 = vmatmul.f32.gmra.mxu2 %v247_v39  ;;  %v273_v39 = vld [vmem:[%s1986_s25 + $0x220] sm:$0xff]  ;;  %v274_v27 = vld [vmem:[%s1986_s25 + $0x228] sm:$0xff] }
 0x195   : > { %1456 = vmatmul.f32.gmra.mxu3 %v248_v47 }
 0x196   : > { %v940_v14 = vpop.f32.mrf.mxu2  ;;  %v1166_v49 = vpop.f32.mrf.mxu0 }
 0x197   : > { %v941_v55 = vadd.f32 %v940_v14, %v828_v13  ;;  %v275_v13 = vld [vmem:[%s1986_s25 + $0x230] sm:$0xff] }
 0x198   : > { %v830_v45 = vpop.f32.mrf.mxu1  ;;  %v1053_v56 = vpop.f32.mrf.mxu3 }
 0x199   : > { %v1054_v36 = vadd.f32 %v1053_v56, %v941_v55  ;;  %1569 = vmatmul.f32.gmra.mxu0 %v249_v54  ;;  %v831_v23 = vadd.f32 %v830_v45, %v2471_v33  ;;  %v276_v55 = vld [vmem:[%s1986_s25 + $0x238] sm:$0xff] }
 0x19b   : > { %v2734_v24 = vadd.f32 %v1166_v49, %v1054_v36  ;;  %1233 = vmatmul.f32.gmra.mxu1 %v255_v7  ;;  %1346 = vmatmul.f32.gmra.mxu2 %v256_v2  ;;  %v282_v2 = vld [vmem:[%s1986_s25 + $0x268] sm:$0xff]  ;;  %v283_v36 = vld [vmem:[%s1986_s25 + $0x270] sm:$0xff] }
 0x19d   : > { %1459 = vmatmul.f32.gmra.mxu3 %v257_v57 }
 0x19e   : > { %v943_v9 = vpop.f32.mrf.mxu2  ;;  %v1169_v10 = vpop.f32.mrf.mxu0 }
 0x19f   : > { %v944_v15 = vadd.f32 %v943_v9, %v831_v23  ;;  %v284_v23 = vld [vmem:[%s1986_s25 + $0x278] sm:$0xff] }
 0x1a0   : > { %v833_v18 = vpop.f32.mrf.mxu1  ;;  %v1056_v4 = vpop.f32.mrf.mxu3 }
 0x1a1   : > { %v1057_v50 = vadd.f32 %v1056_v4, %v944_v15  ;;  %1572 = vmatmul.f32.gmra.mxu0 %v258_v51  ;;  %v834_v33 = vadd.f32 %v833_v18, %v2489_v44  ;;  %v285_v15 = vld [vmem:[%s1986_s25 + $0x280] sm:$0xff] }
 0x1a3   : > { %v2741_v26 = vadd.f32 %v1169_v10, %v1057_v50  ;;  %1236 = vmatmul.f32.gmra.mxu1 %v264_v19  ;;  %1349 = vmatmul.f32.gmra.mxu2 %v265_v16  ;;  %v291_v16 = vld [vmem:[%s1986_s25 + $0x2b0] sm:$0xff]  ;;  %v292_v50 = vld [vmem:[%s1986_s25 + $0x2b8] sm:$0xff] }
 0x1a5   : > { %1462 = vmatmul.f32.gmra.mxu3 %v266_v3 }
 0x1a6   : > { %v946_v48 = vpop.f32.mrf.mxu2  ;;  %v1172_v29 = vpop.f32.mrf.mxu0 }
 0x1a7   : > { %v947_v30 = vadd.f32 %v946_v48, %v834_v33  ;;  %v293_v33 = vld [vmem:[%s1986_s25 + $0x2c0] sm:$0xff] }
 0x1a8   : > { %v836_v34 = vpop.f32.mrf.mxu1  ;;  %v1059_v38 = vpop.f32.mrf.mxu3 }
 0x1a9   : > { %v1060_v47 = vadd.f32 %v1059_v38, %v947_v30  ;;  %1575 = vmatmul.f32.gmra.mxu0 %v267_v60  ;;  %v837_v44 = vadd.f32 %v836_v34, %v2507_v62  ;;  %v294_v30 = vld [vmem:[%s1986_s25 + $0x2c8] sm:$0xff] }
 0x1ab   : > { %v2748_v14 = vadd.f32 %v1172_v29, %v1060_v47  ;;  %1239 = vmatmul.f32.gmra.mxu1 %v273_v39  ;;  %1352 = vmatmul.f32.gmra.mxu2 %v274_v27  ;;  %v300_v27 = vld [vmem:[%s1986_s25 + $0x2f8] sm:$0xff]  ;;  %v301_v47 = vld [vmem:[%s1986_s25 + $0x300] sm:$0xff] }
 0x1ad   : > { %1465 = vmatmul.f32.gmra.mxu3 %v275_v13 }
 0x1ae   : > { %v949_v49 = vpop.f32.mrf.mxu2  ;;  %v1175_v54 = vpop.f32.mrf.mxu0 }
 0x1af   : > { %v950_v45 = vadd.f32 %v949_v49, %v837_v44  ;;  %v302_v44 = vld [vmem:[%s1986_s25 + $0x308] sm:$0xff] }
 0x1b0   : > { %v839_v56 = vpop.f32.mrf.mxu1  ;;  %v1062_v7 = vpop.f32.mrf.mxu3 }
 0x1b1   : > { %v1063_v57 = vadd.f32 %v1062_v7, %v950_v45  ;;  %1578 = vmatmul.f32.gmra.mxu0 %v276_v55  ;;  %v840_v62 = vadd.f32 %v839_v56, %v2391_v52  ;;  %v303_v45 = vld [vmem:[%s1986_s25 + $0x310] sm:$0xff] }
 0x1b3   : > { %v2755_v9 = vadd.f32 %v1175_v54, %v1063_v57  ;;  %1242 = vmatmul.f32.gmra.mxu1 %v282_v2  ;;  %1355 = vmatmul.f32.gmra.mxu2 %v283_v36  ;;  %v309_v36 = vld [vmem:[%s1986_s25 + $0x340] sm:$0xff]  ;;  %v310_v57 = vld [vmem:[%s1986_s25 + $0x348] sm:$0xff] }
 0x1b5   : > { %1468 = vmatmul.f32.gmra.mxu3 %v284_v23 }
 0x1b6   : > { %v952_v10 = vpop.f32.mrf.mxu2  ;;  %v1178_v51 = vpop.f32.mrf.mxu0 }
 0x1b7   : > { %v953_v18 = vadd.f32 %v952_v10, %v840_v62  ;;  %v311_v62 = vld [vmem:[%s1986_s25 + $0x350] sm:$0xff] }
 0x1b8   : > { %v842_v4 = vpop.f32.mrf.mxu1  ;;  %v1065_v19 = vpop.f32.mrf.mxu3 }
 0x1b9   : > { %v1066_v3 = vadd.f32 %v1065_v19, %v953_v18  ;;  %1581 = vmatmul.f32.gmra.mxu0 %v285_v15  ;;  %v843_v52 = vadd.f32 %v842_v4, %v2406_v61  ;;  %v312_v18 = vld [vmem:[%s1986_s25 + $0x358] sm:$0xff] }
 0x1bb   : > { %v2762_v48 = vadd.f32 %v1178_v51, %v1066_v3  ;;  %1245 = vmatmul.f32.gmra.mxu1 %v291_v16  ;;  %1358 = vmatmul.f32.gmra.mxu2 %v292_v50  ;;  %v318_v50 = vld [vmem:[%s1986_s25 + $0x388] sm:$0xff]  ;;  %v319_v3 = vld [vmem:[%s1986_s25 + $0x390] sm:$0xff] }
 0x1bd   : > { %1471 = vmatmul.f32.gmra.mxu3 %v293_v33 }
 0x1be   : > { %v955_v29 = vpop.f32.mrf.mxu2  ;;  %v1181_v60 = vpop.f32.mrf.mxu0 }
 0x1bf   : > { %v956_v34 = vadd.f32 %v955_v29, %v843_v52  ;;  %v320_v52 = vld [vmem:[%s1986_s25 + $0x398] sm:$0xff] }
 0x1c0   : > { %v845_v38 = vpop.f32.mrf.mxu1  ;;  %v1068_v39 = vpop.f32.mrf.mxu3 }
 0x1c1   : > { %v1069_v13 = vadd.f32 %v1068_v39, %v956_v34  ;;  %1584 = vmatmul.f32.gmra.mxu0 %v294_v30  ;;  %v846_v61 = vadd.f32 %v845_v38, %v2427_v8  ;;  %v321_v34 = vld [vmem:[%s1986_s25 + $0x3a0] sm:$0xff] }
 0x1c3   : > { %v2769_v49 = vadd.f32 %v1181_v60, %v1069_v13  ;;  %1248 = vmatmul.f32.gmra.mxu1 %v300_v27  ;;  %1361 = vmatmul.f32.gmra.mxu2 %v301_v47  ;;  %v327_v47 = vld [vmem:[%s1986_s25 + $0x3d0] sm:$0xff]  ;;  %v328_v13 = vld [vmem:[%s1986_s25 + $0x3d8] sm:$0xff] }
 0x1c5   : > { %1474 = vmatmul.f32.gmra.mxu3 %v302_v44 }
 0x1c6   : > { %v958_v54 = vpop.f32.mrf.mxu2  ;;  %v1184_v55 = vpop.f32.mrf.mxu0 }
 0x1c7   : > { %v959_v56 = vadd.f32 %v958_v54, %v846_v61  ;;  %v329_v61 = vld [vmem:[%s1986_s25 + $0x3e0] sm:$0xff] }
 0x1c8   : > { %v848_v7 = vpop.f32.mrf.mxu1  ;;  %v1071_v2 = vpop.f32.mrf.mxu3 }
 0x1c9   : > { %v1072_v23 = vadd.f32 %v1071_v2, %v959_v56  ;;  %1587 = vmatmul.f32.gmra.mxu0 %v303_v45  ;;  %v849_v8 = vadd.f32 %v848_v7, %v2442_v17  ;;  %v330_v56 = vld [vmem:[%s1986_s25 + $0x3e8] sm:$0xff] }
 0x1cb   : > { %v2776_v10 = vadd.f32 %v1184_v55, %v1072_v23  ;;  %1251 = vmatmul.f32.gmra.mxu1 %v309_v36  ;;  %1364 = vmatmul.f32.gmra.mxu2 %v310_v57  ;;  %v336_v57 = vld [vmem:[%s1986_s25 + $0x418] sm:$0xff]  ;;  %v337_v23 = vld [vmem:[%s1986_s25 + $0x420] sm:$0xff] }
 0x1cd   : > { %1477 = vmatmul.f32.gmra.mxu3 %v311_v62 }
 0x1ce   : > { %v961_v51 = vpop.f32.mrf.mxu2  ;;  %v1187_v15 = vpop.f32.mrf.mxu0 }
 0x1cf   : > { %v962_v4 = vadd.f32 %v961_v51, %v849_v8  ;;  %v338_v8 = vld [vmem:[%s1986_s25 + $0x428] sm:$0xff] }
 0x1d0   : > { %v851_v19 = vpop.f32.mrf.mxu1  ;;  %v1074_v16 = vpop.f32.mrf.mxu3 }
 0x1d1   : > { %v1075_v33 = vadd.f32 %v1074_v16, %v962_v4  ;;  %1590 = vmatmul.f32.gmra.mxu0 %v312_v18  ;;  %v852_v17 = vadd.f32 %v851_v19, %v2463_v28  ;;  %v339_v4 = vld [vmem:[%s1986_s25 + $0x430] sm:$0xff] }
 0x1d3   : > { %v2783_v29 = vadd.f32 %v1187_v15, %v1075_v33  ;;  %1254 = vmatmul.f32.gmra.mxu1 %v318_v50  ;;  %1367 = vmatmul.f32.gmra.mxu2 %v319_v3  ;;  %v345_v3 = vld [vmem:[%s1986_s25 + $0x460] sm:$0xff]  ;;  %v346_v33 = vld [vmem:[%s1986_s25 + $0x468] sm:$0xff] }
 0x1d5   : > { %1480 = vmatmul.f32.gmra.mxu3 %v320_v52 }
 0x1d6   : > { %v964_v60 = vpop.f32.mrf.mxu2  ;;  %v1190_v30 = vpop.f32.mrf.mxu0 }
 0x1d7   : > { %v965_v38 = vadd.f32 %v964_v60, %v852_v17  ;;  %v347_v17 = vld [vmem:[%s1986_s25 + $0x470] sm:$0xff] }
 0x1d8   : > { %v854_v39 = vpop.f32.mrf.mxu1  ;;  %v1077_v27 = vpop.f32.mrf.mxu3 }
 0x1d9   : > { %v1078_v44 = vadd.f32 %v1077_v27, %v965_v38  ;;  %1593 = vmatmul.f32.gmra.mxu0 %v321_v34  ;;  %v855_v28 = vadd.f32 %v854_v39, %v2478_v37  ;;  %v348_v38 = vld [vmem:[%s1986_s25 + $0x478] sm:$0xff] }
 0x1db   : > { %v2790_v54 = vadd.f32 %v1190_v30, %v1078_v44  ;;  %1257 = vmatmul.f32.gmra.mxu1 %v327_v47  ;;  %1370 = vmatmul.f32.gmra.mxu2 %v328_v13  ;;  %v354_v13 = vld [vmem:[%s1986_s25 + $0x4a8] sm:$0xff]  ;;  %v355_v44 = vld [vmem:[%s1986_s25 + $0x4b0] sm:$0xff] }
 0x1dd   : > { %1483 = vmatmul.f32.gmra.mxu3 %v329_v61 }
 0x1de   : > { %v967_v55 = vpop.f32.mrf.mxu2  ;;  %v1193_v45 = vpop.f32.mrf.mxu0 }
 0x1df   : > { %v968_v7 = vadd.f32 %v967_v55, %v855_v28  ;;  %v356_v28 = vld [vmem:[%s1986_s25 + $0x4b8] sm:$0xff] }
 0x1e0   : > { %v857_v2 = vpop.f32.mrf.mxu1  ;;  %v1080_v36 = vpop.f32.mrf.mxu3 }
 0x1e1   : > { %v1081_v62 = vadd.f32 %v1080_v36, %v968_v7  ;;  %1596 = vmatmul.f32.gmra.mxu0 %v330_v56  ;;  %v858_v37 = vadd.f32 %v857_v2, %v2499_v53  ;;  %v357_v7 = vld [vmem:[%s1986_s25 + $0x4c0] sm:$0xff] }
 0x1e3   : > { %v2797_v51 = vadd.f32 %v1193_v45, %v1081_v62  ;;  %1260 = vmatmul.f32.gmra.mxu1 %v336_v57  ;;  %1373 = vmatmul.f32.gmra.mxu2 %v337_v23  ;;  %v363_v23 = vld [vmem:[%s1986_s25 + $0x4f0] sm:$0xff]  ;;  %v364_v62 = vld [vmem:[%s1986_s25 + $0x4f8] sm:$0xff] }
 0x1e5   : > { %1486 = vmatmul.f32.gmra.mxu3 %v338_v8 }
 0x1e6   : > { %v970_v15 = vpop.f32.mrf.mxu2  ;;  %v1196_v18 = vpop.f32.mrf.mxu0 }
 0x1e7   : > { %v971_v19 = vadd.f32 %v970_v15, %v858_v37  ;;  %v365_v37 = vld [vmem:[%s1986_s25 + $0x500] sm:$0xff] }
 0x1e8   : > { %v860_v16 = vpop.f32.mrf.mxu1  ;;  %v1083_v50 = vpop.f32.mrf.mxu3 }
 0x1e9   : > { %v1084_v52 = vadd.f32 %v1083_v50, %v971_v19  ;;  %1599 = vmatmul.f32.gmra.mxu0 %v339_v4  ;;  %v861_v53 = vadd.f32 %v860_v16, %v2512_v1  ;;  %v366_v19 = vld [vmem:[%s1986_s25 + $0x508] sm:$0xff] }
 0x1eb   : > { %v2804_v60 = vadd.f32 %v1196_v18, %v1084_v52  ;;  %1263 = vmatmul.f32.gmra.mxu1 %v345_v3  ;;  %1376 = vmatmul.f32.gmra.mxu2 %v346_v33  ;;  %v372_v33 = vld [vmem:[%s1986_s25 + $0x538] sm:$0xff]  ;;  %v373_v52 = vld [vmem:[%s1986_s25 + $0x540] sm:$0xff] }
 0x1ed   : > { %1489 = vmatmul.f32.gmra.mxu3 %v347_v17 }
 0x1ee   : > { %v973_v30 = vpop.f32.mrf.mxu2  ;;  %v1199_v34 = vpop.f32.mrf.mxu0 }
 0x1ef   : > { %v974_v39 = vadd.f32 %v973_v30, %v861_v53  ;;  %v374_v53 = vld [vmem:[%s1986_s25 + $0x548] sm:$0xff] }
 0x1f0   : > { %v1086_v27 = vpop.f32.mrf.mxu3  ;;  %v1219_v47 = vpop.f32.mrf.mxu1 }
 0x1f1   : > { %v1087_v61 = vadd.f32 %v1086_v27, %v974_v39  ;;  %1602 = vmatmul.f32.gmra.mxu0 %v348_v38  ;;  %v1220_v1 = vadd.f32 %v1219_v47, %v2531_v31 }
 0x1f3   : > { %v2811_v55 = vadd.f32 %v1199_v34, %v1087_v61  ;;  %1266 = vmatmul.f32.gmra.mxu1 %v354_v13  ;;  %1379 = vmatmul.f32.gmra.mxu2 %v355_v44  ;;  %v375_v13 = vld [vmem:[%s1986_s25 + $0x550] sm:$0xff] }
 0x1f5   : > { %1492 = vmatmul.f32.gmra.mxu3 %v356_v28 }
 0x1f6   : > { %v1332_v45 = vpop.f32.mrf.mxu2  ;;  %v1558_v56 = vpop.f32.mrf.mxu0 }
 0x1f7   : > { %v1333_v2 = vadd.f32 %v1332_v45, %v1220_v1  ;;  %v381_v45 = vld [vmem:[%s1986_s25 + $0x580] sm:$0xff] }
 0x1f8   : > { %v1222_v36 = vpop.f32.mrf.mxu1  ;;  %v1445_v57 = vpop.f32.mrf.mxu3 }
 0x1f9   : > { %v1446_v8 = vadd.f32 %v1445_v57, %v1333_v2  ;;  %1605 = vmatmul.f32.gmra.mxu0 %v357_v7  ;;  %v1223_v31 = vadd.f32 %v1222_v36, %v2541_v59  ;;  %v383_v2 = vld [vmem:[%s1986_s25 + $0x590] sm:$0xff] }
 0x1fb   : > { %v1559_v15 = vadd.f32 %v1558_v56, %v1446_v8  ;;  %1269 = vmatmul.f32.gmra.mxu1 %v363_v23  ;;  %1382 = vmatmul.f32.gmra.mxu2 %v364_v62  ;;  %v382_v56 = vld [vmem:[%s1986_s25 + $0x588] sm:$0xff] }
 0x1fd   : > { %1654 = vst [vmem:[%s1981_s22] sm:$0xff] %v1559_v15  ;;  %1495 = vmatmul.f32.gmra.mxu3 %v365_v37  ;;  %v1727_v59 = vmul.f32 %v1559_v15, %v1559_v15  ;;  %v384_v37 = vld [vmem:[%s1986_s25 + $0x598] sm:$0xff] }
 0x1fe   : > { %v1335_v18 = vpop.f32.mrf.mxu2  ;;  %v1561_v4 = vpop.f32.mrf.mxu0 }
 0x1ff   : > { %v1336_v16 = vadd.f32 %v1335_v18, %v1223_v31 }
 0x200   : > { %v1225_v50 = vpop.f32.mrf.mxu1  ;;  %v1448_v3 = vpop.f32.mrf.mxu3 }
 0x201   : > { %v1449_v17 = vadd.f32 %v1448_v3, %v1336_v16  ;;  %1608 = vmatmul.f32.gmra.mxu0 %v366_v19  ;;  %v1226_v34 = vadd.f32 %v1225_v50, %v2557_v21  ;;  %v390_v19 = vld [vmem:[%s1986_s25 + $0x5c8] sm:$0xff]  ;;  %v391_v16 = vld [vmem:[%s1986_s25 + $0x5d0] sm:$0xff]  ;;  %v392_v3 = vld [vmem:[%s1986_s25 + $0x5d8] sm:$0xff] }
 0x203   : > { %v1562_v30 = vadd.f32 %v1561_v4, %v1449_v17  ;;  %1272 = vmatmul.f32.gmra.mxu1 %v372_v33  ;;  %1385 = vmatmul.f32.gmra.mxu2 %v373_v52 }
 0x205   : > { %1655 = vst [vmem:[%s1981_s22 + $0x8] sm:$0xff] %v1562_v30  ;;  %v1687_v38 = vadd.f32 %v1562_v30, %v1559_v15  ;;  %v1728_v39 = vmul.f32 %v1562_v30, %v1562_v30  ;;  %1498 = vmatmul.f32.gmra.mxu3 %v374_v53 }
 0x206   : > { %v1338_v27 = vpop.f32.mrf.mxu2  ;;  %v1564_v47 = vpop.f32.mrf.mxu0 }
 0x207   : > { %v1759_v44 = vadd.f32 %v1728_v39, %v1727_v59  ;;  %v1339_v61 = vadd.f32 %v1338_v27, %v1226_v34  ;;  %v393_v59 = vld [vmem:[%s1986_s25 + $0x5e0] sm:$0xff] }
 0x208   : > { %v1228_v28 = vpop.f32.mrf.mxu1  ;;  %v1451_v1 = vpop.f32.mrf.mxu3 }
 0x209   : > { %v1452_v7 = vadd.f32 %v1451_v1, %v1339_v61  ;;  %1611 = vmatmul.f32.gmra.mxu0 %v375_v13  ;;  %v1229_v36 = vadd.f32 %v1228_v28, %v2567_v43  ;;  %v400_v13 = vld [vmem:[%s1986_s25 + $0x618] sm:$0xff]  ;;  %v401_v61 = vld [vmem:[%s1986_s25 + $0x620] sm:$0xff] }
 0x20b   : > { %v1565_v21 = vadd.f32 %v1564_v47, %v1452_v7  ;;  %1275 = vmatmul.f32.gmra.mxu1 %v381_v45  ;;  %1388 = vmatmul.f32.gmra.mxu2 %v382_v56  ;;  %v399_v47 = vld [vmem:[%s1986_s25 + $0x610] sm:$0xff] }
 0x20d   : > { %1656 = vst [vmem:[%s1981_s22 + $0x10] sm:$0xff] %v1565_v21  ;;  %v1688_v57 = vadd.f32 %v1687_v38, %v1565_v21  ;;  %v1729_v23 = vmul.f32 %v1565_v21, %v1565_v21  ;;  %1501 = vmatmul.f32.gmra.mxu3 %v383_v2  ;;  %v402_v2 = vld [vmem:[%s1986_s25 + $0x628] sm:$0xff] }
 0x20e   : > { %v1341_v62 = vpop.f32.mrf.mxu2  ;;  %v1567_v8 = vpop.f32.mrf.mxu0 }
 0x20f   : > { %v1760_v15 = vadd.f32 %v1759_v44, %v1729_v23  ;;  %v1342_v31 = vadd.f32 %v1341_v62, %v1229_v36  ;;  %v408_v62 = vld [vmem:[%s1986_s25 + $0x658] sm:$0xff] }
 0x210   : > { %v1231_v18 = vpop.f32.mrf.mxu1  ;;  %v1454_v4 = vpop.f32.mrf.mxu3 }
 0x211   : > { %v1455_v50 = vadd.f32 %v1454_v4, %v1342_v31  ;;  %1614 = vmatmul.f32.gmra.mxu0 %v384_v37  ;;  %v1232_v33 = vadd.f32 %v1231_v18, %v2583_v11 }
 0x213   : > { %v1568_v43 = vadd.f32 %v1567_v8, %v1455_v50  ;;  %1278 = vmatmul.f32.gmra.mxu1 %v390_v19  ;;  %1391 = vmatmul.f32.gmra.mxu2 %v391_v16  ;;  %v409_v8 = vld [vmem:[%s1986_s25 + $0x660] sm:$0xff]  ;;  %v411_v50 = vld [vmem:[%s1986_s25 + $0x670] sm:$0xff] }
 0x215   : > { %1657 = vst [vmem:[%s1981_s22 + $0x18] sm:$0xff] %v1568_v43  ;;  %v1689_v52 = vadd.f32 %v1688_v57, %v1568_v43  ;;  %v1730_v17 = vmul.f32 %v1568_v43, %v1568_v43  ;;  %1504 = vmatmul.f32.gmra.mxu3 %v392_v3 }
 0x216   : > { %v1344_v53 = vpop.f32.mrf.mxu2  ;;  %v1570_v30 = vpop.f32.mrf.mxu0 }
 0x217   : > { %v1761_v34 = vadd.f32 %v1760_v15, %v1730_v17  ;;  %v1345_v38 = vadd.f32 %v1344_v53, %v1232_v33  ;;  %v410_v15 = vld [vmem:[%s1986_s25 + $0x668] sm:$0xff]  ;;  %v417_v17 = vld [vmem:[%s1986_s25 + $0x6a0] sm:$0xff] }
 0x218   : > { %v1234_v39 = vpop.f32.mrf.mxu1  ;;  %v1457_v27 = vpop.f32.mrf.mxu3  ;;  %v418_v53 = vld [vmem:[%s1986_s25 + $0x6a8] sm:$0xff] }
 0x219   : > { %v1458_v44 = vadd.f32 %v1457_v27, %v1345_v38  ;;  %1617 = vmatmul.f32.gmra.mxu0 %v393_v59  ;;  %v1235_v28 = vadd.f32 %v1234_v39, %v2593_v32  ;;  %v419_v59 = vld [vmem:[%s1986_s25 + $0x6b0] sm:$0xff] }
 0x21b   : > { %v1571_v11 = vadd.f32 %v1570_v30, %v1458_v44  ;;  %1281 = vmatmul.f32.gmra.mxu1 %v399_v47  ;;  %1394 = vmatmul.f32.gmra.mxu2 %v400_v13  ;;  %v420_v13 = vld [vmem:[%s1986_s25 + $0x6b8] sm:$0xff] }
 0x21d   : > { %1658 = vst [vmem:[%s1981_s22 + $0x20] sm:$0xff] %v1571_v11  ;;  %v1690_v1 = vadd.f32 %v1689_v52, %v1571_v11  ;;  %v1731_v45 = vmul.f32 %v1571_v11, %v1571_v11  ;;  %1507 = vmatmul.f32.gmra.mxu3 %v401_v61 }
 0x21e   : > { %v1347_v56 = vpop.f32.mrf.mxu2  ;;  %v1573_v7 = vpop.f32.mrf.mxu0 }
 0x21f   : > { %v1762_v21 = vadd.f32 %v1761_v34, %v1731_v45  ;;  %v1348_v36 = vadd.f32 %v1347_v56, %v1235_v28  ;;  %v427_v45 = vld [vmem:[%s1986_s25 + $0x6f0] sm:$0xff] }
 0x220   : > { %v1237_v57 = vpop.f32.mrf.mxu1  ;;  %v1460_v23 = vpop.f32.mrf.mxu3 }
 0x221   : > { %v1461_v37 = vadd.f32 %v1460_v23, %v1348_v36  ;;  %1620 = vmatmul.f32.gmra.mxu0 %v402_v2  ;;  %v1238_v31 = vadd.f32 %v1237_v57, %v2609_v0 }
 0x223   : > { %v1574_v32 = vadd.f32 %v1573_v7, %v1461_v37  ;;  %1284 = vmatmul.f32.gmra.mxu1 %v408_v62  ;;  %1397 = vmatmul.f32.gmra.mxu2 %v409_v8  ;;  %v428_v7 = vld [vmem:[%s1986_s25 + $0x6f8] sm:$0xff]  ;;  %v429_v62 = vld [vmem:[%s1986_s25 + $0x700] sm:$0xff] }
 0x225   : > { %1659 = vst [vmem:[%s1981_s22 + $0x28] sm:$0xff] %v1574_v32  ;;  %v1691_v18 = vadd.f32 %v1690_v1, %v1574_v32  ;;  %v1732_v4 = vmul.f32 %v1574_v32, %v1574_v32  ;;  %1510 = vmatmul.f32.gmra.mxu3 %v410_v15  ;;  %v426_v1 = vld [vmem:[%s1986_s25 + $0x6e8] sm:$0xff] }
 0x226   : > { %v1350_v19 = vpop.f32.mrf.mxu2  ;;  %v1576_v16 = vpop.f32.mrf.mxu0 }
 0x227   : > { %v1763_v3 = vadd.f32 %v1762_v21, %v1732_v4  ;;  %v1351_v43 = vadd.f32 %v1350_v19, %v1238_v31  ;;  %v435_v31 = vld [vmem:[%s1986_s25 + $0x730] sm:$0xff]  ;;  %v437_v19 = vld [vmem:[%s1986_s25 + $0x740] sm:$0xff] }
 0x228   : > { %v1240_v33 = vpop.f32.mrf.mxu1  ;;  %v1463_v52 = vpop.f32.mrf.mxu3 }
 0x229   : > { %v1464_v30 = vadd.f32 %v1463_v52, %v1351_v43  ;;  %1623 = vmatmul.f32.gmra.mxu0 %v411_v50  ;;  %v1241_v34 = vadd.f32 %v1240_v33, %v2619_v22  ;;  %v438_v52 = vld [vmem:[%s1986_s25 + $0x748] sm:$0xff] }
 0x22b   : > { %v1577_v0 = vadd.f32 %v1576_v16, %v1464_v30  ;;  %1287 = vmatmul.f32.gmra.mxu1 %v417_v17  ;;  %1400 = vmatmul.f32.gmra.mxu2 %v418_v53 }
 0x22d   : > { %1660 = vst [vmem:[%s1981_s22 + $0x30] sm:$0xff] %v1577_v0  ;;  %v1692_v38 = vadd.f32 %v1691_v18, %v1577_v0  ;;  %v1733_v39 = vmul.f32 %v1577_v0, %v1577_v0  ;;  %1513 = vmatmul.f32.gmra.mxu3 %v419_v59  ;;  %v436_v18 = vld [vmem:[%s1986_s25 + $0x738] sm:$0xff] }
 0x22e   : > { %v1353_v27 = vpop.f32.mrf.mxu2  ;;  %v1579_v47 = vpop.f32.mrf.mxu0  ;;  %v444_v0 = vld [vmem:[%s1986_s25 + $0x778] sm:$0xff] }
 0x22f   : > { %v1764_v44 = vadd.f32 %v1763_v3, %v1733_v39  ;;  %v1354_v61 = vadd.f32 %v1353_v27, %v1241_v34  ;;  %v445_v34 = vld [vmem:[%s1986_s25 + $0x780] sm:$0xff]  ;;  %v446_v39 = vld [vmem:[%s1986_s25 + $0x788] sm:$0xff] }
 0x230   : > { %v1243_v11 = vpop.f32.mrf.mxu1  ;;  %v1466_v28 = vpop.f32.mrf.mxu3 }
 0x231   : > { %v1467_v56 = vadd.f32 %v1466_v28, %v1354_v61  ;;  %1626 = vmatmul.f32.gmra.mxu0 %v420_v13  ;;  %v1244_v2 = vadd.f32 %v1243_v11, %v2635_v46  ;;  %v447_v11 = vld [vmem:[%s1986_s25 + $0x790] sm:$0xff] }
 0x233   : > { %v1580_v22 = vadd.f32 %v1579_v47, %v1467_v56  ;;  %1290 = vmatmul.f32.gmra.mxu1 %v426_v1  ;;  %1403 = vmatmul.f32.gmra.mxu2 %v427_v45 }
 0x235   : > { %1661 = vst [vmem:[%s1981_s22 + $0x38] sm:$0xff] %v1580_v22  ;;  %v1693_v21 = vadd.f32 %v1692_v38, %v1580_v22  ;;  %v1734_v36 = vmul.f32 %v1580_v22, %v1580_v22  ;;  %1516 = vmatmul.f32.gmra.mxu3 %v428_v7  ;;  %v453_v7 = vld [vmem:[%s1986_s25 + $0x7c0] sm:$0xff]  ;;  %v454_v22 = vld [vmem:[%s1986_s25 + $0x7c8] sm:$0xff] }
 0x236   : > { %v1356_v57 = vpop.f32.mrf.mxu2  ;;  %v1582_v23 = vpop.f32.mrf.mxu0 }
 0x237   : > { %v1765_v8 = vadd.f32 %v1764_v44, %v1734_v36  ;;  %v1357_v37 = vadd.f32 %v1356_v57, %v1244_v2 }
 0x238   : > { %v1246_v15 = vpop.f32.mrf.mxu1  ;;  %v1469_v32 = vpop.f32.mrf.mxu3 }
 0x239   : > { %v1470_v4 = vadd.f32 %v1469_v32, %v1357_v37  ;;  %1629 = vmatmul.f32.gmra.mxu0 %v429_v62  ;;  %v1247_v16 = vadd.f32 %v1246_v15, %v2645_v12  ;;  %v456_v37 = vld [vmem:[%s1986_s25 + $0x7d8] sm:$0xff] }
 0x23b   : > { %v1583_v46 = vadd.f32 %v1582_v23, %v1470_v4  ;;  %1293 = vmatmul.f32.gmra.mxu1 %v435_v31  ;;  %1406 = vmatmul.f32.gmra.mxu2 %v436_v18  ;;  %v462_v4 = vld [vmem:[%s1986_s25 + $0x808] sm:$0xff] }
 0x23d   : > { %1662 = vst [vmem:[%s1981_s22 + $0x40] sm:$0xff] %v1583_v46  ;;  %v1694_v50 = vadd.f32 %v1693_v21, %v1583_v46  ;;  %v1735_v3 = vmul.f32 %v1583_v46, %v1583_v46  ;;  %1519 = vmatmul.f32.gmra.mxu3 %v437_v19  ;;  %v455_v21 = vld [vmem:[%s1986_s25 + $0x7d0] sm:$0xff] }
 0x23e   : > { %v1359_v43 = vpop.f32.mrf.mxu2  ;;  %v1585_v33 = vpop.f32.mrf.mxu0  ;;  %v463_v19 = vld [vmem:[%s1986_s25 + $0x810] sm:$0xff] }
 0x23f   : > { %v1766_v17 = vadd.f32 %v1765_v8, %v1735_v3  ;;  %v1360_v53 = vadd.f32 %v1359_v43, %v1247_v16  ;;  %v464_v16 = vld [vmem:[%s1986_s25 + $0x818] sm:$0xff] }
 0x240   : > { %v1249_v30 = vpop.f32.mrf.mxu1  ;;  %v1472_v59 = vpop.f32.mrf.mxu3 }
 0x241   : > { %v1473_v38 = vadd.f32 %v1472_v59, %v1360_v53  ;;  %1632 = vmatmul.f32.gmra.mxu0 %v438_v52  ;;  %v1250_v27 = vadd.f32 %v1249_v30, %v2661_v35 }
 0x243   : > { %v1586_v12 = vadd.f32 %v1585_v33, %v1473_v38  ;;  %1296 = vmatmul.f32.gmra.mxu1 %v444_v0  ;;  %1409 = vmatmul.f32.gmra.mxu2 %v445_v34  ;;  %v471_v34 = vld [vmem:[%s1986_s25 + $0x850] sm:$0xff]  ;;  %v472_v38 = vld [vmem:[%s1986_s25 + $0x858] sm:$0xff] }
 0x245   : > { %1663 = vst [vmem:[%s1981_s22 + $0x48] sm:$0xff] %v1586_v12  ;;  %v1695_v47 = vadd.f32 %v1694_v50, %v1586_v12  ;;  %v1736_v13 = vmul.f32 %v1586_v12, %v1586_v12  ;;  %1522 = vmatmul.f32.gmra.mxu3 %v446_v39  ;;  %v473_v12 = vld [vmem:[%s1986_s25 + $0x860] sm:$0xff] }
 0x246   : > { %v1362_v44 = vpop.f32.mrf.mxu2  ;;  %v1588_v61 = vpop.f32.mrf.mxu0 }
 0x247   : > { %v1767_v28 = vadd.f32 %v1766_v17, %v1736_v13  ;;  %v1363_v1 = vadd.f32 %v1362_v44, %v1250_v27  ;;  %v465_v17 = vld [vmem:[%s1986_s25 + $0x820] sm:$0xff] }
 0x248   : > { %v1252_v45 = vpop.f32.mrf.mxu1  ;;  %v1475_v56 = vpop.f32.mrf.mxu3 }
 0x249   : > { %v1476_v2 = vadd.f32 %v1475_v56, %v1363_v1  ;;  %1635 = vmatmul.f32.gmra.mxu0 %v447_v11  ;;  %v1253_v36 = vadd.f32 %v1252_v45, %v2671_v58  ;;  %v474_v11 = vld [vmem:[%s1986_s25 + $0x868] sm:$0xff] }
 0x24b   : > { %v1589_v35 = vadd.f32 %v1588_v61, %v1476_v2  ;;  %1299 = vmatmul.f32.gmra.mxu1 %v453_v7  ;;  %1412 = vmatmul.f32.gmra.mxu2 %v454_v22  ;;  %v480_v7 = vld [vmem:[%s1986_s25 + $0x898] sm:$0xff]  ;;  %v481_v22 = vld [vmem:[%s1986_s25 + $0x8a0] sm:$0xff] }
 0x24d   : > { %1664 = vst [vmem:[%s1981_s22 + $0x50] sm:$0xff] %v1589_v35  ;;  %v1696_v57 = vadd.f32 %v1695_v47, %v1589_v35  ;;  %v1737_v23 = vmul.f32 %v1589_v35, %v1589_v35  ;;  %1525 = vmatmul.f32.gmra.mxu3 %v455_v21  ;;  %v482_v21 = vld [vmem:[%s1986_s25 + $0x8a8] sm:$0xff] }
 0x24e   : > { %v1365_v62 = vpop.f32.mrf.mxu2  ;;  %v1591_v8 = vpop.f32.mrf.mxu0 }
 0x24f   : > { %v1768_v15 = vadd.f32 %v1767_v28, %v1737_v23  ;;  %v1366_v32 = vadd.f32 %v1365_v62, %v1253_v36 }
 0x250   : > { %v1255_v31 = vpop.f32.mrf.mxu1  ;;  %v1478_v18 = vpop.f32.mrf.mxu3 }
 0x251   : > { %v1479_v46 = vadd.f32 %v1478_v18, %v1366_v32  ;;  %1638 = vmatmul.f32.gmra.mxu0 %v456_v37  ;;  %v1256_v50 = vadd.f32 %v1255_v31, %v2678_v20  ;;  %v489_v18 = vld [vmem:[%s1986_s25 + $0x8e0] sm:$0xff] }
 0x253   : > { %v1592_v58 = vadd.f32 %v1591_v8, %v1479_v46  ;;  %1302 = vmatmul.f32.gmra.mxu1 %v462_v4  ;;  %1415 = vmatmul.f32.gmra.mxu2 %v463_v19  ;;  %v483_v8 = vld [vmem:[%s1986_s25 + $0x8b0] sm:$0xff]  ;;  %v490_v4 = vld [vmem:[%s1986_s25 + $0x8e8] sm:$0xff] }
 0x254   : > { %v491_v46 = vld [vmem:[%s1986_s25 + $0x8f0] sm:$0xff] }
 0x255   : > { %1665 = vst [vmem:[%s1981_s22 + $0x58] sm:$0xff] %v1592_v58  ;;  %v1697_v3 = vadd.f32 %v1696_v57, %v1592_v58  ;;  %v1738_v43 = vmul.f32 %v1592_v58, %v1592_v58  ;;  %1528 = vmatmul.f32.gmra.mxu3 %v464_v16 }
 0x256   : > { %v1368_v33 = vpop.f32.mrf.mxu2  ;;  %v1594_v52 = vpop.f32.mrf.mxu0 }
 0x257   : > { %v1769_v53 = vadd.f32 %v1768_v15, %v1738_v43  ;;  %v1369_v30 = vadd.f32 %v1368_v33, %v1256_v50  ;;  %v492_v33 = vld [vmem:[%s1986_s25 + $0x8f8] sm:$0xff] }
 0x258   : > { %v1258_v59 = vpop.f32.mrf.mxu1  ;;  %v1481_v0 = vpop.f32.mrf.mxu3 }
 0x259   : > { %v1482_v39 = vadd.f32 %v1481_v0, %v1369_v30  ;;  %1641 = vmatmul.f32.gmra.mxu0 %v465_v17  ;;  %v1259_v27 = vadd.f32 %v1258_v59, %v2685_v40 }
 0x25b   : > { %v1595_v20 = vadd.f32 %v1594_v52, %v1482_v39  ;;  %1305 = vmatmul.f32.gmra.mxu1 %v471_v34  ;;  %1418 = vmatmul.f32.gmra.mxu2 %v472_v38 }
 0x25d   : > { %1666 = vst [vmem:[%s1981_s22 + $0x60] sm:$0xff] %v1595_v20  ;;  %v1698_v47 = vadd.f32 %v1697_v3, %v1595_v20  ;;  %v1739_v13 = vmul.f32 %v1595_v20, %v1595_v20  ;;  %1531 = vmatmul.f32.gmra.mxu3 %v473_v12 }
 0x25e   : > { %v1371_v44 = vpop.f32.mrf.mxu2  ;;  %v1597_v61 = vpop.f32.mrf.mxu0 }
 0x25f   : > { %v1770_v28 = vadd.f32 %v1769_v53, %v1739_v13  ;;  %v1372_v1 = vadd.f32 %v1371_v44, %v1259_v27 }
 0x260   : > { %v1261_v45 = vpop.f32.mrf.mxu1  ;;  %v1484_v56 = vpop.f32.mrf.mxu3 }
 0x261   : > { %v1485_v2 = vadd.f32 %v1484_v56, %v1372_v1  ;;  %1644 = vmatmul.f32.gmra.mxu0 %v474_v11  ;;  %v1262_v35 = vadd.f32 %v1261_v45, %v2692_v5 }
 0x263   : > { %v1598_v40 = vadd.f32 %v1597_v61, %v1485_v2  ;;  %1308 = vmatmul.f32.gmra.mxu1 %v480_v7  ;;  %1421 = vmatmul.f32.gmra.mxu2 %v481_v22 }
 0x265   : > { %1667 = vst [vmem:[%s1981_s22 + $0x68] sm:$0xff] %v1598_v40  ;;  %v1699_v36 = vadd.f32 %v1698_v47, %v1598_v40  ;;  %v1740_v57 = vmul.f32 %v1598_v40, %v1598_v40  ;;  %1534 = vmatmul.f32.gmra.mxu3 %v482_v21 }
 0x266   : > { %v1374_v23 = vpop.f32.mrf.mxu2  ;;  %v1600_v62 = vpop.f32.mrf.mxu0 }
 0x267   : > { %v1771_v37 = vadd.f32 %v1770_v28, %v1740_v57  ;;  %v1375_v15 = vadd.f32 %v1374_v23, %v1262_v35 }
 0x268   : > { %v1264_v32 = vpop.f32.mrf.mxu1  ;;  %v1487_v31 = vpop.f32.mrf.mxu3 }
 0x269   : > { %v1488_v19 = vadd.f32 %v1487_v31, %v1375_v15  ;;  %1647 = vmatmul.f32.gmra.mxu0 %v483_v8  ;;  %v1265_v16 = vadd.f32 %v1264_v32, %v2699_v63 }
 0x26b   : > { %v1601_v5 = vadd.f32 %v1600_v62, %v1488_v19  ;;  %1311 = vmatmul.f32.gmra.mxu1 %v489_v18  ;;  %1424 = vmatmul.f32.gmra.mxu2 %v490_v4 }
 0x26d   : > { %1668 = vst [vmem:[%s1981_s22 + $0x70] sm:$0xff] %v1601_v5  ;;  %v1700_v58 = vadd.f32 %v1699_v36, %v1601_v5  ;;  %v1741_v50 = vmul.f32 %v1601_v5, %v1601_v5  ;;  %1537 = vmatmul.f32.gmra.mxu3 %v491_v46 }
 0x26e   : > { %v1377_v3 = vpop.f32.mrf.mxu2  ;;  %v1603_v43 = vpop.f32.mrf.mxu0 }
 0x26f   : > { %v1772_v52 = vadd.f32 %v1771_v37, %v1741_v50  ;;  %v1378_v17 = vadd.f32 %v1377_v3, %v1265_v16 }
 0x270   : > { %v1267_v53 = vpop.f32.mrf.mxu1  ;;  %v1490_v30 = vpop.f32.mrf.mxu3 }
 0x271   : > { %v1491_v59 = vadd.f32 %v1490_v30, %v1378_v17  ;;  %1650 = vmatmul.f32.gmra.mxu0 %v492_v33  ;;  %v1268_v34 = vadd.f32 %v1267_v53, %v2706_v41 }
 0x273   : > { %v1604_v0 = vadd.f32 %v1603_v43, %v1491_v59 }
 0x275   : > { %1669 = vst [vmem:[%s1981_s22 + $0x78] sm:$0xff] %v1604_v0  ;;  %v1701_v63 = vadd.f32 %v1700_v58, %v1604_v0  ;;  %v1742_v38 = vmul.f32 %v1604_v0, %v1604_v0 }
 0x276   : > { %v1380_v39 = vpop.f32.mrf.mxu2  ;;  %v1606_v12 = vpop.f32.mrf.mxu0 }
 0x277   : > { %v1773_v20 = vadd.f32 %v1772_v52, %v1742_v38  ;;  %v1381_v27 = vadd.f32 %v1380_v39, %v1268_v34 }
 0x278   : > { %v1270_v47 = vpop.f32.mrf.mxu1  ;;  %v1493_v13 = vpop.f32.mrf.mxu3 }
 0x279   : > { %v1494_v44 = vadd.f32 %v1493_v13, %v1381_v27  ;;  %v1271_v11 = vadd.f32 %v1270_v47, %v2713_v6 }
 0x27b   : > { %v1607_v61 = vadd.f32 %v1606_v12, %v1494_v44 }
 0x27d   : > { %1670 = vst [vmem:[%s1981_s22 + $0x80] sm:$0xff] %v1607_v61  ;;  %v1702_v28 = vadd.f32 %v1701_v63, %v1607_v61  ;;  %v1743_v1 = vmul.f32 %v1607_v61, %v1607_v61 }
 0x27e   : > { %v1383_v45 = vpop.f32.mrf.mxu2  ;;  %v1609_v56 = vpop.f32.mrf.mxu0 }
 0x27f   : > { %v1774_v41 = vadd.f32 %v1773_v20, %v1743_v1  ;;  %v1384_v7 = vadd.f32 %v1383_v45, %v1271_v11 }
 0x280   : > { %v1273_v22 = vpop.f32.mrf.mxu1  ;;  %v1496_v2 = vpop.f32.mrf.mxu3 }
 0x281   : > { %v1497_v21 = vadd.f32 %v1496_v2, %v1384_v7  ;;  %v1274_v35 = vadd.f32 %v1273_v22, %v2720_v25 }
 0x283   : > { %v1610_v40 = vadd.f32 %v1609_v56, %v1497_v21 }
 0x285   : > { %1671 = vst [vmem:[%s1981_s22 + $0x88] sm:$0xff] %v1610_v40  ;;  %v1703_v36 = vadd.f32 %v1702_v28, %v1610_v40  ;;  %v1744_v57 = vmul.f32 %v1610_v40, %v1610_v40 }
 0x286   : > { %v1386_v23 = vpop.f32.mrf.mxu2  ;;  %v1612_v62 = vpop.f32.mrf.mxu0 }
 0x287   : > { %v1775_v6 = vadd.f32 %v1774_v41, %v1744_v57  ;;  %v1387_v8 = vadd.f32 %v1386_v23, %v1274_v35 }
 0x288   : > { %v1276_v37 = vpop.f32.mrf.mxu1  ;;  %v1499_v15 = vpop.f32.mrf.mxu3 }
 0x289   : > { %v1500_v32 = vadd.f32 %v1499_v15, %v1387_v8  ;;  %v1277_v18 = vadd.f32 %v1276_v37, %v2727_v42 }
 0x28b   : > { %v1613_v31 = vadd.f32 %v1612_v62, %v1500_v32 }
 0x28d   : > { %1672 = vst [vmem:[%s1981_s22 + $0x90] sm:$0xff] %v1613_v31  ;;  %v1704_v4 = vadd.f32 %v1703_v36, %v1613_v31  ;;  %v1745_v19 = vmul.f32 %v1613_v31, %v1613_v31 }
 0x28e   : > { %v1389_v46 = vpop.f32.mrf.mxu2  ;;  %v1615_v5 = vpop.f32.mrf.mxu0 }
 0x28f   : > { %v1776_v25 = vadd.f32 %v1775_v6, %v1745_v19  ;;  %v1390_v16 = vadd.f32 %v1389_v46, %v1277_v18 }
 0x290   : > { %v1279_v58 = vpop.f32.mrf.mxu1  ;;  %v1502_v50 = vpop.f32.mrf.mxu3 }
 0x291   : > { %v1503_v3 = vadd.f32 %v1502_v50, %v1390_v16  ;;  %v1280_v33 = vadd.f32 %v1279_v58, %v2734_v24 }
 0x293   : > { %v1616_v43 = vadd.f32 %v1615_v5, %v1503_v3 }
 0x295   : > { %1673 = vst [vmem:[%s1981_s22 + $0x98] sm:$0xff] %v1616_v43  ;;  %v1705_v52 = vadd.f32 %v1704_v4, %v1616_v43  ;;  %v1746_v17 = vmul.f32 %v1616_v43, %v1616_v43 }
 0x296   : > { %v1392_v53 = vpop.f32.mrf.mxu2  ;;  %v1618_v30 = vpop.f32.mrf.mxu0 }
 0x297   : > { %v1777_v42 = vadd.f32 %v1776_v25, %v1746_v17  ;;  %v1393_v59 = vadd.f32 %v1392_v53, %v1280_v33 }
 0x298   : > { %v1282_v0 = vpop.f32.mrf.mxu1  ;;  %v1505_v34 = vpop.f32.mrf.mxu3 }
 0x299   : > { %v1506_v63 = vadd.f32 %v1505_v34, %v1393_v59  ;;  %v1283_v39 = vadd.f32 %v1282_v0, %v2741_v26 }
 0x29b   : > { %v1619_v38 = vadd.f32 %v1618_v30, %v1506_v63 }
 0x29d   : > { %1674 = vst [vmem:[%s1981_s22 + $0xa0] sm:$0xff] %v1619_v38  ;;  %v1706_v12 = vadd.f32 %v1705_v52, %v1619_v38  ;;  %v1747_v20 = vmul.f32 %v1619_v38, %v1619_v38 }
 0x29e   : > { %v1395_v27 = vpop.f32.mrf.mxu2  ;;  %v1621_v47 = vpop.f32.mrf.mxu0 }
 0x29f   : > { %v1778_v24 = vadd.f32 %v1777_v42, %v1747_v20  ;;  %v1396_v13 = vadd.f32 %v1395_v27, %v1283_v39 }
 0x2a0   : > { %v1285_v44 = vpop.f32.mrf.mxu1  ;;  %v1508_v61 = vpop.f32.mrf.mxu3 }
 0x2a1   : > { %v1509_v11 = vadd.f32 %v1508_v61, %v1396_v13  ;;  %v1286_v1 = vadd.f32 %v1285_v44, %v2748_v14 }
 0x2a3   : > { %v1622_v28 = vadd.f32 %v1621_v47, %v1509_v11 }
 0x2a5   : > { %1675 = vst [vmem:[%s1981_s22 + $0xa8] sm:$0xff] %v1622_v28  ;;  %v1707_v45 = vadd.f32 %v1706_v12, %v1622_v28  ;;  %v1748_v56 = vmul.f32 %v1622_v28, %v1622_v28 }
 0x2a6   : > { %v1398_v41 = vpop.f32.mrf.mxu2  ;;  %v1624_v7 = vpop.f32.mrf.mxu0 }
 0x2a7   : > { %v1779_v26 = vadd.f32 %v1778_v24, %v1748_v56  ;;  %v1399_v22 = vadd.f32 %v1398_v41, %v1286_v1 }
 0x2a8   : > { %v1288_v2 = vpop.f32.mrf.mxu1  ;;  %v1511_v21 = vpop.f32.mrf.mxu3 }
 0x2a9   : > { %v1512_v40 = vadd.f32 %v1511_v21, %v1399_v22  ;;  %v1289_v36 = vadd.f32 %v1288_v2, %v2755_v9 }
 0x2ab   : > { %v1625_v35 = vadd.f32 %v1624_v7, %v1512_v40 }
 0x2ad   : > { %1676 = vst [vmem:[%s1981_s22 + $0xb0] sm:$0xff] %v1625_v35  ;;  %v1708_v57 = vadd.f32 %v1707_v45, %v1625_v35  ;;  %v1749_v23 = vmul.f32 %v1625_v35, %v1625_v35 }
 0x2ae   : > { %v1401_v62 = vpop.f32.mrf.mxu2  ;;  %v1627_v6 = vpop.f32.mrf.mxu0 }
 0x2af   : > { %v1780_v14 = vadd.f32 %v1779_v26, %v1749_v23  ;;  %v1402_v8 = vadd.f32 %v1401_v62, %v1289_v36 }
 0x2b0   : > { %v1291_v37 = vpop.f32.mrf.mxu1  ;;  %v1514_v15 = vpop.f32.mrf.mxu3 }
 0x2b1   : > { %v1515_v32 = vadd.f32 %v1514_v15, %v1402_v8  ;;  %v1292_v18 = vadd.f32 %v1291_v37, %v2762_v48 }
 0x2b3   : > { %v1628_v31 = vadd.f32 %v1627_v6, %v1515_v32 }
 0x2b5   : > { %1677 = vst [vmem:[%s1981_s22 + $0xb8] sm:$0xff] %v1628_v31  ;;  %v1709_v4 = vadd.f32 %v1708_v57, %v1628_v31  ;;  %v1750_v19 = vmul.f32 %v1628_v31, %v1628_v31 }
 0x2b6   : > { %v1404_v46 = vpop.f32.mrf.mxu2  ;;  %v1630_v5 = vpop.f32.mrf.mxu0 }
 0x2b7   : > { %v1781_v9 = vadd.f32 %v1780_v14, %v1750_v19  ;;  %v1405_v25 = vadd.f32 %v1404_v46, %v1292_v18 }
 0x2b8   : > { %v1294_v16 = vpop.f32.mrf.mxu1  ;;  %v1517_v58 = vpop.f32.mrf.mxu3 }
 0x2b9   : > { %v1518_v50 = vadd.f32 %v1517_v58, %v1405_v25  ;;  %v1295_v43 = vadd.f32 %v1294_v16, %v2769_v49 }
 0x2bb   : > { %v1631_v3 = vadd.f32 %v1630_v5, %v1518_v50 }
 0x2bd   : > { %1678 = vst [vmem:[%s1981_s22 + $0xc0] sm:$0xff] %v1631_v3  ;;  %v1710_v33 = vadd.f32 %v1709_v4, %v1631_v3  ;;  %v1751_v52 = vmul.f32 %v1631_v3, %v1631_v3 }
 0x2be   : > { %v1407_v17 = vpop.f32.mrf.mxu2  ;;  %v1633_v53 = vpop.f32.mrf.mxu0 }
 0x2bf   : > { %v1782_v48 = vadd.f32 %v1781_v9, %v1751_v52  ;;  %v1408_v30 = vadd.f32 %v1407_v17, %v1295_v43 }
 0x2c0   : > { %v1297_v42 = vpop.f32.mrf.mxu1  ;;  %v1520_v59 = vpop.f32.mrf.mxu3 }
 0x2c1   : > { %v1521_v0 = vadd.f32 %v1520_v59, %v1408_v30  ;;  %v1298_v63 = vadd.f32 %v1297_v42, %v2776_v10 }
 0x2c3   : > { %v1634_v34 = vadd.f32 %v1633_v53, %v1521_v0 }
 0x2c5   : > { %1679 = vst [vmem:[%s1981_s22 + $0xc8] sm:$0xff] %v1634_v34  ;;  %v1711_v38 = vadd.f32 %v1710_v33, %v1634_v34  ;;  %v1752_v39 = vmul.f32 %v1634_v34, %v1634_v34 }
 0x2c6   : > { %v1410_v12 = vpop.f32.mrf.mxu2  ;;  %v1636_v20 = vpop.f32.mrf.mxu0 }
 0x2c7   : > { %v1783_v49 = vadd.f32 %v1782_v48, %v1752_v39  ;;  %v1411_v27 = vadd.f32 %v1410_v12, %v1298_v63 }
 0x2c8   : > { %v1300_v47 = vpop.f32.mrf.mxu1  ;;  %v1523_v24 = vpop.f32.mrf.mxu3 }
 0x2c9   : > { %v1524_v13 = vadd.f32 %v1523_v24, %v1411_v27  ;;  %v1301_v61 = vadd.f32 %v1300_v47, %v2783_v29 }
 0x2cb   : > { %v1637_v44 = vadd.f32 %v1636_v20, %v1524_v13 }
 0x2cd   : > { %1680 = vst [vmem:[%s1981_s22 + $0xd0] sm:$0xff] %v1637_v44  ;;  %v1712_v11 = vadd.f32 %v1711_v38, %v1637_v44  ;;  %v1753_v28 = vmul.f32 %v1637_v44, %v1637_v44 }
 0x2ce   : > { %v1413_v1 = vpop.f32.mrf.mxu2  ;;  %v1639_v45 = vpop.f32.mrf.mxu0 }
 0x2cf   : > { %v1784_v10 = vadd.f32 %v1783_v49, %v1753_v28  ;;  %v1414_v56 = vadd.f32 %v1413_v1, %v1301_v61  ;;  %v1686_v28 = vld [vmem:[%s2956_s3] sm:$0x1] }
 0x2d0   : > { %v1303_v41 = vpop.f32.mrf.mxu1  ;;  %v1526_v7 = vpop.f32.mrf.mxu3 }
 0x2d1   : > { %v1527_v26 = vadd.f32 %v1526_v7, %v1414_v56  ;;  %v1304_v2 = vadd.f32 %v1303_v41, %v2790_v54 }
 0x2d3   : > { %v1640_v22 = vadd.f32 %v1639_v45, %v1527_v26 }
 0x2d5   : > { %1681 = vst [vmem:[%s1981_s22 + $0xd8] sm:$0xff] %v1640_v22  ;;  %v1713_v21 = vadd.f32 %v1712_v11, %v1640_v22  ;;  %v1754_v40 = vmul.f32 %v1640_v22, %v1640_v22 }
 0x2d6   : > { %v1416_v35 = vpop.f32.mrf.mxu2  ;;  %v1642_v36 = vpop.f32.mrf.mxu0 }
 0x2d7   : > { %v1785_v29 = vadd.f32 %v1784_v10, %v1754_v40  ;;  %v1417_v57 = vadd.f32 %v1416_v35, %v1304_v2  ;;  %v1726_v10 = vld [vmem:[%s2957_s4] sm:$0x1] }
 0x2d8   : > { %v1306_v23 = vpop.f32.mrf.mxu1  ;;  %v1529_v62 = vpop.f32.mrf.mxu3 }
 0x2d9   : > { %v1530_v6 = vadd.f32 %v1529_v62, %v1417_v57  ;;  %v1307_v8 = vadd.f32 %v1306_v23, %v2797_v51 }
 0x2db   : > { %v1643_v14 = vadd.f32 %v1642_v36, %v1530_v6 }
 0x2dd   : > { %1682 = vst [vmem:[%s1981_s22 + $0xe0] sm:$0xff] %v1643_v14  ;;  %v1714_v37 = vadd.f32 %v1713_v21, %v1643_v14  ;;  %v1755_v15 = vmul.f32 %v1643_v14, %v1643_v14 }
 0x2de   : > { %v1419_v32 = vpop.f32.mrf.mxu2  ;;  %v1645_v31 = vpop.f32.mrf.mxu0 }
 0x2df   : > { %v1786_v54 = vadd.f32 %v1785_v29, %v1755_v15  ;;  %v1420_v18 = vadd.f32 %v1419_v32, %v1307_v8 }
 0x2e0   : > { %v1309_v4 = vpop.f32.mrf.mxu1  ;;  %v1532_v19 = vpop.f32.mrf.mxu3 }
 0x2e1   : > { %v1533_v46 = vadd.f32 %v1532_v19, %v1420_v18  ;;  %v1310_v9 = vadd.f32 %v1309_v4, %v2804_v60 }
 0x2e3   : > { %v1646_v5 = vadd.f32 %v1645_v31, %v1533_v46 }
 0x2e5   : > { %1683 = vst [vmem:[%s1981_s22 + $0xe8] sm:$0xff] %v1646_v5  ;;  %v1715_v25 = vadd.f32 %v1714_v37, %v1646_v5  ;;  %v1756_v16 = vmul.f32 %v1646_v5, %v1646_v5 }
 0x2e6   : > { %v1422_v58 = vpop.f32.mrf.mxu2  ;;  %v1648_v50 = vpop.f32.mrf.mxu0 }
 0x2e7   : > { %v1787_v51 = vadd.f32 %v1786_v54, %v1756_v16  ;;  %v1423_v3 = vadd.f32 %v1422_v58, %v1310_v9 }
 0x2e8   : > { %v1535_v43 = vpop.f32.mrf.mxu3  ;;  %v1312_v52 = vpop.f32.mrf.mxu1 }
 0x2e9   : > { %v1536_v33 = vadd.f32 %v1535_v43, %v1423_v3  ;;  %v1313_v53 = vadd.f32 %v1312_v52, %v2811_v55 }
 0x2eb   : > { %v1649_v17 = vadd.f32 %v1648_v50, %v1536_v33 }
 0x2ed   : > { %1684 = vst [vmem:[%s1981_s22 + $0xf0] sm:$0xff] %v1649_v17  ;;  %v1716_v48 = vadd.f32 %v1715_v25, %v1649_v17  ;;  %v1757_v30 = vmul.f32 %v1649_v17, %v1649_v17 }
 0x2ee   : > { %v1425_v42 = vpop.f32.mrf.mxu2  ;;  %v1651_v34 = vpop.f32.mrf.mxu0 }
 0x2ef   : > { %v1788_v59 = vadd.f32 %v1787_v51, %v1757_v30  ;;  %v1426_v60 = vadd.f32 %v1425_v42, %v1313_v53 }
 0x2f0   : > { %v1538_v0 = vpop.f32.mrf.mxu3 }
 0x2f1   : > { %v1539_v63 = vadd.f32 %v1538_v0, %v1426_v60 }
 0x2f3   : > { %v1652_v38 = vadd.f32 %v1651_v34, %v1539_v63 }
 0x2f5   : > { %1685 = vst [vmem:[%s1981_s22 + $0xf8] sm:$0xff] %v1652_v38  ;;  %v1717_v39 = vadd.f32 %v1716_v48, %v1652_v38  ;;  %v1758_v12 = vmul.f32 %v1652_v38, %v1652_v38 }
 0x2f7   : > { %v1718_v20 = vrot.slane %v1717_v39, 4  ;;  %v1789_v49 = vadd.f32 %v1788_v59, %v1758_v12 }
 0x2f9   : > { %v1719_v27 = vadd.f32 %v1718_v20, %v1717_v39  ;;  %v1790_v47 = vrot.slane %v1789_v49, 4 }
 0x2fb   : > { %v1720_v24 = vrot.slane %v1719_v27, 2  ;;  %v1791_v13 = vadd.f32 %v1790_v47, %v1789_v49 }
 0x2fd   : > { %v1721_v55 = vadd.f32 %v1720_v24, %v1719_v27  ;;  %v1792_v44 = vrot.slane %v1791_v13, 2 }
 0x2ff   : > { %v1722_v61 = vrot.slane %v1721_v55, 1  ;;  %v1793_v11 = vadd.f32 %v1792_v44, %v1791_v13 }
 0x301   : > { %v1723_v1 = vadd.f32 %v1722_v61, %v1721_v55  ;;  %v1794_v45 = vrot.slane %v1793_v11, 1 }
 0x303   : > { %v1724_v56 = vadd.f32 %v1723_v1, %v1686_v28  ;;  %v1795_v41 = vadd.f32 %v1794_v45, %v1793_v11 }
 0x305   : > { %1725 = vst [vmem:[%s2956_s3] sm:$0x1] %v1724_v56  ;;  %v1796_v7 = vadd.f32 %v1795_v41, %v1726_v10 }
 0x307   : > { %1797 = vst [vmem:[%s2957_s4] sm:$0x1] %v1796_v7 }
 0x308 PF: > { %s15_s15 = sadd.s32 1, %s1942_s15  }
 0x309   : > { %p12_p5 = scmp.ge.s32.totalorder %s15_s15, 4  }
 0x30b   :  { %14 = sbr.rel (!%p12_p5) target bundleno = 1 (0x1), region = 78 }

</bundles_post_ra>
